<compile_context>
chip_gen: v7x
topology: tpu7x:2x2x1
jax: 0.10.0
libtpu: 0.0.40
codegen_flags: <defaults>
</compile_context>

<pallas_src>
import math
import functools

import jax
import jax.numpy as jnp
from jax.experimental import pallas as pl
from jax.experimental.pallas import tpu as pltpu

D_MODEL = 32
NHEAD = 4
DIM_FF = 64
NUM_LAYERS = 2
LN_EPS = 1e-5
NEG_INF = -1e9


# ----------------------------- weight-slab layout -----------------------------

def _round_up(x, m):
    return ((x + m - 1) // m) * m


def _layer_layout(D, F):
    """Row-offset layout of one decoder layer's params inside the packed slab."""
    entries = [
        ('sa_wqkv', D, 3 * D), ('sa_bqkv', 1, 3 * D),
        ('sa_wo', D, D), ('sa_bo', 1, D),
        ('ca_wq', D, D), ('ca_bq', 1, D),
        ('ca_wkv', D, 2 * D), ('ca_bkv', 1, 2 * D),
        ('ca_wo', D, D), ('ca_bo', 1, D),
        ('ln1g', 1, D), ('ln1b', 1, D),
        ('ln2g', 1, D), ('ln2b', 1, D),
        ('ln3g', 1, D), ('ln3b', 1, D),
        ('ff_w1', D, F), ('ff_b1', 1, F),
        ('ff_w2', F, D), ('ff_b2', 1, D),
    ]
    layout, off = {}, 0
    for name, rows, cols in entries:
        layout[name] = (off, rows, cols)
        off += _round_up(rows, 8)          # keep every block 8-sublane aligned
    return layout, off                     # off == rows per layer


def _final_layout(D):
    return {'g': (0, 1, D), 'b': (8, 1, D)}, 16


def _slab_width(D, F):
    return _round_up(max(3 * D, 2 * D, F, D), 128)   # lane-dense slab


def pack_slab(layer_params, final_params, D, F):
    layout, layer_rows = _layer_layout(D, F)
    final_layout, final_rows = _final_layout(D)
    W = _slab_width(D, F)
    L = len(layer_params)
    slab = jnp.zeros((L * layer_rows + final_rows, W), jnp.float32)
    for l, p in enumerate(layer_params):
        base = l * layer_rows
        for name, (off, rows, cols) in layout.items():
            slab = slab.at[base + off: base + off + rows, 0:cols].set(
                p[name].reshape(rows, cols).astype(jnp.float32))
    base = L * layer_rows
    for name, (off, rows, cols) in final_layout.items():
        slab = slab.at[base + off: base + off + rows, 0:cols].set(
            final_params[name].reshape(rows, cols).astype(jnp.float32))
    return slab


# ----------------------------- fused decoder kernel -----------------------------

def _decoder_kernel(x_ref, mem_ref, bias_self_ref, bias_cross_ref, slab_ref, out_ref,
                    *, nhead, d_model, num_layers, layout, layer_rows,
                    final_base, final_layout):
    D = d_model
    H = nhead
    hd = D // H
    scale = 1.0 / math.sqrt(hd)

    x = x_ref[...]                       # (B*S, D)
    mem = mem_ref[...]                   # (B*Sm, D)
    bias_self = bias_self_ref[...]       # (B*S, B*S)  causal + cross-batch block mask
    bias_cross = bias_cross_ref[...]     # (B*S, B*Sm) cross-batch block mask

    def w(l, name):                      # static slab slices -> free ref views + load
        off, rows, cols = layout[name]
        r0 = l * layer_rows + off
        return slab_ref[r0:r0 + rows, 0:cols]

    def wf(name):
        off, rows, cols = final_layout[name]
        r0 = final_base + off
        return slab_ref[r0:r0 + rows, 0:cols]

    def layernorm(v, g, b):
        mu = jnp.mean(v, axis=-1, keepdims=True)
        vc = v - mu
        var = jnp.mean(vc * vc, axis=-1, keepdims=True)
        return vc * jax.lax.rsqrt(var + LN_EPS) * g + b

    def mha(q, k, v, wo, bo, bias):
        """Per-head attention with the output projection folded into the head loop."""
        acc = None
        for h in range(H):               # static tiny loop (H=4), no concatenate
            sl = slice(h * hd, (h + 1) * hd)
            s = jax.lax.dot_general(q[:, sl], k[:, sl],
                                    (((1,), (1,)), ((), ())),
                                    preferred_element_type=jnp.float32) * scale + bias
            s = s - jnp.max(s, axis=-1, keepdims=True)
            p = jnp.exp(s)
            p = p * pl.reciprocal(jnp.sum(p, axis=-1, keepdims=True), approx=True)
            ctx = jnp.dot(p, v[:, sl], preferred_element_type=jnp.float32)
            part = jnp.dot(ctx, wo[sl, :], preferred_element_type=jnp.float32)
            acc = part if acc is None else acc + part
        return acc + bo

    for l in range(num_layers):          # static loop, fully fused in one kernel
        # --- self-attention block (post-norm; dropout = identity) ---
        qkv = jnp.dot(x, w(l, 'sa_wqkv'), preferred_element_type=jnp.float32) + w(l, 'sa_bqkv')
        sa = mha(qkv[:, :D], qkv[:, D:2 * D], qkv[:, 2 * D:],
                 w(l, 'sa_wo'), w(l, 'sa_bo'), bias_self)
        x = layernorm(x + sa, w(l, 'ln1g'), w(l, 'ln1b'))

        # --- cross-attention block ---
        q = jnp.dot(x, w(l, 'ca_wq'), preferred_element_type=jnp.float32) + w(l, 'ca_bq')
        kv = jnp.dot(mem, w(l, 'ca_wkv'), preferred_element_type=jnp.float32) + w(l, 'ca_bkv')
        ca = mha(q, kv[:, :D], kv[:, D:], w(l, 'ca_wo'), w(l, 'ca_bo'), bias_cross)
        x = layernorm(x + ca, w(l, 'ln2g'), w(l, 'ln2b'))

        # --- feed-forward block (ReLU) ---
        h1 = jnp.maximum(
            jnp.dot(x, w(l, 'ff_w1'), preferred_element_type=jnp.float32) + w(l, 'ff_b1'), 0.0)
        ff = jnp.dot(h1, w(l, 'ff_w2'), preferred_element_type=jnp.float32) + w(l, 'ff_b2')
        x = layernorm(x + ff, w(l, 'ln3g'), w(l, 'ln3b'))

    # --- final LayerNorm of nn.TransformerDecoder ---
    out_ref[...] = layernorm(x, wf('g'), wf('b')).astype(out_ref.dtype)


# ----------------------------- wrapper -----------------------------

def decoder_forward(tgt, memory, tgt_mask, slab, *, nhead, d_model, dff, num_layers):
    B, S, D = tgt.shape
    Sm = memory.shape[1]

    layout, layer_rows = _layer_layout(d_model, dff)
    final_layout, _ = _final_layout(d_model)
    final_base = num_layers * layer_rows

    # Layout plumbing in the wrapper: present lane/sublane-dense 2-D slabs.
    x2d = tgt.reshape(B * S, D)
    mem2d = memory.reshape(B * Sm, D)

    # Additive attention biases: block-diagonal batch mask (+ tiled user tgt_mask for self-attn).
    qb = jnp.arange(B * S) // S
    kb_s = jnp.arange(B * S) // S
    kb_c = jnp.arange(B * Sm) // Sm
    blk_self = jnp.where(qb[:, None] != kb_s[None, :], NEG_INF, 0.0).astype(jnp.float32)
    blk_cross = jnp.where(qb[:, None] != kb_c[None, :], NEG_INF, 0.0).astype(jnp.float32)
    bias_self = blk_self + jnp.tile(tgt_mask.astype(jnp.float32), (B, B))
    bias_cross = blk_cross

    kernel = functools.partial(
        _decoder_kernel, nhead=nhead, d_model=d_model, num_layers=num_layers,
        layout=layout, layer_rows=layer_rows, final_base=final_base,
        final_layout=final_layout)

    vmem = pl.BlockSpec(memory_space=pltpu.MemorySpace.VMEM)
    out2d = pl.pallas_call(
        kernel,
        out_shape=jax.ShapeDtypeStruct((B * S, D), tgt.dtype),
        in_specs=[vmem, vmem, vmem, vmem, vmem],
        out_specs=vmem,
    )(x2d, mem2d, bias_self, bias_cross, slab)
    return out2d.reshape(B, S, D)


# ----------------------------- deterministic parameter init -----------------------------

def init_params(key, d_model, dff, num_layers):
    """PyTorch-shaped parameters transposed into kernel (x @ W) layout."""
    layers = []
    for _ in range(num_layers):
        key, *ks = jax.random.split(key, 7)
        scale = 0.02
        sa_in_w = jax.random.normal(ks[0], (3 * d_model, d_model), jnp.float32) * scale
        sa_in_b = jnp.zeros((3 * d_model,), jnp.float32)
        sa_out_w = jax.random.normal(ks[1], (d_model, d_model), jnp.float32) * scale
        sa_out_b = jnp.zeros((d_model,), jnp.float32)
        ca_in_w = jax.random.normal(ks[2], (3 * d_model, d_model), jnp.float32) * scale
        ca_in_b = jnp.zeros((3 * d_model,), jnp.float32)
        ca_out_w = jax.random.normal(ks[3], (d_model, d_model), jnp.float32) * scale
        ca_out_b = jnp.zeros((d_model,), jnp.float32)
        w1 = jax.random.normal(ks[4], (dff, d_model), jnp.float32) * scale
        b1 = jnp.zeros((dff,), jnp.float32)
        w2 = jax.random.normal(ks[5], (d_model, dff), jnp.float32) * scale
        b2 = jnp.zeros((d_model,), jnp.float32)

        layers.append(dict(
            sa_wqkv=sa_in_w.T, sa_bqkv=sa_in_b.reshape(1, -1),
            sa_wo=sa_out_w.T, sa_bo=sa_out_b.reshape(1, -1),
            ca_wq=ca_in_w[:d_model].T, ca_bq=ca_in_b[:d_model].reshape(1, -1),
            ca_wkv=ca_in_w[d_model:].T, ca_bkv=ca_in_b[d_model:].reshape(1, -1),
            ca_wo=ca_out_w.T, ca_bo=ca_out_b.reshape(1, -1),
            ln1g=jnp.ones((1, d_model), jnp.float32), ln1b=jnp.zeros((1, d_model), jnp.float32),
            ln2g=jnp.ones((1, d_model), jnp.float32), ln2b=jnp.zeros((1, d_model), jnp.float32),
            ln3g=jnp.ones((1, d_model), jnp.float32), ln3b=jnp.zeros((1, d_model), jnp.float32),
            ff_w1=w1.T, ff_b1=b1.reshape(1, -1),
            ff_w2=w2.T, ff_b2=b2.reshape(1, -1),
        ))
    final = dict(g=jnp.ones((1, d_model), jnp.float32),
                 b=jnp.zeros((1, d_model), jnp.float32))
    return layers, final


# ----------------------------- main -----------------------------

if __name__ == "__main__":
    B, S_TGT, S_MEM = 2, 8, 16
    key = jax.random.PRNGKey(0)
    k1, k2, k3 = jax.random.split(key, 3)

    tgt = jax.random.normal(k1, (B, S_TGT, D_MODEL), jnp.float32)
    memory = jax.random.normal(k2, (B, S_MEM, D_MODEL), jnp.float32)
    # Additive causal mask (semantics of generate_square_subsequent_mask; finite -1e9 for safety).
    tgt_mask = jnp.where(jnp.triu(jnp.ones((S_TGT, S_TGT), jnp.bool_), k=1),
                         NEG_INF, 0.0).astype(jnp.float32)

    layer_params, final_params = init_params(k3, D_MODEL, DIM_FF, NUM_LAYERS)
    slab = pack_slab(layer_params, final_params, D_MODEL, DIM_FF)   # one packed weight DMA

    fwd = jax.jit(functools.partial(decoder_forward, nhead=NHEAD, d_model=D_MODEL,
                                    dff=DIM_FF, num_layers=NUM_LAYERS))
    out = fwd(tgt, memory, tgt_mask, slab)
    out = jax.block_until_ready(out)

    assert out.shape == (B, S_TGT, D_MODEL) and out.dtype == jnp.float32
    assert bool(jnp.all(jnp.isfinite(out)))
    print("KERNEL_OK")
</pallas_src>

<mosaic_0001>
module attributes {stable_mosaic.version = 11 : i64} {
  func.func @_decoder_kernel(%arg0: memref<16x32xf32, #tpu.memory_space<vmem>>, %arg1: memref<32x32xf32, #tpu.memory_space<vmem>>, %arg2: memref<16x16xf32, #tpu.memory_space<vmem>>, %arg3: memref<16x32xf32, #tpu.memory_space<vmem>>, %arg4: memref<736x128xf32, #tpu.memory_space<vmem>>, %arg5: memref<16x32xf32, #tpu.memory_space<vmem>>) attributes {dimension_semantics = [], scalar_prefetch = 0 : i64, scratch_operands = 0 : i64, tpu.core_type = #tpu.core_type<tc>} {
    %c0 = arith.constant 0 : index
    %c0_0 = arith.constant 0 : index
    %0 = vector.load %arg0[%c0, %c0_0] : memref<16x32xf32, #tpu.memory_space<vmem>>, vector<16x32xf32>
    %c0_1 = arith.constant 0 : index
    %c0_2 = arith.constant 0 : index
    %1 = vector.load %arg1[%c0_1, %c0_2] : memref<32x32xf32, #tpu.memory_space<vmem>>, vector<32x32xf32>
    %c0_3 = arith.constant 0 : index
    %c0_4 = arith.constant 0 : index
    %2 = vector.load %arg2[%c0_3, %c0_4] : memref<16x16xf32, #tpu.memory_space<vmem>>, vector<16x16xf32>
    %c0_5 = arith.constant 0 : index
    %c0_6 = arith.constant 0 : index
    %3 = vector.load %arg3[%c0_5, %c0_6] : memref<16x32xf32, #tpu.memory_space<vmem>>, vector<16x32xf32>
    %c0_7 = arith.constant 0 : index
    %c0_8 = arith.constant 0 : index
    %4 = vector.load %arg4[%c0_7, %c0_8] : memref<736x128xf32, #tpu.memory_space<vmem>>, vector<32x96xf32>
    %cst = arith.constant dense<0.000000e+00> : vector<16x96xf32>
    %5 = tpu.matmul %0, %4, %cst {dimension_numbers = #tpu.dot_dimension_numbers<[1], [0], [0], [1], [0, 0, 1, 1], [], []>} : vector<16x32xf32>, vector<32x96xf32>, vector<16x96xf32> -> vector<16x96xf32>
    %c32 = arith.constant 32 : index
    %c0_9 = arith.constant 0 : index
    %6 = vector.load %arg4[%c32, %c0_9] : memref<736x128xf32, #tpu.memory_space<vmem>>, vector<1x96xf32>
    %7 = vector.broadcast %6 : vector<1x96xf32> to vector<16x96xf32>
    %8 = arith.addf %5, %7 : vector<16x96xf32>
    %9 = vector.extract_strided_slice %8 {offsets = [0, 0], sizes = [16, 32], strides = [1, 1]} : vector<16x96xf32> to vector<16x32xf32>
    %10 = vector.extract_strided_slice %8 {offsets = [0, 32], sizes = [16, 32], strides = [1, 1]} : vector<16x96xf32> to vector<16x32xf32>
    %11 = vector.extract_strided_slice %8 {offsets = [0, 64], sizes = [16, 32], strides = [1, 1]} : vector<16x96xf32> to vector<16x32xf32>
    %c40 = arith.constant 40 : index
    %c0_10 = arith.constant 0 : index
    %12 = vector.load %arg4[%c40, %c0_10] : memref<736x128xf32, #tpu.memory_space<vmem>>, vector<32x32xf32>
    %c72 = arith.constant 72 : index
    %c0_11 = arith.constant 0 : index
    %13 = vector.load %arg4[%c72, %c0_11] : memref<736x128xf32, #tpu.memory_space<vmem>>, vector<1x32xf32>
    %14 = vector.extract_strided_slice %9 {offsets = [0, 0], sizes = [16, 8], strides = [1, 1]} : vector<16x32xf32> to vector<16x8xf32>
    %15 = vector.extract_strided_slice %10 {offsets = [0, 0], sizes = [16, 8], strides = [1, 1]} : vector<16x32xf32> to vector<16x8xf32>
    %cst_12 = arith.constant dense<0.000000e+00> : vector<16x16xf32>
    %16 = tpu.matmul %14, %15, %cst_12 {dimension_numbers = #tpu.dot_dimension_numbers<[1], [1], [0], [0], [0, 0, 1, 0], [], []>} : vector<16x8xf32>, vector<16x8xf32>, vector<16x16xf32> -> vector<16x16xf32>
    %cst_13 = arith.constant 0.353553385 : f32
    %17 = vector.broadcast %cst_13 : f32 to vector<16x16xf32>
    %18 = arith.mulf %16, %17 : vector<16x16xf32>
    %19 = arith.addf %18, %2 : vector<16x16xf32>
    %cst_14 = arith.constant dense<0xFF800000> : vector<16xf32>
    %20 = vector.multi_reduction <maximumf>, %19, %cst_14 [1] : vector<16x16xf32> to vector<16xf32>
    %21 = vector.shape_cast %20 : vector<16xf32> to vector<16x1xf32>
    %22 = vector.broadcast %21 : vector<16x1xf32> to vector<16x16xf32>
    %23 = arith.subf %19, %22 : vector<16x16xf32>
    %24 = math.exp %23 : vector<16x16xf32>
    %cst_15 = arith.constant dense<0.000000e+00> : vector<16xf32>
    %25 = vector.multi_reduction <add>, %24, %cst_15 [1] : vector<16x16xf32> to vector<16xf32>
    %26 = vector.shape_cast %25 : vector<16xf32> to vector<16x1xf32>
    %27 = tpu.reciprocal %26 {approx = true} : vector<16x1xf32> -> vector<16x1xf32>
    %28 = vector.broadcast %27 : vector<16x1xf32> to vector<16x16xf32>
    %29 = arith.mulf %24, %28 : vector<16x16xf32>
    %30 = vector.extract_strided_slice %11 {offsets = [0, 0], sizes = [16, 8], strides = [1, 1]} : vector<16x32xf32> to vector<16x8xf32>
    %cst_16 = arith.constant dense<0.000000e+00> : vector<16x8xf32>
    %31 = tpu.matmul %29, %30, %cst_16 {dimension_numbers = #tpu.dot_dimension_numbers<[1], [0], [0], [1], [0, 0, 1, 1], [], []>} : vector<16x16xf32>, vector<16x8xf32>, vector<16x8xf32> -> vector<16x8xf32>
    %32 = vector.extract_strided_slice %12 {offsets = [0, 0], sizes = [8, 32], strides = [1, 1]} : vector<32x32xf32> to vector<8x32xf32>
    %cst_17 = arith.constant dense<0.000000e+00> : vector<16x32xf32>
    %33 = tpu.matmul %31, %32, %cst_17 {dimension_numbers = #tpu.dot_dimension_numbers<[1], [0], [0], [1], [0, 0, 1, 1], [], []>} : vector<16x8xf32>, vector<8x32xf32>, vector<16x32xf32> -> vector<16x32xf32>
    %34 = vector.extract_strided_slice %9 {offsets = [0, 8], sizes = [16, 8], strides = [1, 1]} : vector<16x32xf32> to vector<16x8xf32>
    %35 = vector.extract_strided_slice %10 {offsets = [0, 8], sizes = [16, 8], strides = [1, 1]} : vector<16x32xf32> to vector<16x8xf32>
    %cst_18 = arith.constant dense<0.000000e+00> : vector<16x16xf32>
    %36 = tpu.matmul %34, %35, %cst_18 {dimension_numbers = #tpu.dot_dimension_numbers<[1], [1], [0], [0], [0, 0, 1, 0], [], []>} : vector<16x8xf32>, vector<16x8xf32>, vector<16x16xf32> -> vector<16x16xf32>
    %cst_19 = arith.constant 0.353553385 : f32
    %37 = vector.broadcast %cst_19 : f32 to vector<16x16xf32>
    %38 = arith.mulf %36, %37 : vector<16x16xf32>
    %39 = arith.addf %38, %2 : vector<16x16xf32>
    %cst_20 = arith.constant dense<0xFF800000> : vector<16xf32>
    %40 = vector.multi_reduction <maximumf>, %39, %cst_20 [1] : vector<16x16xf32> to vector<16xf32>
    %41 = vector.shape_cast %40 : vector<16xf32> to vector<16x1xf32>
    %42 = vector.broadcast %41 : vector<16x1xf32> to vector<16x16xf32>
    %43 = arith.subf %39, %42 : vector<16x16xf32>
    %44 = math.exp %43 : vector<16x16xf32>
    %cst_21 = arith.constant dense<0.000000e+00> : vector<16xf32>
    %45 = vector.multi_reduction <add>, %44, %cst_21 [1] : vector<16x16xf32> to vector<16xf32>
    %46 = vector.shape_cast %45 : vector<16xf32> to vector<16x1xf32>
    %47 = tpu.reciprocal %46 {approx = true} : vector<16x1xf32> -> vector<16x1xf32>
    %48 = vector.broadcast %47 : vector<16x1xf32> to vector<16x16xf32>
    %49 = arith.mulf %44, %48 : vector<16x16xf32>
    %50 = vector.extract_strided_slice %11 {offsets = [0, 8], sizes = [16, 8], strides = [1, 1]} : vector<16x32xf32> to vector<16x8xf32>
    %cst_22 = arith.constant dense<0.000000e+00> : vector<16x8xf32>
    %51 = tpu.matmul %49, %50, %cst_22 {dimension_numbers = #tpu.dot_dimension_numbers<[1], [0], [0], [1], [0, 0, 1, 1], [], []>} : vector<16x16xf32>, vector<16x8xf32>, vector<16x8xf32> -> vector<16x8xf32>
    %52 = vector.extract_strided_slice %12 {offsets = [8, 0], sizes = [8, 32], strides = [1, 1]} : vector<32x32xf32> to vector<8x32xf32>
    %cst_23 = arith.constant dense<0.000000e+00> : vector<16x32xf32>
    %53 = tpu.matmul %51, %52, %cst_23 {dimension_numbers = #tpu.dot_dimension_numbers<[1], [0], [0], [1], [0, 0, 1, 1], [], []>} : vector<16x8xf32>, vector<8x32xf32>, vector<16x32xf32> -> vector<16x32xf32>
    %54 = arith.addf %33, %53 : vector<16x32xf32>
    %55 = vector.extract_strided_slice %9 {offsets = [0, 16], sizes = [16, 8], strides = [1, 1]} : vector<16x32xf32> to vector<16x8xf32>
    %56 = vector.extract_strided_slice %10 {offsets = [0, 16], sizes = [16, 8], strides = [1, 1]} : vector<16x32xf32> to vector<16x8xf32>
    %cst_24 = arith.constant dense<0.000000e+00> : vector<16x16xf32>
    %57 = tpu.matmul %55, %56, %cst_24 {dimension_numbers = #tpu.dot_dimension_numbers<[1], [1], [0], [0], [0, 0, 1, 0], [], []>} : vector<16x8xf32>, vector<16x8xf32>, vector<16x16xf32> -> vector<16x16xf32>
    %cst_25 = arith.constant 0.353553385 : f32
    %58 = vector.broadcast %cst_25 : f32 to vector<16x16xf32>
    %59 = arith.mulf %57, %58 : vector<16x16xf32>
    %60 = arith.addf %59, %2 : vector<16x16xf32>
    %cst_26 = arith.constant dense<0xFF800000> : vector<16xf32>
    %61 = vector.multi_reduction <maximumf>, %60, %cst_26 [1] : vector<16x16xf32> to vector<16xf32>
    %62 = vector.shape_cast %61 : vector<16xf32> to vector<16x1xf32>
    %63 = vector.broadcast %62 : vector<16x1xf32> to vector<16x16xf32>
    %64 = arith.subf %60, %63 : vector<16x16xf32>
    %65 = math.exp %64 : vector<16x16xf32>
    %cst_27 = arith.constant dense<0.000000e+00> : vector<16xf32>
    %66 = vector.multi_reduction <add>, %65, %cst_27 [1] : vector<16x16xf32> to vector<16xf32>
    %67 = vector.shape_cast %66 : vector<16xf32> to vector<16x1xf32>
    %68 = tpu.reciprocal %67 {approx = true} : vector<16x1xf32> -> vector<16x1xf32>
    %69 = vector.broadcast %68 : vector<16x1xf32> to vector<16x16xf32>
    %70 = arith.mulf %65, %69 : vector<16x16xf32>
    %71 = vector.extract_strided_slice %11 {offsets = [0, 16], sizes = [16, 8], strides = [1, 1]} : vector<16x32xf32> to vector<16x8xf32>
    %cst_28 = arith.constant dense<0.000000e+00> : vector<16x8xf32>
    %72 = tpu.matmul %70, %71, %cst_28 {dimension_numbers = #tpu.dot_dimension_numbers<[1], [0], [0], [1], [0, 0, 1, 1], [], []>} : vector<16x16xf32>, vector<16x8xf32>, vector<16x8xf32> -> vector<16x8xf32>
    %73 = vector.extract_strided_slice %12 {offsets = [16, 0], sizes = [8, 32], strides = [1, 1]} : vector<32x32xf32> to vector<8x32xf32>
    %cst_29 = arith.constant dense<0.000000e+00> : vector<16x32xf32>
    %74 = tpu.matmul %72, %73, %cst_29 {dimension_numbers = #tpu.dot_dimension_numbers<[1], [0], [0], [1], [0, 0, 1, 1], [], []>} : vector<16x8xf32>, vector<8x32xf32>, vector<16x32xf32> -> vector<16x32xf32>
    %75 = arith.addf %54, %74 : vector<16x32xf32>
    %76 = vector.extract_strided_slice %9 {offsets = [0, 24], sizes = [16, 8], strides = [1, 1]} : vector<16x32xf32> to vector<16x8xf32>
    %77 = vector.extract_strided_slice %10 {offsets = [0, 24], sizes = [16, 8], strides = [1, 1]} : vector<16x32xf32> to vector<16x8xf32>
    %cst_30 = arith.constant dense<0.000000e+00> : vector<16x16xf32>
    %78 = tpu.matmul %76, %77, %cst_30 {dimension_numbers = #tpu.dot_dimension_numbers<[1], [1], [0], [0], [0, 0, 1, 0], [], []>} : vector<16x8xf32>, vector<16x8xf32>, vector<16x16xf32> -> vector<16x16xf32>
    %cst_31 = arith.constant 0.353553385 : f32
    %79 = vector.broadcast %cst_31 : f32 to vector<16x16xf32>
    %80 = arith.mulf %78, %79 : vector<16x16xf32>
    %81 = arith.addf %80, %2 : vector<16x16xf32>
    %cst_32 = arith.constant dense<0xFF800000> : vector<16xf32>
    %82 = vector.multi_reduction <maximumf>, %81, %cst_32 [1] : vector<16x16xf32> to vector<16xf32>
    %83 = vector.shape_cast %82 : vector<16xf32> to vector<16x1xf32>
    %84 = vector.broadcast %83 : vector<16x1xf32> to vector<16x16xf32>
    %85 = arith.subf %81, %84 : vector<16x16xf32>
    %86 = math.exp %85 : vector<16x16xf32>
    %cst_33 = arith.constant dense<0.000000e+00> : vector<16xf32>
    %87 = vector.multi_reduction <add>, %86, %cst_33 [1] : vector<16x16xf32> to vector<16xf32>
    %88 = vector.shape_cast %87 : vector<16xf32> to vector<16x1xf32>
    %89 = tpu.reciprocal %88 {approx = true} : vector<16x1xf32> -> vector<16x1xf32>
    %90 = vector.broadcast %89 : vector<16x1xf32> to vector<16x16xf32>
    %91 = arith.mulf %86, %90 : vector<16x16xf32>
    %92 = vector.extract_strided_slice %11 {offsets = [0, 24], sizes = [16, 8], strides = [1, 1]} : vector<16x32xf32> to vector<16x8xf32>
    %cst_34 = arith.constant dense<0.000000e+00> : vector<16x8xf32>
    %93 = tpu.matmul %91, %92, %cst_34 {dimension_numbers = #tpu.dot_dimension_numbers<[1], [0], [0], [1], [0, 0, 1, 1], [], []>} : vector<16x16xf32>, vector<16x8xf32>, vector<16x8xf32> -> vector<16x8xf32>
    %94 = vector.extract_strided_slice %12 {offsets = [24, 0], sizes = [8, 32], strides = [1, 1]} : vector<32x32xf32> to vector<8x32xf32>
    %cst_35 = arith.constant dense<0.000000e+00> : vector<16x32xf32>
    %95 = tpu.matmul %93, %94, %cst_35 {dimension_numbers = #tpu.dot_dimension_numbers<[1], [0], [0], [1], [0, 0, 1, 1], [], []>} : vector<16x8xf32>, vector<8x32xf32>, vector<16x32xf32> -> vector<16x32xf32>
    %96 = arith.addf %75, %95 : vector<16x32xf32>
    %97 = vector.broadcast %13 : vector<1x32xf32> to vector<16x32xf32>
    %98 = arith.addf %96, %97 : vector<16x32xf32>
    %99 = arith.addf %0, %98 : vector<16x32xf32>
    %c200 = arith.constant 200 : index
    %c0_36 = arith.constant 0 : index
    %100 = vector.load %arg4[%c200, %c0_36] : memref<736x128xf32, #tpu.memory_space<vmem>>, vector<1x32xf32>
    %c208 = arith.constant 208 : index
    %c0_37 = arith.constant 0 : index
    %101 = vector.load %arg4[%c208, %c0_37] : memref<736x128xf32, #tpu.memory_space<vmem>>, vector<1x32xf32>
    %cst_38 = arith.constant dense<0.000000e+00> : vector<16xf32>
    %102 = vector.multi_reduction <add>, %99, %cst_38 [1] : vector<16x32xf32> to vector<16xf32>
    %103 = vector.shape_cast %102 : vector<16xf32> to vector<16x1xf32>
    %cst_39 = arith.constant 3.200000e+01 : f32
    %104 = vector.broadcast %cst_39 : f32 to vector<16x1xf32>
    %105 = arith.divf %103, %104 : vector<16x1xf32>
    %106 = vector.broadcast %105 : vector<16x1xf32> to vector<16x32xf32>
    %107 = arith.subf %99, %106 : vector<16x32xf32>
    %108 = arith.mulf %107, %107 : vector<16x32xf32>
    %cst_40 = arith.constant dense<0.000000e+00> : vector<16xf32>
    %109 = vector.multi_reduction <add>, %108, %cst_40 [1] : vector<16x32xf32> to vector<16xf32>
    %110 = vector.shape_cast %109 : vector<16xf32> to vector<16x1xf32>
    %cst_41 = arith.constant 3.200000e+01 : f32
    %111 = vector.broadcast %cst_41 : f32 to vector<16x1xf32>
    %112 = arith.divf %110, %111 : vector<16x1xf32>
    %cst_42 = arith.constant 9.99999974E-6 : f32
    %113 = vector.broadcast %cst_42 : f32 to vector<16x1xf32>
    %114 = arith.addf %112, %113 : vector<16x1xf32>
    %115 = math.rsqrt %114 : vector<16x1xf32>
    %116 = vector.broadcast %115 : vector<16x1xf32> to vector<16x32xf32>
    %117 = arith.mulf %107, %116 : vector<16x32xf32>
    %118 = vector.broadcast %100 : vector<1x32xf32> to vector<16x32xf32>
    %119 = arith.mulf %117, %118 : vector<16x32xf32>
    %120 = vector.broadcast %101 : vector<1x32xf32> to vector<16x32xf32>
    %121 = arith.addf %119, %120 : vector<16x32xf32>
    %c80 = arith.constant 80 : index
    %c0_43 = arith.constant 0 : index
    %122 = vector.load %arg4[%c80, %c0_43] : memref<736x128xf32, #tpu.memory_space<vmem>>, vector<32x32xf32>
    %cst_44 = arith.constant dense<0.000000e+00> : vector<16x32xf32>
    %123 = tpu.matmul %121, %122, %cst_44 {dimension_numbers = #tpu.dot_dimension_numbers<[1], [0], [0], [1], [0, 0, 1, 1], [], []>} : vector<16x32xf32>, vector<32x32xf32>, vector<16x32xf32> -> vector<16x32xf32>
    %c112 = arith.constant 112 : index
    %c0_45 = arith.constant 0 : index
    %124 = vector.load %arg4[%c112, %c0_45] : memref<736x128xf32, #tpu.memory_space<vmem>>, vector<1x32xf32>
    %125 = vector.broadcast %124 : vector<1x32xf32> to vector<16x32xf32>
    %126 = arith.addf %123, %125 : vector<16x32xf32>
    %c120 = arith.constant 120 : index
    %c0_46 = arith.constant 0 : index
    %127 = vector.load %arg4[%c120, %c0_46] : memref<736x128xf32, #tpu.memory_space<vmem>>, vector<32x64xf32>
    %cst_47 = arith.constant dense<0.000000e+00> : vector<32x64xf32>
    %128 = tpu.matmul %1, %127, %cst_47 {dimension_numbers = #tpu.dot_dimension_numbers<[1], [0], [0], [1], [0, 0, 1, 1], [], []>} : vector<32x32xf32>, vector<32x64xf32>, vector<32x64xf32> -> vector<32x64xf32>
    %c152 = arith.constant 152 : index
    %c0_48 = arith.constant 0 : index
    %129 = vector.load %arg4[%c152, %c0_48] : memref<736x128xf32, #tpu.memory_space<vmem>>, vector<1x64xf32>
    %130 = vector.broadcast %129 : vector<1x64xf32> to vector<32x64xf32>
    %131 = arith.addf %128, %130 : vector<32x64xf32>
    %132 = vector.extract_strided_slice %131 {offsets = [0, 0], sizes = [32, 32], strides = [1, 1]} : vector<32x64xf32> to vector<32x32xf32>
    %133 = vector.extract_strided_slice %131 {offsets = [0, 32], sizes = [32, 32], strides = [1, 1]} : vector<32x64xf32> to vector<32x32xf32>
    %c160 = arith.constant 160 : index
    %c0_49 = arith.constant 0 : index
    %134 = vector.load %arg4[%c160, %c0_49] : memref<736x128xf32, #tpu.memory_space<vmem>>, vector<32x32xf32>
    %c192 = arith.constant 192 : index
    %c0_50 = arith.constant 0 : index
    %135 = vector.load %arg4[%c192, %c0_50] : memref<736x128xf32, #tpu.memory_space<vmem>>, vector<1x32xf32>
    %136 = vector.extract_strided_slice %126 {offsets = [0, 0], sizes = [16, 8], strides = [1, 1]} : vector<16x32xf32> to vector<16x8xf32>
    %137 = vector.extract_strided_slice %132 {offsets = [0, 0], sizes = [32, 8], strides = [1, 1]} : vector<32x32xf32> to vector<32x8xf32>
    %cst_51 = arith.constant dense<0.000000e+00> : vector<16x32xf32>
    %138 = tpu.matmul %136, %137, %cst_51 {dimension_numbers = #tpu.dot_dimension_numbers<[1], [1], [0], [0], [0, 0, 1, 0], [], []>} : vector<16x8xf32>, vector<32x8xf32>, vector<16x32xf32> -> vector<16x32xf32>
    %cst_52 = arith.constant 0.353553385 : f32
    %139 = vector.broadcast %cst_52 : f32 to vector<16x32xf32>
    %140 = arith.mulf %138, %139 : vector<16x32xf32>
    %141 = arith.addf %140, %3 : vector<16x32xf32>
    %cst_53 = arith.constant dense<0xFF800000> : vector<16xf32>
    %142 = vector.multi_reduction <maximumf>, %141, %cst_53 [1] : vector<16x32xf32> to vector<16xf32>
    %143 = vector.shape_cast %142 : vector<16xf32> to vector<16x1xf32>
    %144 = vector.broadcast %143 : vector<16x1xf32> to vector<16x32xf32>
    %145 = arith.subf %141, %144 : vector<16x32xf32>
    %146 = math.exp %145 : vector<16x32xf32>
    %cst_54 = arith.constant dense<0.000000e+00> : vector<16xf32>
    %147 = vector.multi_reduction <add>, %146, %cst_54 [1] : vector<16x32xf32> to vector<16xf32>
    %148 = vector.shape_cast %147 : vector<16xf32> to vector<16x1xf32>
    %149 = tpu.reciprocal %148 {approx = true} : vector<16x1xf32> -> vector<16x1xf32>
    %150 = vector.broadcast %149 : vector<16x1xf32> to vector<16x32xf32>
    %151 = arith.mulf %146, %150 : vector<16x32xf32>
    %152 = vector.extract_strided_slice %133 {offsets = [0, 0], sizes = [32, 8], strides = [1, 1]} : vector<32x32xf32> to vector<32x8xf32>
    %cst_55 = arith.constant dense<0.000000e+00> : vector<16x8xf32>
    %153 = tpu.matmul %151, %152, %cst_55 {dimension_numbers = #tpu.dot_dimension_numbers<[1], [0], [0], [1], [0, 0, 1, 1], [], []>} : vector<16x32xf32>, vector<32x8xf32>, vector<16x8xf32> -> vector<16x8xf32>
    %154 = vector.extract_strided_slice %134 {offsets = [0, 0], sizes = [8, 32], strides = [1, 1]} : vector<32x32xf32> to vector<8x32xf32>
    %cst_56 = arith.constant dense<0.000000e+00> : vector<16x32xf32>
    %155 = tpu.matmul %153, %154, %cst_56 {dimension_numbers = #tpu.dot_dimension_numbers<[1], [0], [0], [1], [0, 0, 1, 1], [], []>} : vector<16x8xf32>, vector<8x32xf32>, vector<16x32xf32> -> vector<16x32xf32>
    %156 = vector.extract_strided_slice %126 {offsets = [0, 8], sizes = [16, 8], strides = [1, 1]} : vector<16x32xf32> to vector<16x8xf32>
    %157 = vector.extract_strided_slice %132 {offsets = [0, 8], sizes = [32, 8], strides = [1, 1]} : vector<32x32xf32> to vector<32x8xf32>
    %cst_57 = arith.constant dense<0.000000e+00> : vector<16x32xf32>
    %158 = tpu.matmul %156, %157, %cst_57 {dimension_numbers = #tpu.dot_dimension_numbers<[1], [1], [0], [0], [0, 0, 1, 0], [], []>} : vector<16x8xf32>, vector<32x8xf32>, vector<16x32xf32> -> vector<16x32xf32>
    %cst_58 = arith.constant 0.353553385 : f32
    %159 = vector.broadcast %cst_58 : f32 to vector<16x32xf32>
    %160 = arith.mulf %158, %159 : vector<16x32xf32>
    %161 = arith.addf %160, %3 : vector<16x32xf32>
    %cst_59 = arith.constant dense<0xFF800000> : vector<16xf32>
    %162 = vector.multi_reduction <maximumf>, %161, %cst_59 [1] : vector<16x32xf32> to vector<16xf32>
    %163 = vector.shape_cast %162 : vector<16xf32> to vector<16x1xf32>
    %164 = vector.broadcast %163 : vector<16x1xf32> to vector<16x32xf32>
    %165 = arith.subf %161, %164 : vector<16x32xf32>
    %166 = math.exp %165 : vector<16x32xf32>
    %cst_60 = arith.constant dense<0.000000e+00> : vector<16xf32>
    %167 = vector.multi_reduction <add>, %166, %cst_60 [1] : vector<16x32xf32> to vector<16xf32>
    %168 = vector.shape_cast %167 : vector<16xf32> to vector<16x1xf32>
    %169 = tpu.reciprocal %168 {approx = true} : vector<16x1xf32> -> vector<16x1xf32>
    %170 = vector.broadcast %169 : vector<16x1xf32> to vector<16x32xf32>
    %171 = arith.mulf %166, %170 : vector<16x32xf32>
    %172 = vector.extract_strided_slice %133 {offsets = [0, 8], sizes = [32, 8], strides = [1, 1]} : vector<32x32xf32> to vector<32x8xf32>
    %cst_61 = arith.constant dense<0.000000e+00> : vector<16x8xf32>
    %173 = tpu.matmul %171, %172, %cst_61 {dimension_numbers = #tpu.dot_dimension_numbers<[1], [0], [0], [1], [0, 0, 1, 1], [], []>} : vector<16x32xf32>, vector<32x8xf32>, vector<16x8xf32> -> vector<16x8xf32>
    %174 = vector.extract_strided_slice %134 {offsets = [8, 0], sizes = [8, 32], strides = [1, 1]} : vector<32x32xf32> to vector<8x32xf32>
    %cst_62 = arith.constant dense<0.000000e+00> : vector<16x32xf32>
    %175 = tpu.matmul %173, %174, %cst_62 {dimension_numbers = #tpu.dot_dimension_numbers<[1], [0], [0], [1], [0, 0, 1, 1], [], []>} : vector<16x8xf32>, vector<8x32xf32>, vector<16x32xf32> -> vector<16x32xf32>
    %176 = arith.addf %155, %175 : vector<16x32xf32>
    %177 = vector.extract_strided_slice %126 {offsets = [0, 16], sizes = [16, 8], strides = [1, 1]} : vector<16x32xf32> to vector<16x8xf32>
    %178 = vector.extract_strided_slice %132 {offsets = [0, 16], sizes = [32, 8], strides = [1, 1]} : vector<32x32xf32> to vector<32x8xf32>
    %cst_63 = arith.constant dense<0.000000e+00> : vector<16x32xf32>
    %179 = tpu.matmul %177, %178, %cst_63 {dimension_numbers = #tpu.dot_dimension_numbers<[1], [1], [0], [0], [0, 0, 1, 0], [], []>} : vector<16x8xf32>, vector<32x8xf32>, vector<16x32xf32> -> vector<16x32xf32>
    %cst_64 = arith.constant 0.353553385 : f32
    %180 = vector.broadcast %cst_64 : f32 to vector<16x32xf32>
    %181 = arith.mulf %179, %180 : vector<16x32xf32>
    %182 = arith.addf %181, %3 : vector<16x32xf32>
    %cst_65 = arith.constant dense<0xFF800000> : vector<16xf32>
    %183 = vector.multi_reduction <maximumf>, %182, %cst_65 [1] : vector<16x32xf32> to vector<16xf32>
    %184 = vector.shape_cast %183 : vector<16xf32> to vector<16x1xf32>
    %185 = vector.broadcast %184 : vector<16x1xf32> to vector<16x32xf32>
    %186 = arith.subf %182, %185 : vector<16x32xf32>
    %187 = math.exp %186 : vector<16x32xf32>
    %cst_66 = arith.constant dense<0.000000e+00> : vector<16xf32>
    %188 = vector.multi_reduction <add>, %187, %cst_66 [1] : vector<16x32xf32> to vector<16xf32>
    %189 = vector.shape_cast %188 : vector<16xf32> to vector<16x1xf32>
    %190 = tpu.reciprocal %189 {approx = true} : vector<16x1xf32> -> vector<16x1xf32>
    %191 = vector.broadcast %190 : vector<16x1xf32> to vector<16x32xf32>
    %192 = arith.mulf %187, %191 : vector<16x32xf32>
    %193 = vector.extract_strided_slice %133 {offsets = [0, 16], sizes = [32, 8], strides = [1, 1]} : vector<32x32xf32> to vector<32x8xf32>
    %cst_67 = arith.constant dense<0.000000e+00> : vector<16x8xf32>
    %194 = tpu.matmul %192, %193, %cst_67 {dimension_numbers = #tpu.dot_dimension_numbers<[1], [0], [0], [1], [0, 0, 1, 1], [], []>} : vector<16x32xf32>, vector<32x8xf32>, vector<16x8xf32> -> vector<16x8xf32>
    %195 = vector.extract_strided_slice %134 {offsets = [16, 0], sizes = [8, 32], strides = [1, 1]} : vector<32x32xf32> to vector<8x32xf32>
    %cst_68 = arith.constant dense<0.000000e+00> : vector<16x32xf32>
    %196 = tpu.matmul %194, %195, %cst_68 {dimension_numbers = #tpu.dot_dimension_numbers<[1], [0], [0], [1], [0, 0, 1, 1], [], []>} : vector<16x8xf32>, vector<8x32xf32>, vector<16x32xf32> -> vector<16x32xf32>
    %197 = arith.addf %176, %196 : vector<16x32xf32>
    %198 = vector.extract_strided_slice %126 {offsets = [0, 24], sizes = [16, 8], strides = [1, 1]} : vector<16x32xf32> to vector<16x8xf32>
    %199 = vector.extract_strided_slice %132 {offsets = [0, 24], sizes = [32, 8], strides = [1, 1]} : vector<32x32xf32> to vector<32x8xf32>
    %cst_69 = arith.constant dense<0.000000e+00> : vector<16x32xf32>
    %200 = tpu.matmul %198, %199, %cst_69 {dimension_numbers = #tpu.dot_dimension_numbers<[1], [1], [0], [0], [0, 0, 1, 0], [], []>} : vector<16x8xf32>, vector<32x8xf32>, vector<16x32xf32> -> vector<16x32xf32>
    %cst_70 = arith.constant 0.353553385 : f32
    %201 = vector.broadcast %cst_70 : f32 to vector<16x32xf32>
    %202 = arith.mulf %200, %201 : vector<16x32xf32>
    %203 = arith.addf %202, %3 : vector<16x32xf32>
    %cst_71 = arith.constant dense<0xFF800000> : vector<16xf32>
    %204 = vector.multi_reduction <maximumf>, %203, %cst_71 [1] : vector<16x32xf32> to vector<16xf32>
    %205 = vector.shape_cast %204 : vector<16xf32> to vector<16x1xf32>
    %206 = vector.broadcast %205 : vector<16x1xf32> to vector<16x32xf32>
    %207 = arith.subf %203, %206 : vector<16x32xf32>
    %208 = math.exp %207 : vector<16x32xf32>
    %cst_72 = arith.constant dense<0.000000e+00> : vector<16xf32>
    %209 = vector.multi_reduction <add>, %208, %cst_72 [1] : vector<16x32xf32> to vector<16xf32>
    %210 = vector.shape_cast %209 : vector<16xf32> to vector<16x1xf32>
    %211 = tpu.reciprocal %210 {approx = true} : vector<16x1xf32> -> vector<16x1xf32>
    %212 = vector.broadcast %211 : vector<16x1xf32> to vector<16x32xf32>
    %213 = arith.mulf %208, %212 : vector<16x32xf32>
    %214 = vector.extract_strided_slice %133 {offsets = [0, 24], sizes = [32, 8], strides = [1, 1]} : vector<32x32xf32> to vector<32x8xf32>
    %cst_73 = arith.constant dense<0.000000e+00> : vector<16x8xf32>
    %215 = tpu.matmul %213, %214, %cst_73 {dimension_numbers = #tpu.dot_dimension_numbers<[1], [0], [0], [1], [0, 0, 1, 1], [], []>} : vector<16x32xf32>, vector<32x8xf32>, vector<16x8xf32> -> vector<16x8xf32>
    %216 = vector.extract_strided_slice %134 {offsets = [24, 0], sizes = [8, 32], strides = [1, 1]} : vector<32x32xf32> to vector<8x32xf32>
    %cst_74 = arith.constant dense<0.000000e+00> : vector<16x32xf32>
    %217 = tpu.matmul %215, %216, %cst_74 {dimension_numbers = #tpu.dot_dimension_numbers<[1], [0], [0], [1], [0, 0, 1, 1], [], []>} : vector<16x8xf32>, vector<8x32xf32>, vector<16x32xf32> -> vector<16x32xf32>
    %218 = arith.addf %197, %217 : vector<16x32xf32>
    %219 = vector.broadcast %135 : vector<1x32xf32> to vector<16x32xf32>
    %220 = arith.addf %218, %219 : vector<16x32xf32>
    %221 = arith.addf %121, %220 : vector<16x32xf32>
    %c216 = arith.constant 216 : index
    %c0_75 = arith.constant 0 : index
    %222 = vector.load %arg4[%c216, %c0_75] : memref<736x128xf32, #tpu.memory_space<vmem>>, vector<1x32xf32>
    %c224 = arith.constant 224 : index
    %c0_76 = arith.constant 0 : index
    %223 = vector.load %arg4[%c224, %c0_76] : memref<736x128xf32, #tpu.memory_space<vmem>>, vector<1x32xf32>
    %cst_77 = arith.constant dense<0.000000e+00> : vector<16xf32>
    %224 = vector.multi_reduction <add>, %221, %cst_77 [1] : vector<16x32xf32> to vector<16xf32>
    %225 = vector.shape_cast %224 : vector<16xf32> to vector<16x1xf32>
    %cst_78 = arith.constant 3.200000e+01 : f32
    %226 = vector.broadcast %cst_78 : f32 to vector<16x1xf32>
    %227 = arith.divf %225, %226 : vector<16x1xf32>
    %228 = vector.broadcast %227 : vector<16x1xf32> to vector<16x32xf32>
    %229 = arith.subf %221, %228 : vector<16x32xf32>
    %230 = arith.mulf %229, %229 : vector<16x32xf32>
    %cst_79 = arith.constant dense<0.000000e+00> : vector<16xf32>
    %231 = vector.multi_reduction <add>, %230, %cst_79 [1] : vector<16x32xf32> to vector<16xf32>
    %232 = vector.shape_cast %231 : vector<16xf32> to vector<16x1xf32>
    %cst_80 = arith.constant 3.200000e+01 : f32
    %233 = vector.broadcast %cst_80 : f32 to vector<16x1xf32>
    %234 = arith.divf %232, %233 : vector<16x1xf32>
    %cst_81 = arith.constant 9.99999974E-6 : f32
    %235 = vector.broadcast %cst_81 : f32 to vector<16x1xf32>
    %236 = arith.addf %234, %235 : vector<16x1xf32>
    %237 = math.rsqrt %236 : vector<16x1xf32>
    %238 = vector.broadcast %237 : vector<16x1xf32> to vector<16x32xf32>
    %239 = arith.mulf %229, %238 : vector<16x32xf32>
    %240 = vector.broadcast %222 : vector<1x32xf32> to vector<16x32xf32>
    %241 = arith.mulf %239, %240 : vector<16x32xf32>
    %242 = vector.broadcast %223 : vector<1x32xf32> to vector<16x32xf32>
    %243 = arith.addf %241, %242 : vector<16x32xf32>
    %c248 = arith.constant 248 : index
    %c0_82 = arith.constant 0 : index
    %244 = vector.load %arg4[%c248, %c0_82] : memref<736x128xf32, #tpu.memory_space<vmem>>, vector<32x64xf32>
    %cst_83 = arith.constant dense<0.000000e+00> : vector<16x64xf32>
    %245 = tpu.matmul %243, %244, %cst_83 {dimension_numbers = #tpu.dot_dimension_numbers<[1], [0], [0], [1], [0, 0, 1, 1], [], []>} : vector<16x32xf32>, vector<32x64xf32>, vector<16x64xf32> -> vector<16x64xf32>
    %c280 = arith.constant 280 : index
    %c0_84 = arith.constant 0 : index
    %246 = vector.load %arg4[%c280, %c0_84] : memref<736x128xf32, #tpu.memory_space<vmem>>, vector<1x64xf32>
    %247 = vector.broadcast %246 : vector<1x64xf32> to vector<16x64xf32>
    %248 = arith.addf %245, %247 : vector<16x64xf32>
    %cst_85 = arith.constant 0.000000e+00 : f32
    %249 = vector.broadcast %cst_85 : f32 to vector<16x64xf32>
    %250 = arith.maximumf %248, %249 : vector<16x64xf32>
    %c288 = arith.constant 288 : index
    %c0_86 = arith.constant 0 : index
    %251 = vector.load %arg4[%c288, %c0_86] : memref<736x128xf32, #tpu.memory_space<vmem>>, vector<64x32xf32>
    %cst_87 = arith.constant dense<0.000000e+00> : vector<16x32xf32>
    %252 = tpu.matmul %250, %251, %cst_87 {dimension_numbers = #tpu.dot_dimension_numbers<[1], [0], [0], [1], [0, 0, 1, 1], [], []>} : vector<16x64xf32>, vector<64x32xf32>, vector<16x32xf32> -> vector<16x32xf32>
    %c352 = arith.constant 352 : index
    %c0_88 = arith.constant 0 : index
    %253 = vector.load %arg4[%c352, %c0_88] : memref<736x128xf32, #tpu.memory_space<vmem>>, vector<1x32xf32>
    %254 = vector.broadcast %253 : vector<1x32xf32> to vector<16x32xf32>
    %255 = arith.addf %252, %254 : vector<16x32xf32>
    %256 = arith.addf %243, %255 : vector<16x32xf32>
    %c232 = arith.constant 232 : index
    %c0_89 = arith.constant 0 : index
    %257 = vector.load %arg4[%c232, %c0_89] : memref<736x128xf32, #tpu.memory_space<vmem>>, vector<1x32xf32>
    %c240 = arith.constant 240 : index
    %c0_90 = arith.constant 0 : index
    %258 = vector.load %arg4[%c240, %c0_90] : memref<736x128xf32, #tpu.memory_space<vmem>>, vector<1x32xf32>
    %cst_91 = arith.constant dense<0.000000e+00> : vector<16xf32>
    %259 = vector.multi_reduction <add>, %256, %cst_91 [1] : vector<16x32xf32> to vector<16xf32>
    %260 = vector.shape_cast %259 : vector<16xf32> to vector<16x1xf32>
    %cst_92 = arith.constant 3.200000e+01 : f32
    %261 = vector.broadcast %cst_92 : f32 to vector<16x1xf32>
    %262 = arith.divf %260, %261 : vector<16x1xf32>
    %263 = vector.broadcast %262 : vector<16x1xf32> to vector<16x32xf32>
    %264 = arith.subf %256, %263 : vector<16x32xf32>
    %265 = arith.mulf %264, %264 : vector<16x32xf32>
    %cst_93 = arith.constant dense<0.000000e+00> : vector<16xf32>
    %266 = vector.multi_reduction <add>, %265, %cst_93 [1] : vector<16x32xf32> to vector<16xf32>
    %267 = vector.shape_cast %266 : vector<16xf32> to vector<16x1xf32>
    %cst_94 = arith.constant 3.200000e+01 : f32
    %268 = vector.broadcast %cst_94 : f32 to vector<16x1xf32>
    %269 = arith.divf %267, %268 : vector<16x1xf32>
    %cst_95 = arith.constant 9.99999974E-6 : f32
    %270 = vector.broadcast %cst_95 : f32 to vector<16x1xf32>
    %271 = arith.addf %269, %270 : vector<16x1xf32>
    %272 = math.rsqrt %271 : vector<16x1xf32>
    %273 = vector.broadcast %272 : vector<16x1xf32> to vector<16x32xf32>
    %274 = arith.mulf %264, %273 : vector<16x32xf32>
    %275 = vector.broadcast %257 : vector<1x32xf32> to vector<16x32xf32>
    %276 = arith.mulf %274, %275 : vector<16x32xf32>
    %277 = vector.broadcast %258 : vector<1x32xf32> to vector<16x32xf32>
    %278 = arith.addf %276, %277 : vector<16x32xf32>
    %c360 = arith.constant 360 : index
    %c0_96 = arith.constant 0 : index
    %279 = vector.load %arg4[%c360, %c0_96] : memref<736x128xf32, #tpu.memory_space<vmem>>, vector<32x96xf32>
    %cst_97 = arith.constant dense<0.000000e+00> : vector<16x96xf32>
    %280 = tpu.matmul %278, %279, %cst_97 {dimension_numbers = #tpu.dot_dimension_numbers<[1], [0], [0], [1], [0, 0, 1, 1], [], []>} : vector<16x32xf32>, vector<32x96xf32>, vector<16x96xf32> -> vector<16x96xf32>
    %c392 = arith.constant 392 : index
    %c0_98 = arith.constant 0 : index
    %281 = vector.load %arg4[%c392, %c0_98] : memref<736x128xf32, #tpu.memory_space<vmem>>, vector<1x96xf32>
    %282 = vector.broadcast %281 : vector<1x96xf32> to vector<16x96xf32>
    %283 = arith.addf %280, %282 : vector<16x96xf32>
    %284 = vector.extract_strided_slice %283 {offsets = [0, 0], sizes = [16, 32], strides = [1, 1]} : vector<16x96xf32> to vector<16x32xf32>
    %285 = vector.extract_strided_slice %283 {offsets = [0, 32], sizes = [16, 32], strides = [1, 1]} : vector<16x96xf32> to vector<16x32xf32>
    %286 = vector.extract_strided_slice %283 {offsets = [0, 64], sizes = [16, 32], strides = [1, 1]} : vector<16x96xf32> to vector<16x32xf32>
    %c400 = arith.constant 400 : index
    %c0_99 = arith.constant 0 : index
    %287 = vector.load %arg4[%c400, %c0_99] : memref<736x128xf32, #tpu.memory_space<vmem>>, vector<32x32xf32>
    %c432 = arith.constant 432 : index
    %c0_100 = arith.constant 0 : index
    %288 = vector.load %arg4[%c432, %c0_100] : memref<736x128xf32, #tpu.memory_space<vmem>>, vector<1x32xf32>
    %289 = vector.extract_strided_slice %284 {offsets = [0, 0], sizes = [16, 8], strides = [1, 1]} : vector<16x32xf32> to vector<16x8xf32>
    %290 = vector.extract_strided_slice %285 {offsets = [0, 0], sizes = [16, 8], strides = [1, 1]} : vector<16x32xf32> to vector<16x8xf32>
    %cst_101 = arith.constant dense<0.000000e+00> : vector<16x16xf32>
    %291 = tpu.matmul %289, %290, %cst_101 {dimension_numbers = #tpu.dot_dimension_numbers<[1], [1], [0], [0], [0, 0, 1, 0], [], []>} : vector<16x8xf32>, vector<16x8xf32>, vector<16x16xf32> -> vector<16x16xf32>
    %cst_102 = arith.constant 0.353553385 : f32
    %292 = vector.broadcast %cst_102 : f32 to vector<16x16xf32>
    %293 = arith.mulf %291, %292 : vector<16x16xf32>
    %294 = arith.addf %293, %2 : vector<16x16xf32>
    %cst_103 = arith.constant dense<0xFF800000> : vector<16xf32>
    %295 = vector.multi_reduction <maximumf>, %294, %cst_103 [1] : vector<16x16xf32> to vector<16xf32>
    %296 = vector.shape_cast %295 : vector<16xf32> to vector<16x1xf32>
    %297 = vector.broadcast %296 : vector<16x1xf32> to vector<16x16xf32>
    %298 = arith.subf %294, %297 : vector<16x16xf32>
    %299 = math.exp %298 : vector<16x16xf32>
    %cst_104 = arith.constant dense<0.000000e+00> : vector<16xf32>
    %300 = vector.multi_reduction <add>, %299, %cst_104 [1] : vector<16x16xf32> to vector<16xf32>
    %301 = vector.shape_cast %300 : vector<16xf32> to vector<16x1xf32>
    %302 = tpu.reciprocal %301 {approx = true} : vector<16x1xf32> -> vector<16x1xf32>
    %303 = vector.broadcast %302 : vector<16x1xf32> to vector<16x16xf32>
    %304 = arith.mulf %299, %303 : vector<16x16xf32>
    %305 = vector.extract_strided_slice %286 {offsets = [0, 0], sizes = [16, 8], strides = [1, 1]} : vector<16x32xf32> to vector<16x8xf32>
    %cst_105 = arith.constant dense<0.000000e+00> : vector<16x8xf32>
    %306 = tpu.matmul %304, %305, %cst_105 {dimension_numbers = #tpu.dot_dimension_numbers<[1], [0], [0], [1], [0, 0, 1, 1], [], []>} : vector<16x16xf32>, vector<16x8xf32>, vector<16x8xf32> -> vector<16x8xf32>
    %307 = vector.extract_strided_slice %287 {offsets = [0, 0], sizes = [8, 32], strides = [1, 1]} : vector<32x32xf32> to vector<8x32xf32>
    %cst_106 = arith.constant dense<0.000000e+00> : vector<16x32xf32>
    %308 = tpu.matmul %306, %307, %cst_106 {dimension_numbers = #tpu.dot_dimension_numbers<[1], [0], [0], [1], [0, 0, 1, 1], [], []>} : vector<16x8xf32>, vector<8x32xf32>, vector<16x32xf32> -> vector<16x32xf32>
    %309 = vector.extract_strided_slice %284 {offsets = [0, 8], sizes = [16, 8], strides = [1, 1]} : vector<16x32xf32> to vector<16x8xf32>
    %310 = vector.extract_strided_slice %285 {offsets = [0, 8], sizes = [16, 8], strides = [1, 1]} : vector<16x32xf32> to vector<16x8xf32>
    %cst_107 = arith.constant dense<0.000000e+00> : vector<16x16xf32>
    %311 = tpu.matmul %309, %310, %cst_107 {dimension_numbers = #tpu.dot_dimension_numbers<[1], [1], [0], [0], [0, 0, 1, 0], [], []>} : vector<16x8xf32>, vector<16x8xf32>, vector<16x16xf32> -> vector<16x16xf32>
    %cst_108 = arith.constant 0.353553385 : f32
    %312 = vector.broadcast %cst_108 : f32 to vector<16x16xf32>
    %313 = arith.mulf %311, %312 : vector<16x16xf32>
    %314 = arith.addf %313, %2 : vector<16x16xf32>
    %cst_109 = arith.constant dense<0xFF800000> : vector<16xf32>
    %315 = vector.multi_reduction <maximumf>, %314, %cst_109 [1] : vector<16x16xf32> to vector<16xf32>
    %316 = vector.shape_cast %315 : vector<16xf32> to vector<16x1xf32>
    %317 = vector.broadcast %316 : vector<16x1xf32> to vector<16x16xf32>
    %318 = arith.subf %314, %317 : vector<16x16xf32>
    %319 = math.exp %318 : vector<16x16xf32>
    %cst_110 = arith.constant dense<0.000000e+00> : vector<16xf32>
    %320 = vector.multi_reduction <add>, %319, %cst_110 [1] : vector<16x16xf32> to vector<16xf32>
    %321 = vector.shape_cast %320 : vector<16xf32> to vector<16x1xf32>
    %322 = tpu.reciprocal %321 {approx = true} : vector<16x1xf32> -> vector<16x1xf32>
    %323 = vector.broadcast %322 : vector<16x1xf32> to vector<16x16xf32>
    %324 = arith.mulf %319, %323 : vector<16x16xf32>
    %325 = vector.extract_strided_slice %286 {offsets = [0, 8], sizes = [16, 8], strides = [1, 1]} : vector<16x32xf32> to vector<16x8xf32>
    %cst_111 = arith.constant dense<0.000000e+00> : vector<16x8xf32>
    %326 = tpu.matmul %324, %325, %cst_111 {dimension_numbers = #tpu.dot_dimension_numbers<[1], [0], [0], [1], [0, 0, 1, 1], [], []>} : vector<16x16xf32>, vector<16x8xf32>, vector<16x8xf32> -> vector<16x8xf32>
    %327 = vector.extract_strided_slice %287 {offsets = [8, 0], sizes = [8, 32], strides = [1, 1]} : vector<32x32xf32> to vector<8x32xf32>
    %cst_112 = arith.constant dense<0.000000e+00> : vector<16x32xf32>
    %328 = tpu.matmul %326, %327, %cst_112 {dimension_numbers = #tpu.dot_dimension_numbers<[1], [0], [0], [1], [0, 0, 1, 1], [], []>} : vector<16x8xf32>, vector<8x32xf32>, vector<16x32xf32> -> vector<16x32xf32>
    %329 = arith.addf %308, %328 : vector<16x32xf32>
    %330 = vector.extract_strided_slice %284 {offsets = [0, 16], sizes = [16, 8], strides = [1, 1]} : vector<16x32xf32> to vector<16x8xf32>
    %331 = vector.extract_strided_slice %285 {offsets = [0, 16], sizes = [16, 8], strides = [1, 1]} : vector<16x32xf32> to vector<16x8xf32>
    %cst_113 = arith.constant dense<0.000000e+00> : vector<16x16xf32>
    %332 = tpu.matmul %330, %331, %cst_113 {dimension_numbers = #tpu.dot_dimension_numbers<[1], [1], [0], [0], [0, 0, 1, 0], [], []>} : vector<16x8xf32>, vector<16x8xf32>, vector<16x16xf32> -> vector<16x16xf32>
    %cst_114 = arith.constant 0.353553385 : f32
    %333 = vector.broadcast %cst_114 : f32 to vector<16x16xf32>
    %334 = arith.mulf %332, %333 : vector<16x16xf32>
    %335 = arith.addf %334, %2 : vector<16x16xf32>
    %cst_115 = arith.constant dense<0xFF800000> : vector<16xf32>
    %336 = vector.multi_reduction <maximumf>, %335, %cst_115 [1] : vector<16x16xf32> to vector<16xf32>
    %337 = vector.shape_cast %336 : vector<16xf32> to vector<16x1xf32>
    %338 = vector.broadcast %337 : vector<16x1xf32> to vector<16x16xf32>
    %339 = arith.subf %335, %338 : vector<16x16xf32>
    %340 = math.exp %339 : vector<16x16xf32>
    %cst_116 = arith.constant dense<0.000000e+00> : vector<16xf32>
    %341 = vector.multi_reduction <add>, %340, %cst_116 [1] : vector<16x16xf32> to vector<16xf32>
    %342 = vector.shape_cast %341 : vector<16xf32> to vector<16x1xf32>
    %343 = tpu.reciprocal %342 {approx = true} : vector<16x1xf32> -> vector<16x1xf32>
    %344 = vector.broadcast %343 : vector<16x1xf32> to vector<16x16xf32>
    %345 = arith.mulf %340, %344 : vector<16x16xf32>
    %346 = vector.extract_strided_slice %286 {offsets = [0, 16], sizes = [16, 8], strides = [1, 1]} : vector<16x32xf32> to vector<16x8xf32>
    %cst_117 = arith.constant dense<0.000000e+00> : vector<16x8xf32>
    %347 = tpu.matmul %345, %346, %cst_117 {dimension_numbers = #tpu.dot_dimension_numbers<[1], [0], [0], [1], [0, 0, 1, 1], [], []>} : vector<16x16xf32>, vector<16x8xf32>, vector<16x8xf32> -> vector<16x8xf32>
    %348 = vector.extract_strided_slice %287 {offsets = [16, 0], sizes = [8, 32], strides = [1, 1]} : vector<32x32xf32> to vector<8x32xf32>
    %cst_118 = arith.constant dense<0.000000e+00> : vector<16x32xf32>
    %349 = tpu.matmul %347, %348, %cst_118 {dimension_numbers = #tpu.dot_dimension_numbers<[1], [0], [0], [1], [0, 0, 1, 1], [], []>} : vector<16x8xf32>, vector<8x32xf32>, vector<16x32xf32> -> vector<16x32xf32>
    %350 = arith.addf %329, %349 : vector<16x32xf32>
    %351 = vector.extract_strided_slice %284 {offsets = [0, 24], sizes = [16, 8], strides = [1, 1]} : vector<16x32xf32> to vector<16x8xf32>
    %352 = vector.extract_strided_slice %285 {offsets = [0, 24], sizes = [16, 8], strides = [1, 1]} : vector<16x32xf32> to vector<16x8xf32>
    %cst_119 = arith.constant dense<0.000000e+00> : vector<16x16xf32>
    %353 = tpu.matmul %351, %352, %cst_119 {dimension_numbers = #tpu.dot_dimension_numbers<[1], [1], [0], [0], [0, 0, 1, 0], [], []>} : vector<16x8xf32>, vector<16x8xf32>, vector<16x16xf32> -> vector<16x16xf32>
    %cst_120 = arith.constant 0.353553385 : f32
    %354 = vector.broadcast %cst_120 : f32 to vector<16x16xf32>
    %355 = arith.mulf %353, %354 : vector<16x16xf32>
    %356 = arith.addf %355, %2 : vector<16x16xf32>
    %cst_121 = arith.constant dense<0xFF800000> : vector<16xf32>
    %357 = vector.multi_reduction <maximumf>, %356, %cst_121 [1] : vector<16x16xf32> to vector<16xf32>
    %358 = vector.shape_cast %357 : vector<16xf32> to vector<16x1xf32>
    %359 = vector.broadcast %358 : vector<16x1xf32> to vector<16x16xf32>
    %360 = arith.subf %356, %359 : vector<16x16xf32>
    %361 = math.exp %360 : vector<16x16xf32>
    %cst_122 = arith.constant dense<0.000000e+00> : vector<16xf32>
    %362 = vector.multi_reduction <add>, %361, %cst_122 [1] : vector<16x16xf32> to vector<16xf32>
    %363 = vector.shape_cast %362 : vector<16xf32> to vector<16x1xf32>
    %364 = tpu.reciprocal %363 {approx = true} : vector<16x1xf32> -> vector<16x1xf32>
    %365 = vector.broadcast %364 : vector<16x1xf32> to vector<16x16xf32>
    %366 = arith.mulf %361, %365 : vector<16x16xf32>
    %367 = vector.extract_strided_slice %286 {offsets = [0, 24], sizes = [16, 8], strides = [1, 1]} : vector<16x32xf32> to vector<16x8xf32>
    %cst_123 = arith.constant dense<0.000000e+00> : vector<16x8xf32>
    %368 = tpu.matmul %366, %367, %cst_123 {dimension_numbers = #tpu.dot_dimension_numbers<[1], [0], [0], [1], [0, 0, 1, 1], [], []>} : vector<16x16xf32>, vector<16x8xf32>, vector<16x8xf32> -> vector<16x8xf32>
    %369 = vector.extract_strided_slice %287 {offsets = [24, 0], sizes = [8, 32], strides = [1, 1]} : vector<32x32xf32> to vector<8x32xf32>
    %cst_124 = arith.constant dense<0.000000e+00> : vector<16x32xf32>
    %370 = tpu.matmul %368, %369, %cst_124 {dimension_numbers = #tpu.dot_dimension_numbers<[1], [0], [0], [1], [0, 0, 1, 1], [], []>} : vector<16x8xf32>, vector<8x32xf32>, vector<16x32xf32> -> vector<16x32xf32>
    %371 = arith.addf %350, %370 : vector<16x32xf32>
    %372 = vector.broadcast %288 : vector<1x32xf32> to vector<16x32xf32>
    %373 = arith.addf %371, %372 : vector<16x32xf32>
    %374 = arith.addf %278, %373 : vector<16x32xf32>
    %c560 = arith.constant 560 : index
    %c0_125 = arith.constant 0 : index
    %375 = vector.load %arg4[%c560, %c0_125] : memref<736x128xf32, #tpu.memory_space<vmem>>, vector<1x32xf32>
    %c568 = arith.constant 568 : index
    %c0_126 = arith.constant 0 : index
    %376 = vector.load %arg4[%c568, %c0_126] : memref<736x128xf32, #tpu.memory_space<vmem>>, vector<1x32xf32>
    %cst_127 = arith.constant dense<0.000000e+00> : vector<16xf32>
    %377 = vector.multi_reduction <add>, %374, %cst_127 [1] : vector<16x32xf32> to vector<16xf32>
    %378 = vector.shape_cast %377 : vector<16xf32> to vector<16x1xf32>
    %cst_128 = arith.constant 3.200000e+01 : f32
    %379 = vector.broadcast %cst_128 : f32 to vector<16x1xf32>
    %380 = arith.divf %378, %379 : vector<16x1xf32>
    %381 = vector.broadcast %380 : vector<16x1xf32> to vector<16x32xf32>
    %382 = arith.subf %374, %381 : vector<16x32xf32>
    %383 = arith.mulf %382, %382 : vector<16x32xf32>
    %cst_129 = arith.constant dense<0.000000e+00> : vector<16xf32>
    %384 = vector.multi_reduction <add>, %383, %cst_129 [1] : vector<16x32xf32> to vector<16xf32>
    %385 = vector.shape_cast %384 : vector<16xf32> to vector<16x1xf32>
    %cst_130 = arith.constant 3.200000e+01 : f32
    %386 = vector.broadcast %cst_130 : f32 to vector<16x1xf32>
    %387 = arith.divf %385, %386 : vector<16x1xf32>
    %cst_131 = arith.constant 9.99999974E-6 : f32
    %388 = vector.broadcast %cst_131 : f32 to vector<16x1xf32>
    %389 = arith.addf %387, %388 : vector<16x1xf32>
    %390 = math.rsqrt %389 : vector<16x1xf32>
    %391 = vector.broadcast %390 : vector<16x1xf32> to vector<16x32xf32>
    %392 = arith.mulf %382, %391 : vector<16x32xf32>
    %393 = vector.broadcast %375 : vector<1x32xf32> to vector<16x32xf32>
    %394 = arith.mulf %392, %393 : vector<16x32xf32>
    %395 = vector.broadcast %376 : vector<1x32xf32> to vector<16x32xf32>
    %396 = arith.addf %394, %395 : vector<16x32xf32>
    %c440 = arith.constant 440 : index
    %c0_132 = arith.constant 0 : index
    %397 = vector.load %arg4[%c440, %c0_132] : memref<736x128xf32, #tpu.memory_space<vmem>>, vector<32x32xf32>
    %cst_133 = arith.constant dense<0.000000e+00> : vector<16x32xf32>
    %398 = tpu.matmul %396, %397, %cst_133 {dimension_numbers = #tpu.dot_dimension_numbers<[1], [0], [0], [1], [0, 0, 1, 1], [], []>} : vector<16x32xf32>, vector<32x32xf32>, vector<16x32xf32> -> vector<16x32xf32>
    %c472 = arith.constant 472 : index
    %c0_134 = arith.constant 0 : index
    %399 = vector.load %arg4[%c472, %c0_134] : memref<736x128xf32, #tpu.memory_space<vmem>>, vector<1x32xf32>
    %400 = vector.broadcast %399 : vector<1x32xf32> to vector<16x32xf32>
    %401 = arith.addf %398, %400 : vector<16x32xf32>
    %c480 = arith.constant 480 : index
    %c0_135 = arith.constant 0 : index
    %402 = vector.load %arg4[%c480, %c0_135] : memref<736x128xf32, #tpu.memory_space<vmem>>, vector<32x64xf32>
    %cst_136 = arith.constant dense<0.000000e+00> : vector<32x64xf32>
    %403 = tpu.matmul %1, %402, %cst_136 {dimension_numbers = #tpu.dot_dimension_numbers<[1], [0], [0], [1], [0, 0, 1, 1], [], []>} : vector<32x32xf32>, vector<32x64xf32>, vector<32x64xf32> -> vector<32x64xf32>
    %c512 = arith.constant 512 : index
    %c0_137 = arith.constant 0 : index
    %404 = vector.load %arg4[%c512, %c0_137] : memref<736x128xf32, #tpu.memory_space<vmem>>, vector<1x64xf32>
    %405 = vector.broadcast %404 : vector<1x64xf32> to vector<32x64xf32>
    %406 = arith.addf %403, %405 : vector<32x64xf32>
    %407 = vector.extract_strided_slice %406 {offsets = [0, 0], sizes = [32, 32], strides = [1, 1]} : vector<32x64xf32> to vector<32x32xf32>
    %408 = vector.extract_strided_slice %406 {offsets = [0, 32], sizes = [32, 32], strides = [1, 1]} : vector<32x64xf32> to vector<32x32xf32>
    %c520 = arith.constant 520 : index
    %c0_138 = arith.constant 0 : index
    %409 = vector.load %arg4[%c520, %c0_138] : memref<736x128xf32, #tpu.memory_space<vmem>>, vector<32x32xf32>
    %c552 = arith.constant 552 : index
    %c0_139 = arith.constant 0 : index
    %410 = vector.load %arg4[%c552, %c0_139] : memref<736x128xf32, #tpu.memory_space<vmem>>, vector<1x32xf32>
    %411 = vector.extract_strided_slice %401 {offsets = [0, 0], sizes = [16, 8], strides = [1, 1]} : vector<16x32xf32> to vector<16x8xf32>
    %412 = vector.extract_strided_slice %407 {offsets = [0, 0], sizes = [32, 8], strides = [1, 1]} : vector<32x32xf32> to vector<32x8xf32>
    %cst_140 = arith.constant dense<0.000000e+00> : vector<16x32xf32>
    %413 = tpu.matmul %411, %412, %cst_140 {dimension_numbers = #tpu.dot_dimension_numbers<[1], [1], [0], [0], [0, 0, 1, 0], [], []>} : vector<16x8xf32>, vector<32x8xf32>, vector<16x32xf32> -> vector<16x32xf32>
    %cst_141 = arith.constant 0.353553385 : f32
    %414 = vector.broadcast %cst_141 : f32 to vector<16x32xf32>
    %415 = arith.mulf %413, %414 : vector<16x32xf32>
    %416 = arith.addf %415, %3 : vector<16x32xf32>
    %cst_142 = arith.constant dense<0xFF800000> : vector<16xf32>
    %417 = vector.multi_reduction <maximumf>, %416, %cst_142 [1] : vector<16x32xf32> to vector<16xf32>
    %418 = vector.shape_cast %417 : vector<16xf32> to vector<16x1xf32>
    %419 = vector.broadcast %418 : vector<16x1xf32> to vector<16x32xf32>
    %420 = arith.subf %416, %419 : vector<16x32xf32>
    %421 = math.exp %420 : vector<16x32xf32>
    %cst_143 = arith.constant dense<0.000000e+00> : vector<16xf32>
    %422 = vector.multi_reduction <add>, %421, %cst_143 [1] : vector<16x32xf32> to vector<16xf32>
    %423 = vector.shape_cast %422 : vector<16xf32> to vector<16x1xf32>
    %424 = tpu.reciprocal %423 {approx = true} : vector<16x1xf32> -> vector<16x1xf32>
    %425 = vector.broadcast %424 : vector<16x1xf32> to vector<16x32xf32>
    %426 = arith.mulf %421, %425 : vector<16x32xf32>
    %427 = vector.extract_strided_slice %408 {offsets = [0, 0], sizes = [32, 8], strides = [1, 1]} : vector<32x32xf32> to vector<32x8xf32>
    %cst_144 = arith.constant dense<0.000000e+00> : vector<16x8xf32>
    %428 = tpu.matmul %426, %427, %cst_144 {dimension_numbers = #tpu.dot_dimension_numbers<[1], [0], [0], [1], [0, 0, 1, 1], [], []>} : vector<16x32xf32>, vector<32x8xf32>, vector<16x8xf32> -> vector<16x8xf32>
    %429 = vector.extract_strided_slice %409 {offsets = [0, 0], sizes = [8, 32], strides = [1, 1]} : vector<32x32xf32> to vector<8x32xf32>
    %cst_145 = arith.constant dense<0.000000e+00> : vector<16x32xf32>
    %430 = tpu.matmul %428, %429, %cst_145 {dimension_numbers = #tpu.dot_dimension_numbers<[1], [0], [0], [1], [0, 0, 1, 1], [], []>} : vector<16x8xf32>, vector<8x32xf32>, vector<16x32xf32> -> vector<16x32xf32>
    %431 = vector.extract_strided_slice %401 {offsets = [0, 8], sizes = [16, 8], strides = [1, 1]} : vector<16x32xf32> to vector<16x8xf32>
    %432 = vector.extract_strided_slice %407 {offsets = [0, 8], sizes = [32, 8], strides = [1, 1]} : vector<32x32xf32> to vector<32x8xf32>
    %cst_146 = arith.constant dense<0.000000e+00> : vector<16x32xf32>
    %433 = tpu.matmul %431, %432, %cst_146 {dimension_numbers = #tpu.dot_dimension_numbers<[1], [1], [0], [0], [0, 0, 1, 0], [], []>} : vector<16x8xf32>, vector<32x8xf32>, vector<16x32xf32> -> vector<16x32xf32>
    %cst_147 = arith.constant 0.353553385 : f32
    %434 = vector.broadcast %cst_147 : f32 to vector<16x32xf32>
    %435 = arith.mulf %433, %434 : vector<16x32xf32>
    %436 = arith.addf %435, %3 : vector<16x32xf32>
    %cst_148 = arith.constant dense<0xFF800000> : vector<16xf32>
    %437 = vector.multi_reduction <maximumf>, %436, %cst_148 [1] : vector<16x32xf32> to vector<16xf32>
    %438 = vector.shape_cast %437 : vector<16xf32> to vector<16x1xf32>
    %439 = vector.broadcast %438 : vector<16x1xf32> to vector<16x32xf32>
    %440 = arith.subf %436, %439 : vector<16x32xf32>
    %441 = math.exp %440 : vector<16x32xf32>
    %cst_149 = arith.constant dense<0.000000e+00> : vector<16xf32>
    %442 = vector.multi_reduction <add>, %441, %cst_149 [1] : vector<16x32xf32> to vector<16xf32>
    %443 = vector.shape_cast %442 : vector<16xf32> to vector<16x1xf32>
    %444 = tpu.reciprocal %443 {approx = true} : vector<16x1xf32> -> vector<16x1xf32>
    %445 = vector.broadcast %444 : vector<16x1xf32> to vector<16x32xf32>
    %446 = arith.mulf %441, %445 : vector<16x32xf32>
    %447 = vector.extract_strided_slice %408 {offsets = [0, 8], sizes = [32, 8], strides = [1, 1]} : vector<32x32xf32> to vector<32x8xf32>
    %cst_150 = arith.constant dense<0.000000e+00> : vector<16x8xf32>
    %448 = tpu.matmul %446, %447, %cst_150 {dimension_numbers = #tpu.dot_dimension_numbers<[1], [0], [0], [1], [0, 0, 1, 1], [], []>} : vector<16x32xf32>, vector<32x8xf32>, vector<16x8xf32> -> vector<16x8xf32>
    %449 = vector.extract_strided_slice %409 {offsets = [8, 0], sizes = [8, 32], strides = [1, 1]} : vector<32x32xf32> to vector<8x32xf32>
    %cst_151 = arith.constant dense<0.000000e+00> : vector<16x32xf32>
    %450 = tpu.matmul %448, %449, %cst_151 {dimension_numbers = #tpu.dot_dimension_numbers<[1], [0], [0], [1], [0, 0, 1, 1], [], []>} : vector<16x8xf32>, vector<8x32xf32>, vector<16x32xf32> -> vector<16x32xf32>
    %451 = arith.addf %430, %450 : vector<16x32xf32>
    %452 = vector.extract_strided_slice %401 {offsets = [0, 16], sizes = [16, 8], strides = [1, 1]} : vector<16x32xf32> to vector<16x8xf32>
    %453 = vector.extract_strided_slice %407 {offsets = [0, 16], sizes = [32, 8], strides = [1, 1]} : vector<32x32xf32> to vector<32x8xf32>
    %cst_152 = arith.constant dense<0.000000e+00> : vector<16x32xf32>
    %454 = tpu.matmul %452, %453, %cst_152 {dimension_numbers = #tpu.dot_dimension_numbers<[1], [1], [0], [0], [0, 0, 1, 0], [], []>} : vector<16x8xf32>, vector<32x8xf32>, vector<16x32xf32> -> vector<16x32xf32>
    %cst_153 = arith.constant 0.353553385 : f32
    %455 = vector.broadcast %cst_153 : f32 to vector<16x32xf32>
    %456 = arith.mulf %454, %455 : vector<16x32xf32>
    %457 = arith.addf %456, %3 : vector<16x32xf32>
    %cst_154 = arith.constant dense<0xFF800000> : vector<16xf32>
    %458 = vector.multi_reduction <maximumf>, %457, %cst_154 [1] : vector<16x32xf32> to vector<16xf32>
    %459 = vector.shape_cast %458 : vector<16xf32> to vector<16x1xf32>
    %460 = vector.broadcast %459 : vector<16x1xf32> to vector<16x32xf32>
    %461 = arith.subf %457, %460 : vector<16x32xf32>
    %462 = math.exp %461 : vector<16x32xf32>
    %cst_155 = arith.constant dense<0.000000e+00> : vector<16xf32>
    %463 = vector.multi_reduction <add>, %462, %cst_155 [1] : vector<16x32xf32> to vector<16xf32>
    %464 = vector.shape_cast %463 : vector<16xf32> to vector<16x1xf32>
    %465 = tpu.reciprocal %464 {approx = true} : vector<16x1xf32> -> vector<16x1xf32>
    %466 = vector.broadcast %465 : vector<16x1xf32> to vector<16x32xf32>
    %467 = arith.mulf %462, %466 : vector<16x32xf32>
    %468 = vector.extract_strided_slice %408 {offsets = [0, 16], sizes = [32, 8], strides = [1, 1]} : vector<32x32xf32> to vector<32x8xf32>
    %cst_156 = arith.constant dense<0.000000e+00> : vector<16x8xf32>
    %469 = tpu.matmul %467, %468, %cst_156 {dimension_numbers = #tpu.dot_dimension_numbers<[1], [0], [0], [1], [0, 0, 1, 1], [], []>} : vector<16x32xf32>, vector<32x8xf32>, vector<16x8xf32> -> vector<16x8xf32>
    %470 = vector.extract_strided_slice %409 {offsets = [16, 0], sizes = [8, 32], strides = [1, 1]} : vector<32x32xf32> to vector<8x32xf32>
    %cst_157 = arith.constant dense<0.000000e+00> : vector<16x32xf32>
    %471 = tpu.matmul %469, %470, %cst_157 {dimension_numbers = #tpu.dot_dimension_numbers<[1], [0], [0], [1], [0, 0, 1, 1], [], []>} : vector<16x8xf32>, vector<8x32xf32>, vector<16x32xf32> -> vector<16x32xf32>
    %472 = arith.addf %451, %471 : vector<16x32xf32>
    %473 = vector.extract_strided_slice %401 {offsets = [0, 24], sizes = [16, 8], strides = [1, 1]} : vector<16x32xf32> to vector<16x8xf32>
    %474 = vector.extract_strided_slice %407 {offsets = [0, 24], sizes = [32, 8], strides = [1, 1]} : vector<32x32xf32> to vector<32x8xf32>
    %cst_158 = arith.constant dense<0.000000e+00> : vector<16x32xf32>
    %475 = tpu.matmul %473, %474, %cst_158 {dimension_numbers = #tpu.dot_dimension_numbers<[1], [1], [0], [0], [0, 0, 1, 0], [], []>} : vector<16x8xf32>, vector<32x8xf32>, vector<16x32xf32> -> vector<16x32xf32>
    %cst_159 = arith.constant 0.353553385 : f32
    %476 = vector.broadcast %cst_159 : f32 to vector<16x32xf32>
    %477 = arith.mulf %475, %476 : vector<16x32xf32>
    %478 = arith.addf %477, %3 : vector<16x32xf32>
    %cst_160 = arith.constant dense<0xFF800000> : vector<16xf32>
    %479 = vector.multi_reduction <maximumf>, %478, %cst_160 [1] : vector<16x32xf32> to vector<16xf32>
    %480 = vector.shape_cast %479 : vector<16xf32> to vector<16x1xf32>
    %481 = vector.broadcast %480 : vector<16x1xf32> to vector<16x32xf32>
    %482 = arith.subf %478, %481 : vector<16x32xf32>
    %483 = math.exp %482 : vector<16x32xf32>
    %cst_161 = arith.constant dense<0.000000e+00> : vector<16xf32>
    %484 = vector.multi_reduction <add>, %483, %cst_161 [1] : vector<16x32xf32> to vector<16xf32>
    %485 = vector.shape_cast %484 : vector<16xf32> to vector<16x1xf32>
    %486 = tpu.reciprocal %485 {approx = true} : vector<16x1xf32> -> vector<16x1xf32>
    %487 = vector.broadcast %486 : vector<16x1xf32> to vector<16x32xf32>
    %488 = arith.mulf %483, %487 : vector<16x32xf32>
    %489 = vector.extract_strided_slice %408 {offsets = [0, 24], sizes = [32, 8], strides = [1, 1]} : vector<32x32xf32> to vector<32x8xf32>
    %cst_162 = arith.constant dense<0.000000e+00> : vector<16x8xf32>
    %490 = tpu.matmul %488, %489, %cst_162 {dimension_numbers = #tpu.dot_dimension_numbers<[1], [0], [0], [1], [0, 0, 1, 1], [], []>} : vector<16x32xf32>, vector<32x8xf32>, vector<16x8xf32> -> vector<16x8xf32>
    %491 = vector.extract_strided_slice %409 {offsets = [24, 0], sizes = [8, 32], strides = [1, 1]} : vector<32x32xf32> to vector<8x32xf32>
    %cst_163 = arith.constant dense<0.000000e+00> : vector<16x32xf32>
    %492 = tpu.matmul %490, %491, %cst_163 {dimension_numbers = #tpu.dot_dimension_numbers<[1], [0], [0], [1], [0, 0, 1, 1], [], []>} : vector<16x8xf32>, vector<8x32xf32>, vector<16x32xf32> -> vector<16x32xf32>
    %493 = arith.addf %472, %492 : vector<16x32xf32>
    %494 = vector.broadcast %410 : vector<1x32xf32> to vector<16x32xf32>
    %495 = arith.addf %493, %494 : vector<16x32xf32>
    %496 = arith.addf %396, %495 : vector<16x32xf32>
    %c576 = arith.constant 576 : index
    %c0_164 = arith.constant 0 : index
    %497 = vector.load %arg4[%c576, %c0_164] : memref<736x128xf32, #tpu.memory_space<vmem>>, vector<1x32xf32>
    %c584 = arith.constant 584 : index
    %c0_165 = arith.constant 0 : index
    %498 = vector.load %arg4[%c584, %c0_165] : memref<736x128xf32, #tpu.memory_space<vmem>>, vector<1x32xf32>
    %cst_166 = arith.constant dense<0.000000e+00> : vector<16xf32>
    %499 = vector.multi_reduction <add>, %496, %cst_166 [1] : vector<16x32xf32> to vector<16xf32>
    %500 = vector.shape_cast %499 : vector<16xf32> to vector<16x1xf32>
    %cst_167 = arith.constant 3.200000e+01 : f32
    %501 = vector.broadcast %cst_167 : f32 to vector<16x1xf32>
    %502 = arith.divf %500, %501 : vector<16x1xf32>
    %503 = vector.broadcast %502 : vector<16x1xf32> to vector<16x32xf32>
    %504 = arith.subf %496, %503 : vector<16x32xf32>
    %505 = arith.mulf %504, %504 : vector<16x32xf32>
    %cst_168 = arith.constant dense<0.000000e+00> : vector<16xf32>
    %506 = vector.multi_reduction <add>, %505, %cst_168 [1] : vector<16x32xf32> to vector<16xf32>
    %507 = vector.shape_cast %506 : vector<16xf32> to vector<16x1xf32>
    %cst_169 = arith.constant 3.200000e+01 : f32
    %508 = vector.broadcast %cst_169 : f32 to vector<16x1xf32>
    %509 = arith.divf %507, %508 : vector<16x1xf32>
    %cst_170 = arith.constant 9.99999974E-6 : f32
    %510 = vector.broadcast %cst_170 : f32 to vector<16x1xf32>
    %511 = arith.addf %509, %510 : vector<16x1xf32>
    %512 = math.rsqrt %511 : vector<16x1xf32>
    %513 = vector.broadcast %512 : vector<16x1xf32> to vector<16x32xf32>
    %514 = arith.mulf %504, %513 : vector<16x32xf32>
    %515 = vector.broadcast %497 : vector<1x32xf32> to vector<16x32xf32>
    %516 = arith.mulf %514, %515 : vector<16x32xf32>
    %517 = vector.broadcast %498 : vector<1x32xf32> to vector<16x32xf32>
    %518 = arith.addf %516, %517 : vector<16x32xf32>
    %c608 = arith.constant 608 : index
    %c0_171 = arith.constant 0 : index
    %519 = vector.load %arg4[%c608, %c0_171] : memref<736x128xf32, #tpu.memory_space<vmem>>, vector<32x64xf32>
    %cst_172 = arith.constant dense<0.000000e+00> : vector<16x64xf32>
    %520 = tpu.matmul %518, %519, %cst_172 {dimension_numbers = #tpu.dot_dimension_numbers<[1], [0], [0], [1], [0, 0, 1, 1], [], []>} : vector<16x32xf32>, vector<32x64xf32>, vector<16x64xf32> -> vector<16x64xf32>
    %c640 = arith.constant 640 : index
    %c0_173 = arith.constant 0 : index
    %521 = vector.load %arg4[%c640, %c0_173] : memref<736x128xf32, #tpu.memory_space<vmem>>, vector<1x64xf32>
    %522 = vector.broadcast %521 : vector<1x64xf32> to vector<16x64xf32>
    %523 = arith.addf %520, %522 : vector<16x64xf32>
    %cst_174 = arith.constant 0.000000e+00 : f32
    %524 = vector.broadcast %cst_174 : f32 to vector<16x64xf32>
    %525 = arith.maximumf %523, %524 : vector<16x64xf32>
    %c648 = arith.constant 648 : index
    %c0_175 = arith.constant 0 : index
    %526 = vector.load %arg4[%c648, %c0_175] : memref<736x128xf32, #tpu.memory_space<vmem>>, vector<64x32xf32>
    %cst_176 = arith.constant dense<0.000000e+00> : vector<16x32xf32>
    %527 = tpu.matmul %525, %526, %cst_176 {dimension_numbers = #tpu.dot_dimension_numbers<[1], [0], [0], [1], [0, 0, 1, 1], [], []>} : vector<16x64xf32>, vector<64x32xf32>, vector<16x32xf32> -> vector<16x32xf32>
    %c712 = arith.constant 712 : index
    %c0_177 = arith.constant 0 : index
    %528 = vector.load %arg4[%c712, %c0_177] : memref<736x128xf32, #tpu.memory_space<vmem>>, vector<1x32xf32>
    %529 = vector.broadcast %528 : vector<1x32xf32> to vector<16x32xf32>
    %530 = arith.addf %527, %529 : vector<16x32xf32>
    %531 = arith.addf %518, %530 : vector<16x32xf32>
    %c592 = arith.constant 592 : index
    %c0_178 = arith.constant 0 : index
    %532 = vector.load %arg4[%c592, %c0_178] : memref<736x128xf32, #tpu.memory_space<vmem>>, vector<1x32xf32>
    %c600 = arith.constant 600 : index
    %c0_179 = arith.constant 0 : index
    %533 = vector.load %arg4[%c600, %c0_179] : memref<736x128xf32, #tpu.memory_space<vmem>>, vector<1x32xf32>
    %cst_180 = arith.constant dense<0.000000e+00> : vector<16xf32>
    %534 = vector.multi_reduction <add>, %531, %cst_180 [1] : vector<16x32xf32> to vector<16xf32>
    %535 = vector.shape_cast %534 : vector<16xf32> to vector<16x1xf32>
    %cst_181 = arith.constant 3.200000e+01 : f32
    %536 = vector.broadcast %cst_181 : f32 to vector<16x1xf32>
    %537 = arith.divf %535, %536 : vector<16x1xf32>
    %538 = vector.broadcast %537 : vector<16x1xf32> to vector<16x32xf32>
    %539 = arith.subf %531, %538 : vector<16x32xf32>
    %540 = arith.mulf %539, %539 : vector<16x32xf32>
    %cst_182 = arith.constant dense<0.000000e+00> : vector<16xf32>
    %541 = vector.multi_reduction <add>, %540, %cst_182 [1] : vector<16x32xf32> to vector<16xf32>
    %542 = vector.shape_cast %541 : vector<16xf32> to vector<16x1xf32>
    %cst_183 = arith.constant 3.200000e+01 : f32
    %543 = vector.broadcast %cst_183 : f32 to vector<16x1xf32>
    %544 = arith.divf %542, %543 : vector<16x1xf32>
    %cst_184 = arith.constant 9.99999974E-6 : f32
    %545 = vector.broadcast %cst_184 : f32 to vector<16x1xf32>
    %546 = arith.addf %544, %545 : vector<16x1xf32>
    %547 = math.rsqrt %546 : vector<16x1xf32>
    %548 = vector.broadcast %547 : vector<16x1xf32> to vector<16x32xf32>
    %549 = arith.mulf %539, %548 : vector<16x32xf32>
    %550 = vector.broadcast %532 : vector<1x32xf32> to vector<16x32xf32>
    %551 = arith.mulf %549, %550 : vector<16x32xf32>
    %552 = vector.broadcast %533 : vector<1x32xf32> to vector<16x32xf32>
    %553 = arith.addf %551, %552 : vector<16x32xf32>
    %c720 = arith.constant 720 : index
    %c0_185 = arith.constant 0 : index
    %554 = vector.load %arg4[%c720, %c0_185] : memref<736x128xf32, #tpu.memory_space<vmem>>, vector<1x32xf32>
    %c728 = arith.constant 728 : index
    %c0_186 = arith.constant 0 : index
    %555 = vector.load %arg4[%c728, %c0_186] : memref<736x128xf32, #tpu.memory_space<vmem>>, vector<1x32xf32>
    %cst_187 = arith.constant dense<0.000000e+00> : vector<16xf32>
    %556 = vector.multi_reduction <add>, %553, %cst_187 [1] : vector<16x32xf32> to vector<16xf32>
    %557 = vector.shape_cast %556 : vector<16xf32> to vector<16x1xf32>
    %cst_188 = arith.constant 3.200000e+01 : f32
    %558 = vector.broadcast %cst_188 : f32 to vector<16x1xf32>
    %559 = arith.divf %557, %558 : vector<16x1xf32>
    %560 = vector.broadcast %559 : vector<16x1xf32> to vector<16x32xf32>
    %561 = arith.subf %553, %560 : vector<16x32xf32>
    %562 = arith.mulf %561, %561 : vector<16x32xf32>
    %cst_189 = arith.constant dense<0.000000e+00> : vector<16xf32>
    %563 = vector.multi_reduction <add>, %562, %cst_189 [1] : vector<16x32xf32> to vector<16xf32>
    %564 = vector.shape_cast %563 : vector<16xf32> to vector<16x1xf32>
    %cst_190 = arith.constant 3.200000e+01 : f32
    %565 = vector.broadcast %cst_190 : f32 to vector<16x1xf32>
    %566 = arith.divf %564, %565 : vector<16x1xf32>
    %cst_191 = arith.constant 9.99999974E-6 : f32
    %567 = vector.broadcast %cst_191 : f32 to vector<16x1xf32>
    %568 = arith.addf %566, %567 : vector<16x1xf32>
    %569 = math.rsqrt %568 : vector<16x1xf32>
    %570 = vector.broadcast %569 : vector<16x1xf32> to vector<16x32xf32>
    %571 = arith.mulf %561, %570 : vector<16x32xf32>
    %572 = vector.broadcast %554 : vector<1x32xf32> to vector<16x32xf32>
    %573 = arith.mulf %571, %572 : vector<16x32xf32>
    %574 = vector.broadcast %555 : vector<1x32xf32> to vector<16x32xf32>
    %575 = arith.addf %573, %574 : vector<16x32xf32>
    %c0_192 = arith.constant 0 : index
    %c0_193 = arith.constant 0 : index
    %576 = vector.load %arg5[%c0_192, %c0_193] : memref<16x32xf32, #tpu.memory_space<vmem>>, vector<16x32xf32>
    tpu.vector_store %arg5[%c0_192, %c0_193], %575 {strides = array<i32>} : memref<16x32xf32, #tpu.memory_space<vmem>>, vector<16x32xf32>,
    return
  }
}

</mosaic_0001>

<bundles_post_ra>
// kernel: tile.8
= control target key start
LH: loop header
LB: loop body
LE: loop exit
PB: predicated region body
PF: predicated region fallthrough
CT: control target
= control target key end

     0   :  { %s154_s0 = inlined_call_operand.vmem [shape: f32[8,8], index: 0, kind: input, shape index: {}]   ;;  %s155_s1 = inlined_call_operand.vmem [shape: f32[2,8,2,8], index: 1, kind: output, shape index: {}]  }
   0x1   :  { %v4_v0 = vld [vmem:[%s154_s0] ss:$0 sm:$0xff]  ;;  %v51_v1 = vld [vmem:[%s154_s0 + $0x1] ss:$0 sm:$0xff]  ;;  %v54_v2 = vld [vmem:[%s154_s0 + $0x2] ss:$0 sm:$0xff] }
   0x2   :  { %5 = vst [vmem:[%s155_s1] sm:$0x3] %v4_v0  ;;  %50 = vst [vmem:[%s155_s1 + $0x10] sm:$0x3] %v4_v0  ;;  %v57_v3 = vld [vmem:[%s154_s0 + $0x3] ss:$0 sm:$0xff] }
   0x3   :  { %52 = vst [vmem:[%s155_s1 + $0x2] sm:$0x3] %v51_v1  ;;  %53 = vst [vmem:[%s155_s1 + $0x12] sm:$0x3] %v51_v1  ;;  %v60_v4 = vld [vmem:[%s154_s0 + $0x4] ss:$0 sm:$0xff] }
   0x4   :  { %55 = vst [vmem:[%s155_s1 + $0x4] sm:$0x3] %v54_v2  ;;  %56 = vst [vmem:[%s155_s1 + $0x14] sm:$0x3] %v54_v2  ;;  %v63_v5 = vld [vmem:[%s154_s0 + $0x5] ss:$0 sm:$0xff] }
   0x5   :  { %58 = vst [vmem:[%s155_s1 + $0x6] sm:$0x3] %v57_v3  ;;  %59 = vst [vmem:[%s155_s1 + $0x16] sm:$0x3] %v57_v3  ;;  %v66_v6 = vld [vmem:[%s154_s0 + $0x6] ss:$0 sm:$0xff] }
   0x6   :  { %61 = vst [vmem:[%s155_s1 + $0x8] sm:$0x3] %v60_v4  ;;  %62 = vst [vmem:[%s155_s1 + $0x18] sm:$0x3] %v60_v4  ;;  %v69_v7 = vld [vmem:[%s154_s0 + $0x7] ss:$0 sm:$0xff] }
   0x7   :  { %64 = vst [vmem:[%s155_s1 + $0xa] sm:$0x3] %v63_v5  ;;  %65 = vst [vmem:[%s155_s1 + $0x1a] sm:$0x3] %v63_v5 }
   0x8   :  { %67 = vst [vmem:[%s155_s1 + $0xc] sm:$0x3] %v66_v6  ;;  %68 = vst [vmem:[%s155_s1 + $0x1c] sm:$0x3] %v66_v6 }
   0x9   :  { %70 = vst [vmem:[%s155_s1 + $0xe] sm:$0x3] %v69_v7  ;;  %71 = vst [vmem:[%s155_s1 + $0x1e] sm:$0x3] %v69_v7 }

// kernel: tile.9
= control target key start
LH: loop header
LB: loop body
LE: loop exit
PB: predicated region body
PF: predicated region fallthrough
CT: control target
= control target key end

     0   :  { %vm82_vm0 = vcmask 1047556   ;;  %vm84_vm1 = vcmask 64512   ;;  %vm103_vm2 = vcmask 130112   ;;  %s225_s0 = inlined_call_operand.vmem [shape: f32[2,8,2,8], index: 0, kind: input, shape index: {}]   ;;  %s226_s1 = inlined_call_operand.vmem [shape: f32[16,16], index: 1, kind: output, shape index: {}]  }
   0x1   :  { %v138_v0 = vld [vmem:[%s225_s0 + $0xe] sm:$0x3]  ;;  %v139_v1 = vld [vmem:[%s225_s0 + $0xc] sm:$0x3]  ;;  %v140_v2 = vld [vmem:[%s225_s0 + $0xa] sm:$0x3] }
   0x2   :  { %48 = vst [vmem:[#allocation0 + $0x38] sm:$0x3] %v138_v0  ;;  %53 = vst [vmem:[#allocation0 + $0x30] sm:$0x3] %v139_v1  ;;  %v141_v3 = vld [vmem:[%s225_s0 + $0x8] sm:$0x3] }
   0x3   :  { %58 = vst [vmem:[#allocation0 + $0x28] sm:$0x3] %v140_v2  ;;  %v142_v4 = vld [vmem:[%s225_s0 + $0x6] sm:$0x3]  ;;  %v143_v5 = vld [vmem:[%s225_s0 + $0x4] sm:$0x3] }
   0x4   :  { %63 = vst [vmem:[#allocation0 + $0x20] sm:$0x3] %v141_v3  ;;  %68 = vst [vmem:[#allocation0 + $0x18] sm:$0x3] %v142_v4  ;;  %v144_v6 = vld [vmem:[%s225_s0 + $0x2] sm:$0x3] }
   0x5   :  { %73 = vst [vmem:[#allocation0 + $0x10] sm:$0x3] %v143_v5  ;;  %v78_v7 = vld [vmem:[%s225_s0] sm:$0x3]  ;;  %77 = vst [vmem:[#allocation0 + $0x8] sm:$0x3] %v144_v6 }
   0x6   :  { %79 = vst [vmem:[#allocation0] sm:$0x3] %v78_v7  ;;  %v130_v8 = vld [vmem:[%s225_s0 + $0x1e] sm:$0x3]  ;;  %v131_v9 = vld [vmem:[%s225_s0 + $0x1c] sm:$0x3] }
   0x7   :  { %v132_v10 = vld [vmem:[%s225_s0 + $0x1a] sm:$0x3]  ;;  %8 = vst [vmem:[#allocation0 + $0x78] sm:$0x3] %v130_v8  ;;  %13 = vst [vmem:[#allocation0 + $0x70] sm:$0x3] %v131_v9 }
   0x8   :  { %18 = vst [vmem:[#allocation0 + $0x68] sm:$0x3] %v132_v10  ;;  %v133_v11 = vld [vmem:[%s225_s0 + $0x18] sm:$0x3]  ;;  %v134_v12 = vld [vmem:[%s225_s0 + $0x16] sm:$0x3] }
   0x9   :  { %v135_v13 = vld [vmem:[%s225_s0 + $0x14] sm:$0x3]  ;;  %23 = vst [vmem:[#allocation0 + $0x60] sm:$0x3] %v133_v11  ;;  %28 = vst [vmem:[#allocation0 + $0x58] sm:$0x3] %v134_v12 }
   0xa   :  { %33 = vst [vmem:[#allocation0 + $0x50] sm:$0x3] %v135_v13  ;;  %v136_v14 = vld [vmem:[%s225_s0 + $0x12] sm:$0x3]  ;;  %v137_v15 = vld [vmem:[%s225_s0 + $0x10] sm:$0x3] }
   0xb   :  { %38 = vst [vmem:[#allocation0 + $0x48] sm:$0x3] %v136_v14  ;;  %43 = vst [vmem:[#allocation0 + $0x40] sm:$0x3] %v137_v15  ;;  %s148_s0 = smov 8  }
   0xc   :  { %v98_v16 = vld [vmem:[#allocation0 + $0x1] ss:$8 sm:$0xf0]   ;;  %v81_v17 = vld [vmem:[#allocation0] ss:$8 sm:$0xf0]  }
   0xd   :  { %v96_v18 = vld [vmem:[#allocation0 + $0x1] ss:$8 sm:$0xf]   ;;  %v80_v19 = vld [vmem:[#allocation0] ss:$8 sm:$0xf]  }
   0xe   :  { %v100_v20 = vsel %vm82_vm0, %v98_v16, %v96_v18  ;;  %v83_v21 = vsel %vm82_vm0, %v81_v17, %v80_v19 }
   0xf   :  { %101 = vrot.lane.b32.xlu0 %v100_v20, %s148_s0  ;;  %85 = vst.msk [vmem:[%s226_s1] sm:$0xff] %vm84_vm1, %v83_v21  }
  0x10   :  { %v108_v22 = vld [vmem:[#allocation0 + $0x41] ss:$8 sm:$0xf0]   ;;  %v89_v23 = vld [vmem:[#allocation0 + $0x40] ss:$8 sm:$0xf0]  }
  0x12   :  { %v106_v24 = vld [vmem:[#allocation0 + $0x41] ss:$8 sm:$0xf]   ;;  %v87_v25 = vld [vmem:[#allocation0 + $0x40] ss:$8 sm:$0xf]  }
  0x13   :  { %v110_v26 = vsel %vm82_vm0, %v108_v22, %v106_v24  ;;  %v91_v27 = vsel %vm82_vm0, %v89_v23, %v87_v25 }
  0x14   :  { %145 = vst.msk [vmem:[%s226_s1 + $0x8] sm:$0xff] %vm84_vm1, %v91_v27   ;;  %111 = vrot.lane.b32.xlu0 %v110_v26, %s148_s0 }
  0x81   :  { %v102_v28 = vpop.permute.xlu0 %101  }
  0x82   :  { %104 = vst.msk [vmem:[%s226_s1] sm:$0xff] %vm103_vm2, %v102_v28  }
  0x86   :  { %v112_v29 = vpop.permute.xlu0 %111  }
  0x87   :  { %146 = vst.msk [vmem:[%s226_s1 + $0x8] sm:$0xff] %vm103_vm2, %v112_v29  }

// kernel: decoder_forward.1
= control target key start
LH: loop header
LB: loop body
LE: loop exit
PB: predicated region body
PF: predicated region fallthrough
CT: control target
= control target key end

     0   :  { %10 = vsyncpa [#allocation3], 0  ;;  %s8513_s0 = inlined_call_operand.vmem [shape: f32[16,32], index: 0, kind: input, shape index: {}]   ;;  %s8514_s1 = inlined_call_operand.vmem [shape: f32[32,32], index: 1, kind: input, shape index: {}]   ;;  %s8515_s2 = inlined_call_operand.vmem [shape: f32[16,16], index: 2, kind: input, shape index: {}]   ;;  %s8516_s3 = inlined_call_operand.vmem [shape: f32[16,32], index: 3, kind: input, shape index: {}]   ;;  %s8517_s4 = inlined_call_operand.hbm [shape: f32[736,128], index: 4, kind: input, shape index: {}]   ;;  %s8518_s5 = inlined_call_operand.hbm [shape: f32[16,32], index: 5, kind: output, shape index: {}]  }
   0x1   :  { %11 = vsyncpa [#allocation4], 0  ;;  %s7792_s18 = smov [#allocation2]   ;;  %s7744_s22 = scalar_lea.hbm %s8517_s4, 11776 }
   0x2   :  { %s25_s19 = sshll.u32 %s7792_s18, 4  ;;  %p7745_p0 = scmp.ne.s32.totalorder %s8517_s4, %s7744_s22  ;;  %s26_s19 = int_to_ptr.vmem [resolvable:$true] %s25_s19 }
   0x3   :  { %p7748_p1 = scmp.lt.u32.totalorder %s7744_s22, %s8517_s4 }
   0x5   :  { %p7750_p2 = pnand %p7748_p1, %p7745_p0 }
   0x7   :  { %7753 = shalt.err (!%p7750_p2)
}
   0x8   :  { %s7754_s27 = scalar_lea.vmem %s26_s19, 11776  ;;  %p7759_p4 = scmp.lt.s32.totalorder %s26_s19, %s26_s19 }
   0x9   :  { %p7755_p3 = scmp.ne.s32.totalorder %s26_s19, %s7754_s27  ;;  %p7760_p5 = scmp.lt.s32.totalorder %s7754_s27, %s7754_s27 }
   0xb   :  { %p7761_p6 = por %p7760_p5, %p7759_p4 }
   0xd   :  { %p7762_p7 = pnand %p7761_p6, %p7755_p3 }
   0xf   :  { %7765 = shalt.err (!%p7762_p7)
}
  0x10   :  { %s7793_s28 = smov 128   ;;  %s7794_s29 = smov 8  }
  0x11   :  { %31 = dma.hbm_to_vmem [thread:$0]  %s8517_s4, 11776, %s26_s19, [#allocation3], %s7793_s28, %s7793_s28, %s7794_s29  }
  0x12   :  { %7788 = dma.done.wait [#allocation3], 11776  }
  0x13   :  { %7789 = vsyncadd [#allocation3], 4294955520  ;;  %vm54_vm0 = vcmask 261120   ;;  %v45_v0 = vld [vmem:[#allocation2] sm:$0xff]  ;;  %v46_v1 = vld [vmem:[#allocation2 + $0x8] sm:$0xff]  ;;  %vm147_vm1 = vcmask 64512  }
  0x14   :  { %v47_v2 = vld [vmem:[#allocation2 + $0x10] sm:$0xff]  ;;  %v6985_v3 = vpack.c.bf16 %v46_v1, %v45_v0  ;;  %v48_v4 = vld [vmem:[#allocation2 + $0x18] sm:$0xff]  ;;  %v7855_v5 = vld [vmem:[%s8513_s0] sm:$0xff]  ;;  %s7795_s10 = smov 120   ;;  %s7797_s11 = smov 88   ;;  %vm235_vm3 = vcmask 130048  }
  0x15   :  { %v6989_v6 = vpack.c.bf16 %v48_v4, %v47_v2  ;;  %6493 = vmatprep.mubr.msk.f32.mxu1 %vm54_vm0, %v7855_v5  ;;  %v7862_v7 = vld [vmem:[%s8513_s0 + $0x8] sm:$0xff]  ;;  %v6009_v8 = vld [vmem:[#allocation2 + $0x20] ss:$0 sm:$0xff]  ;;  %s7796_s0 = smov 96   ;;  %s7798_s12 = smov 112   ;;  %vm7892_vm2 = vmpackc.low %vm147_vm1, %vm147_vm1  ;;  %vm2882_vm4 = vcmask 523264  }
  0x16   :  { %6986 = vmatprep.subr.bf16.mxu1 %v6985_v3  ;;  %s7799_s13 = smov 80   ;;  %v7917_v32 = vld [vmem:[%s8515_s2 + $0x8] sm:$0xff]  ;;  %v7922_v35 = vld [vmem:[%s8515_s2] sm:$0xff]  ;;  %s7800_s18 = smov 56  }
  0x17   :  { %6988 = vmatpush3.bf16.msra.mxu1 %v6985_v3  ;;  %s7801_s19 = smov 72   ;;  %s7802_s20 = smov 64  }
  0x18   :  { %6990 = vmatprep.subr.bf16.mxu1 %v6989_v6  ;;  %s7803_s21 = smov 104   ;;  %s7804_s22 = smov 48  }
  0x19   :  { %s7805_s23 = smov 40  }
  0x1b   :  { %6992 = vmatpush3.bf16.msra.mxu1 %v6989_v6 }
  0x1e   :  { %6494 = vmatmul.mubr.msk.f32.vlgmr.msra.gmra.mrb[0].mxu1 %vm54_vm0, %v7862_v7 }
  0xf1   :  { %v6495_v9 = vpop.f32.mrb[0].mxu1 }
  0xf2   :  { %v7866_v10 = vadd.f32 %v6495_v9, %v6009_v8  ;;  %v127_v11 = vpop.f32.mrb[1].mxu1 }
  0xf3   :  { %v7868_v12 = vadd.f32 %v6009_v8, %v127_v11 }
  0xf5   :  { %345 = vrot.lane.b32.xlu1 %v7868_v12, %s7795_s10  ;;  %6500 = vmatprep.mubr.msk.f32.mxu1 %vm147_vm1, %v7868_v12  ;;  %v7876_v13 = vpack.i.bf16 %v7866_v10, %v7868_v12 }
  0xf7   :  { %7361 = vrot.lane.b32.xlu0 %v7876_v13, %s7796_s0 }
  0xf9   :  { %347 = vrot.lane.b32.xlu1 %v7866_v10, %s7795_s10 }
  0xfb   :  { %7366 = vrot.lane.b32.xlu0 %v7876_v13, %s7797_s11 }
  0xfd   :  { %711 = vrot.lane.b32.xlu1 %v7868_v12, %s7798_s12 }
  0xff   :  { %7371 = vrot.lane.b32.xlu0 %v7876_v13, %s7799_s13 }
 0x103   :  { %713 = vrot.lane.b32.xlu0 %v7866_v10, %s7798_s12 }
 0x167   :  { %v346_v24 = vpop.permute.xlu1 %345 }
 0x169   :  { %v7362_v14 = vpop.permute.xlu0 %7361 }
 0x16a   :  { %v7364_v15 = vunpack.i.h.bf16 %v7362_v14  ;;  %v7363_v16 = vunpack.i.l.bf16 %v7362_v14 }
 0x16b   :  { %v348_v28 = vpop.permute.xlu1 %347 }
 0x16c   :  { %v6993_v18 = vpack.c.bf16 %v7364_v15, %v7363_v16 }
 0x16d   :  { %v7367_v19 = vpop.permute.xlu0 %7366 }
 0x16e   :  { %v7369_v20 = vunpack.i.h.bf16 %v7367_v19  ;;  %v7368_v21 = vunpack.i.l.bf16 %v7367_v19  ;;  %6995 = vmatprep.subr.msk.bf16.mxu1 %vm7892_vm2, %v6993_v18 }
 0x16f   :  { %6998 = vmatpush3.bf16.xpose.msk.msra.mxu1 %vm7892_vm2, %v6993_v18  ;;  %v712_v29 = vpop.permute.xlu1 %711 }
 0x170   :  { %v7003_v22 = vpack.c.bf16 %v7369_v20, %v7368_v21 }
 0x171   :  { %v7372_v23 = vpop.permute.xlu0 %7371 }
 0x172   :  { %v7374_v25 = vunpack.i.h.bf16 %v7372_v23  ;;  %v7373_v26 = vunpack.i.l.bf16 %v7372_v23  ;;  %7005 = vmatprep.subr.msk.bf16.mxu1 %vm7892_vm2, %v7003_v22 }
 0x174   :  { %v7013_v27 = vpack.c.bf16 %v7374_v25, %v7373_v26 }
 0x175   :  { %v714_v30 = vpop.permute.xlu0 %713 }
 0x176   :  { %6501 = vmatmul.mubr.msk.f32.vlgmr.msra.gmra.mrb[2].mxu1 %vm147_vm1, %v7866_v10 }
 0x177   :  { %7008 = vmatpush3.bf16.xpose.msk.msra.mxu1 %vm7892_vm2, %v7003_v22  ;;  %6514 = vmatprep.mubr.msk.f32.mxu1 %vm147_vm1, %v346_v24 }
 0x178   :  { %7015 = vmatprep.subr.msk.bf16.mxu1 %vm7892_vm2, %v7013_v27 }
 0x17e   :  { %6515 = vmatmul.mubr.msk.f32.vlgmr.msra.gmra.mrb[4].mxu1 %vm147_vm1, %v348_v28 }
 0x17f   :  { %7018 = vmatpush3.bf16.xpose.msk.msra.mxu1 %vm7892_vm2, %v7013_v27  ;;  %6538 = vmatprep.mubr.msk.f32.mxu1 %vm147_vm1, %v712_v29 }
 0x186   :  { %6539 = vmatmul.mubr.msk.f32.vlgmr.msra.gmra.mrb[6].mxu1 %vm147_vm1, %v714_v30 }
 0x249   :  { %v6502_v31 = vpop.f32.mrb[2].mxu1 }
 0x24a   :  { %v232_v33 = vmul.f32 0.35355338, %v6502_v31  ;;  %v222_v34 = vpop.f32.mrb[3].mxu1 }
 0x24b   :  { %v231_v36 = vmul.f32 0.35355338, %v222_v34 }
 0x24c   :  { %v234_v37 = vadd.f32 %v232_v33, %v7917_v32 }
 0x24d   :  { %v233_v38 = vadd.f32 %v231_v36, %v7922_v35 }
 0x24e   :  { %v239_v39 = vsel %vm235_vm3, %v234_v37, -inf }
 0x24f   :  { %240 = vmax.xlane.f32.xlu0 %v239_v39  ;;  %v236_v40 = vsel %vm235_vm3, %v233_v38, -inf }
 0x250   :  { %237 = vmax.xlane.f32.xlu1 %v236_v40 }
 0x251   :  { %v6516_v41 = vpop.f32.mrb[4].mxu1 }
 0x252   :  { %v437_v42 = vmul.f32 0.35355338, %v6516_v41  ;;  %v427_v43 = vpop.f32.mrb[5].mxu1 }
 0x253   :  { %v436_v44 = vmul.f32 0.35355338, %v427_v43 }
 0x254   :  { %v439_v45 = vadd.f32 %v437_v42, %v7917_v32 }
 0x255   :  { %v438_v46 = vadd.f32 %v436_v44, %v7922_v35 }
 0x256   :  { %v443_v47 = vsel %vm235_vm3, %v439_v45, -inf }
 0x257   :  { %444 = vmax.xlane.f32.xlu1 %v443_v47  ;;  %v440_v48 = vsel %vm235_vm3, %v438_v46, -inf }
 0x258   :  { %441 = vmax.xlane.f32.xlu0 %v440_v48 }
 0x259   :  { %v6540_v49 = vpop.f32.mrb[6].mxu1 }
 0x25a   :  { %v793_v50 = vpop.f32.mrb[7].mxu1  ;;  %v803_v11 = vmul.f32 0.35355338, %v6540_v49 }
 0x25b   :  { %v802_v9 = vmul.f32 0.35355338, %v793_v50 }
 0x25c   :  { %v805_v15 = vadd.f32 %v803_v11, %v7917_v32 }
 0x25d   :  { %v804_v14 = vadd.f32 %v802_v9, %v7922_v35 }
 0x25e   :  { %v809_v18 = vsel %vm235_vm3, %v805_v15, -inf }
 0x25f   :  { %v806_v16 = vsel %vm235_vm3, %v804_v14, -inf }
 0x2dc   :  { %v241_v51 = vpop.xlane.xlu0 %240 }
 0x2dd   :  { %v243_v52 = vsub.f32 %v234_v37, %v241_v51  ;;  %v238_v53 = vpop.xlane.xlu1 %237 }
 0x2de   :  { %v242_v54 = vsub.f32 %v233_v38, %v238_v53 }
 0x2df   :  { %v246_v55 = vmul.f32 1.442695, %v243_v52 }
 0x2e0   :  { %v244_v56 = vmul.f32 1.442695, %v242_v54  ;;  %v137_v54 = vld [vmem:[#allocation2 + $0x30] sm:$0xff] }
 0x2e1   :  { %7580 = vpow2.f32 %v246_v55  ;;  %v136_v55 = vld [vmem:[#allocation2 + $0x28] sm:$0xff] }
 0x2e2   :  { %7582 = vpow2.f32 %v244_v56 }
 0x2e4   :  { %v445_v57 = vpop.xlane.xlu1 %444 }
 0x2e5   :  { %v447_v58 = vsub.f32 %v439_v45, %v445_v57  ;;  %v442_v59 = vpop.xlane.xlu0 %441 }
 0x2e6   :  { %v446_v60 = vsub.f32 %v438_v46, %v442_v59 }
 0x2e7   :  { %v450_v61 = vmul.f32 1.442695, %v447_v58 }
 0x2e8   :  { %v448_v62 = vmul.f32 1.442695, %v446_v60 }
 0x2e9   :  { %7584 = vpow2.f32 %v450_v61 }
 0x2ea   :  { %7586 = vpow2.f32 %v448_v62 }
 0x2eb   :  { %v7932_v63 = vpop.eup %7580 }
 0x2ec   :  { %v7583_v0 = vpop.eup %7582  ;;  %v251_v1 = vsel %vm235_vm3, %v7932_v63, 0.0 }
 0x2ed   :  { %252 = vadd.xlane.f32.xlu1 %v251_v1  ;;  %v248_v2 = vsel %vm235_vm3, %v7583_v0, 0.0 }
 0x2ee   :  { %249 = vadd.xlane.f32.xlu0 %v248_v2 }
 0x2f3   :  { %v7937_v3 = vpop.eup %7584 }
 0x2f4   :  { %v7587_v4 = vpop.eup %7586  ;;  %v455_v6 = vsel %vm235_vm3, %v7937_v3, 0.0 }
 0x2f5   :  { %456 = vadd.xlane.f32.xlu1 %v455_v6  ;;  %v452_v8 = vsel %vm235_vm3, %v7587_v4, 0.0 }
 0x2f6   :  { %453 = vadd.xlane.f32.xlu0 %v452_v8 }
 0x306   :  { %7381 = vrot.lane.b32.xlu1 %v7876_v13, %s7800_s18 }
 0x30a   :  { %7386 = vrot.lane.b32.xlu1 %v7876_v13, %s7801_s19 }
 0x30c   :  { %7376 = vrot.lane.b32.xlu0 %v7876_v13, %s7802_s20 }
 0x30e   :  { %1000 = vrot.lane.b32.xlu1 %v7866_v10, %s7803_s21 }
 0x310   :  { %998 = vrot.lane.b32.xlu0 %v7868_v12, %s7803_s21 }
 0x32f   :  { %807 = vmax.xlane.f32.xlu0 %v806_v16 }
 0x332   :  { %810 = vmax.xlane.f32.xlu1 %v809_v18 }
 0x343   :  { %7391 = vrot.lane.b32.xlu1 %v7876_v13, %s7804_s22 }
 0x347   :  { %7396 = vrot.lane.b32.xlu1 %v7876_v13, %s7805_s23 }
 0x37a   :  { %v253_v12 = vpop.xlane.xlu1 %252 }
 0x37b   :  { %v250_v10 = vpop.xlane.xlu0 %249 }
 0x37c   :  { %7588 = vrcp.f32 %v250_v10  ;;  %v138_v10 = vld [vmem:[#allocation2 + $0x38] sm:$0xff] }
 0x37d   :  { %7590 = vrcp.f32 %v253_v12 }
 0x382   :  { %v457_v19 = vpop.xlane.xlu1 %456 }
 0x383   :  { %v454_v20 = vpop.xlane.xlu0 %453 }
 0x384   :  { %7592 = vrcp.f32 %v454_v20 }
 0x385   :  { %7594 = vrcp.f32 %v457_v19 }
 0x386   :  { %v7589_v21 = vpop.eup %7588  ;;  %v7382_v22 = vpop.permute.xlu1 %7381 }
 0x387   :  { %v7377_v23 = vpop.permute.xlu0 %7376  ;;  %v256_v24 = vmul.f32 %v7589_v21, %v7583_v0  ;;  %v7384_v25 = vunpack.i.h.bf16 %v7382_v22  ;;  %v7383_v26 = vunpack.i.l.bf16 %v7382_v22  ;;  %v7591_v30 = vpop.eup %7590 }
 0x388   :  { %v7379_v27 = vunpack.i.h.bf16 %v7377_v23  ;;  %v7378_v28 = vunpack.i.l.bf16 %v7377_v23  ;;  %v257_v39 = vmul.f32 %v7591_v30, %v7932_v63 }
 0x389   :  { %6507 = vmatprep.mubr.msk.f32.mxu0 %vm235_vm3, %v256_v24  ;;  %v7009_v36 = vpack.c.bf16 %v7384_v25, %v7383_v26 }
 0x38a   :  { %v7387_v29 = vpop.permute.xlu1 %7386  ;;  %v6999_v13 = vpack.c.bf16 %v7379_v27, %v7378_v28 }
 0x38b   :  { %v7389_v31 = vunpack.i.h.bf16 %v7387_v29  ;;  %v7388_v33 = vunpack.i.l.bf16 %v7387_v29  ;;  %v999_v34 = vpop.permute.xlu0 %998 }
 0x38c   :  { %7000 = vmatprep.subr.bf16.mxu0 %v6999_v13  ;;  %6557 = vmatprep.mubr.msk.f32.mxu1 %vm147_vm1, %v999_v34 }
 0x38d   :  { %v7023_v37 = vpack.c.bf16 %v7389_v31, %v7388_v33  ;;  %7002 = vmatpush3.bf16.msra.mxu0 %v6999_v13  ;;  %v139_v33 = vld [vmem:[#allocation2 + $0x40] sm:$0xff] }
 0x38e   :  { %v7593_v38 = vpop.eup %7592  ;;  %7010 = vmatprep.subr.bf16.mxu0 %v7009_v36  ;;  %v1001_v43 = vpop.permute.xlu1 %1000 }
 0x38f   :  { %v7595_v40 = vpop.eup %7594  ;;  %7025 = vmatprep.subr.msk.bf16.mxu1 %vm7892_vm2, %v7023_v37  ;;  %v460_v41 = vmul.f32 %v7593_v38, %v7587_v4 }
 0x390   :  { %6508 = vmatmul.mubr.msk.f32.vlgmr.msra.gmra.mrb[0].mxu0 %vm235_vm3, %v257_v39  ;;  %7028 = vmatpush3.bf16.xpose.msk.msra.mxu1 %vm7892_vm2, %v7023_v37  ;;  %v461_v42 = vmul.f32 %v7595_v40, %v7937_v3 }
 0x391   :  { %7012 = vmatpush3.bf16.msra.mxu0 %v7009_v36  ;;  %6521 = vmatprep.mubr.msk.f32.mxu0 %vm235_vm3, %v460_v41 }
 0x392   :  { %6524 = vmatprep.subr.mxu0 %v137_v54 }
 0x394   :  { %6522 = vmatmul.mubr.msk.f32.vlgmr.msra.gmra.mrb[2].mxu0 %vm235_vm3, %v461_v42 }
 0x395   :  { %6525 = vmatpush3.msra.mxu0 %v137_v54 }
 0x396   :  { %6529 = vmatprep.subr.mxu0 %v136_v55 }
 0x397   :  { %6558 = vmatmul.mubr.msk.f32.vlgmr.msra.gmra.mrb[8].mxu1 %vm147_vm1, %v1001_v43  ;;  %v6044_v43 = vld [vmem:[#allocation2 + $0x48] ss:$0 sm:$0xff] }
 0x3bc   :  { %v808_v44 = vpop.xlane.xlu0 %807 }
 0x3bd   :  { %v812_v45 = vsub.f32 %v804_v14, %v808_v44 }
 0x3bf   :  { %v814_v46 = vmul.f32 1.442695, %v812_v45  ;;  %v811_v47 = vpop.xlane.xlu1 %810 }
 0x3c0   :  { %v813_v48 = vsub.f32 %v805_v15, %v811_v47 }
 0x3c1   :  { %7596 = vpow2.f32 %v814_v46 }
 0x3c2   :  { %v816_v49 = vmul.f32 1.442695, %v813_v48 }
 0x3c3   :  { %v7392_v57 = vpop.permute.xlu1 %7391 }
 0x3c4   :  { %7598 = vpow2.f32 %v816_v49  ;;  %v7394_v61 = vunpack.i.h.bf16 %v7392_v57  ;;  %v7393_v62 = vunpack.i.l.bf16 %v7392_v57 }
 0x3c6   :  { %v7019_v2 = vpack.c.bf16 %v7394_v61, %v7393_v62 }
 0x3c7   :  { %v7397_v11 = vpop.permute.xlu1 %7396 }
 0x3c8   :  { %v7399_v12 = vunpack.i.h.bf16 %v7397_v11  ;;  %v7398_v19 = vunpack.i.l.bf16 %v7397_v11  ;;  %v1336_v11 = vld [vmem:[#allocation2 + $0x60] sm:$0xff] }
 0x3ca   :  { %v7029_v21 = vpack.c.bf16 %v7399_v12, %v7398_v19 }
 0x3cb   :  { %v7597_v50 = vpop.eup %7596 }
 0x3cc   :  { %v818_v51 = vsel %vm235_vm3, %v7597_v50, 0.0 }
 0x3cd   :  { %819 = vadd.xlane.f32.xlu0 %v818_v51 }
 0x3ce   :  { %v7599_v52 = vpop.eup %7598 }
 0x3cf   :  { %v821_v53 = vsel %vm235_vm3, %v7599_v52, 0.0 }
 0x3d1   :  { %822 = vadd.xlane.f32.xlu0 %v821_v53  ;;  %v1425_v53 = vld [vmem:[#allocation2 + $0x80] sm:$0xff] }
 0x45a   :  { %v820_v56 = vpop.xlane.xlu0 %819 }
 0x45b   :  { %7600 = vrcp.f32 %v820_v56 }
 0x45e   :  { %v823_v59 = vpop.xlane.xlu0 %822 }
 0x45f   :  { %7602 = vrcp.f32 %v823_v59 }
 0x463   :  { %v6509_v58 = vpop.f32.mrb[0].mxu0 }
 0x464   :  { %v336_v60 = vpop.f32.mrb[1].mxu0 }
 0x465   :  { %v7601_v8 = vpop.eup %7600 }
 0x466   :  { %v826_v18 = vmul.f32 %v7601_v8, %v7597_v50  ;;  %v1334_v8 = vld [vmem:[#allocation2 + $0x50] sm:$0xff] }
 0x467   :  { %v6523_v63 = vpop.f32.mrb[2].mxu0 }
 0x468   :  { %v540_v0 = vpop.f32.mrb[3].mxu0 }
 0x469   :  { %6526 = vmatprep.mubr.msk.f32.mxu0 %vm147_vm1, %v540_v0  ;;  %v7603_v16 = vpop.eup %7602  ;;  %v1427_v0 = vld [vmem:[#allocation2 + $0x90] sm:$0xff] }
 0x46a   :  { %6527 = vmatmul.mubr.msk.f32.vlgmr.msra.gmra.mrb[4].mxu0 %vm147_vm1, %v6523_v63  ;;  %v6559_v1 = vpop.f32.mrb[8].mxu1  ;;  %v1426_v63 = vld [vmem:[#allocation2 + $0x88] sm:$0xff] }
 0x46b   :  { %6530 = vmatpush3.msra.mxu0 %v136_v55  ;;  %6531 = vmatprep.mubr.msk.f32.mxu0 %vm147_vm1, %v336_v60  ;;  %v1080_v3 = vpop.f32.mrb[9].mxu1  ;;  %v1090_v4 = vmul.f32 0.35355338, %v6559_v1  ;;  %v7045_v1 = vpack.c.bf16 %v1427_v0, %v1426_v63 }
 0x46c   :  { %7020 = vmatprep.subr.bf16.mxu0 %v7019_v2  ;;  %v1089_v6 = vmul.f32 0.35355338, %v1080_v3  ;;  %v38_v3 = vld [vmem:[%s8514_s1 + $0x8] sm:$0xff] }
 0x46d   :  { %v1092_v15 = vadd.f32 %v1090_v4, %v7917_v32  ;;  %v39_v4 = vld [vmem:[%s8514_s1 + $0x10] sm:$0xff] }
 0x46e   :  { %v1091_v9 = vadd.f32 %v1089_v6, %v7922_v35  ;;  %v827_v35 = vmul.f32 %v7603_v16, %v7599_v52  ;;  %v1424_v52 = vld [vmem:[#allocation2 + $0x78] sm:$0xff] }
 0x46f   :  { %v1096_v20 = vsel %vm235_vm3, %v1092_v15, -inf  ;;  %v7041_v54 = vpack.c.bf16 %v1425_v53, %v1424_v52  ;;  %v40_v6 = vld [vmem:[%s8514_s1 + $0x18] sm:$0xff] }
 0x470   :  { %v1093_v14 = vsel %vm235_vm3, %v1091_v9, -inf }
 0x471   :  { %1094 = vmax.xlane.f32.xlu0 %v1093_v14  ;;  %v1337_v14 = vld [vmem:[#allocation2 + $0x68] sm:$0xff] }
 0x472   :  { %6532 = vmatmul.mubr.msk.f32.vlgmr.msra.gmra.mrb[4].mxu0 %vm147_vm1, %v6509_v58  ;;  %v7037_v16 = vpack.c.bf16 %v1337_v14, %v1336_v11 }
 0x473   :  { %7022 = vmatpush3.bf16.msra.mxu0 %v7019_v2  ;;  %6545 = vmatprep.mubr.msk.f32.mxu0 %vm235_vm3, %v826_v18  ;;  %v37_v2 = vld [vmem:[%s8514_s1] sm:$0xff] }
 0x474   :  { %6548 = vmatprep.subr.mxu0 %v138_v10 }
 0x475   :  { %1097 = vmax.xlane.f32.xlu0 %v1096_v20 }
 0x476   :  { %6546 = vmatmul.mubr.msk.f32.vlgmr.msra.gmra.mrb[6].mxu0 %vm235_vm3, %v827_v35 }
 0x477   :  { %6549 = vmatpush3.msra.mxu0 %v138_v10 }
 0x478   :  { %7030 = vmatprep.subr.bf16.mxu0 %v7029_v21 }
 0x4fe   :  { %v1095_v32 = vpop.xlane.xlu0 %1094 }
 0x4ff   :  { %v1099_v22 = vsub.f32 %v1091_v9, %v1095_v32  ;;  %v1335_v9 = vld [vmem:[#allocation2 + $0x58] sm:$0xff]  ;;  %v6045_v32 = vld [vmem:[#allocation2 + $0xc8] ss:$0 sm:$0xff] }
 0x501   :  { %v1101_v23 = vmul.f32 1.442695, %v1099_v22 }
 0x502   :  { %v1098_v24 = vpop.xlane.xlu0 %1097 }
 0x503   :  { %7604 = vpow2.f32 %v1101_v23  ;;  %v1100_v25 = vsub.f32 %v1092_v15, %v1098_v24  ;;  %v7033_v15 = vpack.c.bf16 %v1335_v9, %v1334_v8  ;;  %v6046_v23 = vld [vmem:[#allocation2 + $0xd0] ss:$0 sm:$0xff] }
 0x505   :  { %v1103_v26 = vmul.f32 1.442695, %v1100_v25  ;;  %7034 = vmatprep.subr.bf16.mxu1 %v7033_v15 }
 0x506   :  { %7036 = vmatpush3.bf16.msra.mxu1 %v7033_v15 }
 0x507   :  { %7606 = vpow2.f32 %v1103_v26  ;;  %7038 = vmatprep.subr.bf16.mxu1 %v7037_v16 }
 0x50a   :  { %7040 = vmatpush3.bf16.msra.mxu1 %v7037_v16 }
 0x50d   :  { %v7605_v27 = vpop.eup %7604 }
 0x50e   :  { %v1105_v28 = vsel %vm235_vm3, %v7605_v27, 0.0 }
 0x50f   :  { %1106 = vadd.xlane.f32.xlu0 %v1105_v28 }
 0x511   :  { %v7607_v29 = vpop.eup %7606 }
 0x512   :  { %v1108_v13 = vsel %vm235_vm3, %v7607_v29, 0.0 }
 0x513   :  { %1109 = vadd.xlane.f32.xlu0 %v1108_v13  ;;  %v6050_v13 = vld [vmem:[#allocation2 + $0x98] ss:$0 sm:$0xff] }
 0x549   :  { %v6547_v30 = vpop.f32.mrb[6].mxu0 }
 0x54a   :  { %v906_v31 = vpop.f32.mrb[7].mxu0 }
 0x54b   :  { %6550 = vmatprep.mubr.msk.f32.mxu0 %vm147_vm1, %v906_v31 }
 0x54c   :  { %6551 = vmatmul.mubr.msk.f32.vlgmr.msra.gmra.mrb[4].mxu0 %vm147_vm1, %v6547_v30 }
 0x54d   :  { %7032 = vmatpush3.bf16.msra.mxu0 %v7029_v21 }
 0x54e   :  { %6567 = vmatprep.subr.mxu0 %v139_v33 }
 0x59c   :  { %v1107_v34 = vpop.xlane.xlu0 %1106 }
 0x59d   :  { %7608 = vrcp.f32 %v1107_v34 }
 0x5a0   :  { %v1110_v36 = vpop.xlane.xlu0 %1109 }
 0x5a1   :  { %7610 = vrcp.f32 %v1110_v36 }
 0x5a7   :  { %v7609_v37 = vpop.eup %7608 }
 0x5a8   :  { %v1113_v38 = vmul.f32 %v7609_v37, %v7605_v27 }
 0x5aa   :  { %6564 = vmatprep.mubr.msk.f32.mxu0 %vm235_vm3, %v1113_v38 }
 0x5ab   :  { %v7611_v39 = vpop.eup %7610 }
 0x5ac   :  { %v1114_v40 = vmul.f32 %v7611_v39, %v7607_v29 }
 0x5ae   :  { %6565 = vmatmul.mubr.msk.f32.vlgmr.msra.gmra.mrb[8].mxu0 %vm235_vm3, %v1114_v40 }
 0x5af   :  { %6568 = vmatpush3.msra.mxu0 %v139_v33 }
 0x5b0   :  { %7042 = vmatprep.subr.bf16.mxu0 %v7041_v54 }
 0x681   :  { %v6566_v41 = vpop.f32.mrb[8].mxu0 }
 0x682   :  { %v1193_v42 = vpop.f32.mrb[9].mxu0 }
 0x683   :  { %6569 = vmatprep.mubr.msk.f32.mxu0 %vm147_vm1, %v1193_v42 }
 0x684   :  { %6570 = vmatmul.mubr.msk.f32.vlgmr.msra.gmra.mrb[4].mxu0 %vm147_vm1, %v6566_v41 }
 0x685   :  { %7044 = vmatpush3.bf16.msra.mxu0 %v7041_v54  ;;  %6591 = vmatprep.mubr.msk.f32.mxu0 %vm54_vm0, %v37_v2  ;;  %v8058_v54 = vld [vmem:[%s8516_s3 + $0x8] sm:$0xff] }
 0x686   :  { %7046 = vmatprep.subr.bf16.mxu0 %v7045_v1 }
 0x689   :  { %7048 = vmatpush3.bf16.msra.mxu0 %v7045_v1 }
 0x68c   :  { %6592 = vmatmul.mubr.msk.f32.vlgmr.msra.gmra.mrb[10].mxu0 %vm54_vm0, %v38_v3 }
 0x68d   :  { %6594 = vmatprep.mubr.msk.f32.mxu0 %vm54_vm0, %v39_v4 }
 0x690   :  { %6595 = vmatmul.mubr.msk.f32.gmra.mrb[12].mxu0 %vm54_vm0, %v40_v6 }
 0x757   :  { %v6571_v44 = vpop.f32.mrb[4].mxu0 }
 0x758   :  { %v1290_v45 = vadd.f32 %v6571_v44, %v6044_v43  ;;  %v1274_v46 = vpop.f32.mrb[5].mxu0  ;;  %v6047_v44 = vld [vmem:[#allocation2 + $0x70] ss:$0 sm:$0xff] }
 0x759   :  { %v1289_v47 = vadd.f32 %v6044_v43, %v1274_v46 }
 0x75a   :  { %v1292_v48 = vadd.f32 %v1290_v45, %v7862_v7 }
 0x75b   :  { %v1291_v49 = vadd.f32 %v1289_v47, %v7855_v5 }
 0x75c   :  { %v1298_v50 = vsel %vm54_vm0, %v1292_v48, 0.0 }
 0x75d   :  { %1299 = vadd.xlane.f32.xlu1 %v1298_v50  ;;  %v1295_v51 = vsel %vm54_vm0, %v1291_v49, 0.0 }
 0x75e   :  { %1296 = vadd.xlane.f32.xlu0 %v1295_v51  ;;  %v8053_v51 = vld [vmem:[%s8516_s3] sm:$0xff] }
 0x75f   :  { %v6593_v30 = vpop.f32.mrb[10].mxu0 }
 0x760   :  { %v1517_v31 = vadd.f32 %v6593_v30, %v6050_v13  ;;  %v1511_v33 = vpop.f32.mrb[11].mxu0 }
 0x761   :  { %v1512_v34 = vadd.f32 %v6050_v13, %v1511_v33 }
 0x763   :  { %v7049_v36 = vpack.c.bf16 %v1517_v31, %v1512_v34  ;;  %v6596_v37 = vpop.f32.mrb[12].mxu0  ;;  %v8022_v40 = vpack.i.bf16 %v1517_v31, %v1512_v34 }
 0x764   :  { %v1527_v38 = vadd.f32 %v6596_v37, %v6050_v13  ;;  %v1521_v39 = vpop.f32.mrb[13].mxu0 }
 0x765   :  { %7051 = vmatprep.subr.msk.bf16.mxu1 %vm7892_vm2, %v7049_v36  ;;  %v1522_v41 = vadd.f32 %v6050_v13, %v1521_v39 }
 0x767   :  { %v7055_v42 = vpack.c.bf16 %v1527_v38, %v1522_v41  ;;  %v8028_v43 = vpack.i.bf16 %v1527_v38, %v1522_v41 }
 0x76e   :  { %7406 = vrot.lane.b32.xlu1 %v8028_v43, %s7796_s0 }
 0x7ea   :  { %v1300_v55 = vpop.xlane.xlu1 %1299 }
 0x7eb   :  { %v1303_v56 = vmul.f32 0.03125, %v1300_v55  ;;  %v1297_v57 = vpop.xlane.xlu0 %1296 }
 0x7ec   :  { %v1302_v58 = vmul.f32 0.03125, %v1297_v57 }
 0x7ed   :  { %v1305_v59 = vsub.f32 %v1292_v48, %v1303_v56 }
 0x7ee   :  { %v1304_v60 = vsub.f32 %v1291_v49, %v1302_v58 }
 0x7ef   :  { %v1307_v61 = vmul.f32 %v1305_v59, %v1305_v59 }
 0x7f0   :  { %v1306_v7 = vmul.f32 %v1304_v60, %v1304_v60 }
 0x7f1   :  { %v1311_v62 = vsel %vm54_vm0, %v1307_v61, 0.0 }
 0x7f2   :  { %v1308_v5 = vsel %vm54_vm0, %v1306_v7, 0.0 }
 0x7f3   :  { %1309 = vadd.xlane.f32.xlu0 %v1308_v5  ;;  %v7407_v5 = vpop.permute.xlu1 %7406 }
 0x7f4   :  { %v7409_v0 = vunpack.i.h.bf16 %v7407_v5  ;;  %v7408_v2 = vunpack.i.l.bf16 %v7407_v5 }
 0x7f6   :  { %v7065_v8 = vpack.c.bf16 %v7409_v0, %v7408_v2 }
 0x7f7   :  { %1312 = vadd.xlane.f32.xlu0 %v1311_v62 }
 0x880   :  { %v1310_v18 = vpop.xlane.xlu0 %1309 }
 0x881   :  { %v1314_v10 = vmul.f32 0.03125, %v1310_v18 }
 0x883   :  { %v1316_v12 = vadd.f32 1e-05, %v1314_v10 }
 0x884   :  { %v1313_v19 = vpop.xlane.xlu0 %1312 }
 0x885   :  { %7612 = vrsqrt.f32 %v1316_v12  ;;  %v1315_v20 = vmul.f32 0.03125, %v1313_v19 }
 0x887   :  { %v1317_v35 = vadd.f32 1e-05, %v1315_v20 }
 0x889   :  { %7614 = vrsqrt.f32 %v1317_v35 }
 0x88f   :  { %v7613_v21 = vpop.eup %7612 }
 0x890   :  { %v1320_v22 = vmul.f32 %v7613_v21, %v1304_v60 }
 0x892   :  { %v1326_v24 = vmul.f32 %v6045_v32, %v1320_v22 }
 0x893   :  { %v7615_v25 = vpop.eup %7614 }
 0x894   :  { %v1321_v26 = vmul.f32 %v7615_v25, %v1305_v59  ;;  %v8014_v27 = vadd.f32 %v6046_v23, %v1326_v24 }
 0x896   :  { %v1327_v28 = vmul.f32 %v6045_v32, %v1321_v26  ;;  %6580 = vmatprep.mubr.msk.f32.mxu1 %vm54_vm0, %v8014_v27 }
 0x898   :  { %v8018_v29 = vadd.f32 %v6046_v23, %v1327_v28 }
 0x89a   :  { %6581 = vmatmul.mubr.msk.f32.vlgmr.msra.gmra.mrb[10].mxu1 %vm54_vm0, %v8018_v29 }
 0x89b   :  { %7054 = vmatpush3.bf16.xpose.msk.msra.mxu1 %vm7892_vm2, %v7049_v36 }
 0x89c   :  { %7057 = vmatprep.subr.msk.bf16.mxu1 %vm7892_vm2, %v7055_v42 }
 0x8a3   :  { %7060 = vmatpush3.bf16.xpose.msk.msra.mxu1 %vm7892_vm2, %v7055_v42 }
 0x96d   :  { %v6582_v45 = vpop.f32.mrb[10].mxu1 }
 0x96e   :  { %v1415_v46 = vpop.f32.mrb[11].mxu1  ;;  %v8038_v48 = vadd.f32 %v6582_v45, %v6047_v44 }
 0x96f   :  { %v8036_v47 = vadd.f32 %v6047_v44, %v1415_v46 }
 0x971   :  { %1747 = vrot.lane.b32.xlu1 %v8036_v47, %s7795_s10  ;;  %6605 = vmatprep.mubr.msk.f32.mxu1 %vm147_vm1, %v8036_v47 }
 0x972   :  { %6606 = vmatmul.mubr.msk.f32.vlgmr.msra.gmra.mrb[12].mxu1 %vm147_vm1, %v8038_v48 }
 0x975   :  { %7421 = vrot.lane.b32.xlu1 %v8022_v40, %s7798_s12 }
 0x979   :  { %2127 = vrot.lane.b32.xlu1 %v8036_v47, %s7798_s12 }
 0x9e3   :  { %v1748_v32 = vpop.permute.xlu1 %1747 }
 0x9e7   :  { %v7422_v13 = vpop.permute.xlu1 %7421 }
 0x9e8   :  { %v7424_v31 = vunpack.i.h.bf16 %v7422_v13  ;;  %v7423_v33 = vunpack.i.l.bf16 %v7422_v13 }
 0x9ea   :  { %v7089_v34 = vpack.c.bf16 %v7424_v31, %v7423_v33 }
 0x9eb   :  { %v2128_v39 = vpop.permute.xlu1 %2127 }
 0xa45   :  { %v6607_v49 = vpop.f32.mrb[12].mxu1 }
 0xa46   :  { %v1619_v50 = vpop.f32.mrb[13].mxu1  ;;  %v1629_v52 = vmul.f32 0.35355338, %v6607_v49 }
 0xa47   :  { %v1628_v53 = vmul.f32 0.35355338, %v1619_v50 }
 0xa48   :  { %v1631_v57 = vadd.f32 %v1629_v52, %v8058_v54 }
 0xa49   :  { %v1630_v55 = vadd.f32 %v1628_v53, %v8053_v51 }
 0xa4a   :  { %v1635_v58 = vsel %vm54_vm0, %v1631_v57, -inf }
 0xa4b   :  { %v1632_v56 = vsel %vm54_vm0, %v1630_v55, -inf }
 0xa4c   :  { %1633 = vmax.xlane.f32.xlu0 %v1632_v56 }
 0xa50   :  { %1636 = vmax.xlane.f32.xlu0 %v1635_v58 }
 0xa66   :  { %7401 = vrot.lane.b32.xlu0 %v8022_v40, %s7796_s0 }
 0xad9   :  { %v1634_v59 = vpop.xlane.xlu0 %1633 }
 0xada   :  { %v1638_v60 = vsub.f32 %v1630_v55, %v1634_v59 }
 0xadc   :  { %v1640_v62 = vmul.f32 1.442695, %v1638_v60 }
 0xadd   :  { %v1637_v7 = vpop.xlane.xlu0 %1636 }
 0xade   :  { %v1639_v61 = vsub.f32 %v1631_v57, %v1637_v7 }
 0xae0   :  { %v1642_v63 = vmul.f32 1.442695, %v1639_v61 }
 0xae1   :  { %v7402_v1 = vpop.permute.xlu0 %7401 }
 0xae2   :  { %7616 = vpow2.f32 %v1642_v63  ;;  %v7404_v3 = vunpack.i.h.bf16 %v7402_v1  ;;  %v7403_v4 = vunpack.i.l.bf16 %v7402_v1 }
 0xae3   :  { %7618 = vpow2.f32 %v1640_v62 }
 0xae4   :  { %v7061_v6 = vpack.c.bf16 %v7404_v3, %v7403_v4 }
 0xae6   :  { %7062 = vmatprep.subr.bf16.mxu0 %v7061_v6 }
 0xae7   :  { %7064 = vmatpush3.bf16.msra.mxu0 %v7061_v6 }
 0xae8   :  { %7066 = vmatprep.subr.bf16.mxu0 %v7065_v8 }
 0xaeb   :  { %7068 = vmatpush3.bf16.msra.mxu0 %v7065_v8 }
 0xaec   :  { %v7617_v9 = vpop.eup %7616 }
 0xaed   :  { %v1647_v11 = vsel %vm54_vm0, %v7617_v9, 0.0  ;;  %v7619_v14 = vpop.eup %7618 }
 0xaee   :  { %1648 = vadd.xlane.f32.xlu0 %v1647_v11  ;;  %v1644_v15 = vsel %vm54_vm0, %v7619_v14, 0.0 }
 0xaf2   :  { %1645 = vadd.xlane.f32.xlu0 %v1644_v15 }
 0xb08   :  { %7411 = vrot.lane.b32.xlu0 %v8022_v40, %s7795_s10 }
 0xb0c   :  { %7416 = vrot.lane.b32.xlu0 %v8028_v43, %s7795_s10 }
 0xb10   :  { %1749 = vrot.lane.b32.xlu0 %v8038_v48, %s7795_s10 }
 0xb14   :  { %7426 = vrot.lane.b32.xlu0 %v8028_v43, %s7798_s12 }
 0xb18   :  { %2129 = vrot.lane.b32.xlu0 %v8038_v48, %s7798_s12 }
 0xb7b   :  { %v1649_v16 = vpop.xlane.xlu0 %1648 }
 0xb7c   :  { %7620 = vrcp.f32 %v1649_v16 }
 0xb7f   :  { %v1646_v18 = vpop.xlane.xlu0 %1645 }
 0xb80   :  { %7622 = vrcp.f32 %v1646_v18 }
 0xb83   :  { %v7412_v10 = vpop.permute.xlu0 %7411 }
 0xb84   :  { %v7414_v12 = vunpack.i.h.bf16 %v7412_v10  ;;  %v7413_v19 = vunpack.i.l.bf16 %v7412_v10 }
 0xb86   :  { %v7069_v20 = vpack.c.bf16 %v7414_v12, %v7413_v19  ;;  %v7621_v21 = vpop.eup %7620 }
 0xb87   :  { %v7417_v35 = vpop.permute.xlu0 %7416  ;;  %v1653_v26 = vmul.f32 %v7621_v21, %v7617_v9 }
 0xb88   :  { %7071 = vmatprep.subr.msk.bf16.mxu0 %vm7892_vm2, %v7069_v20  ;;  %v7419_v23 = vunpack.i.h.bf16 %v7417_v35  ;;  %v7418_v24 = vunpack.i.l.bf16 %v7417_v35 }
 0xb8a   :  { %v7623_v22 = vpop.eup %7622  ;;  %v7075_v28 = vpack.c.bf16 %v7419_v23, %v7418_v24 }
 0xb8b   :  { %v1652_v25 = vmul.f32 %v7623_v22, %v7619_v14  ;;  %v1750_v30 = vpop.permute.xlu0 %1749 }
 0xb8d   :  { %6616 = vmatprep.mubr.msk.f32.mxu0 %vm54_vm0, %v1652_v25 }
 0xb8e   :  { %6617 = vmatmul.mubr.msk.f32.vlgmr.msra.gmra.mrb[14].mxu0 %vm54_vm0, %v1653_v26 }
 0xb8f   :  { %7074 = vmatpush3.bf16.xpose.msk.msra.mxu0 %vm7892_vm2, %v7069_v20  ;;  %6627 = vmatprep.mubr.msk.f32.mxu0 %vm147_vm1, %v1748_v32  ;;  %v7427_v36 = vpop.permute.xlu0 %7426 }
 0xb90   :  { %7077 = vmatprep.subr.msk.bf16.mxu0 %vm7892_vm2, %v7075_v28  ;;  %v7429_v37 = vunpack.i.h.bf16 %v7427_v36  ;;  %v7428_v38 = vunpack.i.l.bf16 %v7427_v36 }
 0xb92   :  { %v7095_v41 = vpack.c.bf16 %v7429_v37, %v7428_v38 }
 0xb93   :  { %v2130_v42 = vpop.permute.xlu0 %2129 }
 0xb97   :  { %7080 = vmatpush3.bf16.xpose.msk.msra.mxu0 %vm7892_vm2, %v7075_v28 }
 0xb98   :  { %7091 = vmatprep.subr.msk.bf16.mxu0 %vm7892_vm2, %v7089_v34 }
 0xb9e   :  { %6628 = vmatmul.mubr.msk.f32.vlgmr.msra.gmra.mrb[16].mxu0 %vm147_vm1, %v1750_v30 }
 0xb9f   :  { %7094 = vmatpush3.bf16.xpose.msk.msra.mxu0 %vm7892_vm2, %v7089_v34  ;;  %6659 = vmatprep.mubr.msk.f32.mxu0 %vm147_vm1, %v2128_v39  ;;  %v1531_v39 = vld [vmem:[#allocation2 + $0xa8] sm:$0xff] }
 0xba0   :  { %7097 = vmatprep.subr.msk.bf16.mxu0 %vm7892_vm2, %v7095_v41 }
 0xba7   :  { %7100 = vmatpush3.bf16.xpose.msk.msra.mxu0 %vm7892_vm2, %v7095_v41  ;;  %v1530_v41 = vld [vmem:[#allocation2 + $0xa0] sm:$0xff] }
 0xbae   :  { %6660 = vmatmul.mubr.msk.f32.vlgmr.msra.gmra.mrb[18].mxu0 %vm147_vm1, %v2130_v42 }
 0xc61   :  { %v8100_v44 = vpop.f32.mrb[14].mxu0 }
 0xc62   :  { %v8102_v45 = vpop.f32.mrb[15].mxu0 }
 0xc71   :  { %v6629_v46 = vpop.f32.mrb[16].mxu0 }
 0xc72   :  { %v1847_v49 = vmul.f32 0.35355338, %v6629_v46  ;;  %v1837_v50 = vpop.f32.mrb[17].mxu0 }
 0xc73   :  { %v1846_v52 = vmul.f32 0.35355338, %v1837_v50 }
 0xc74   :  { %v1849_v53 = vadd.f32 %v1847_v49, %v8058_v54 }
 0xc75   :  { %v1848_v55 = vadd.f32 %v1846_v52, %v8053_v51 }
 0xc76   :  { %v1853_v56 = vsel %vm54_vm0, %v1849_v53, -inf }
 0xc77   :  { %1854 = vmax.xlane.f32.xlu0 %v1853_v56  ;;  %v1850_v57 = vsel %vm54_vm0, %v1848_v55, -inf }
 0xc78   :  { %1851 = vmax.xlane.f32.xlu1 %v1850_v57 }
 0xc81   :  { %v6661_v58 = vpop.f32.mrb[18].mxu0 }
 0xc82   :  { %v2217_v59 = vpop.f32.mrb[19].mxu0  ;;  %v2227_v6 = vmul.f32 0.35355338, %v6661_v58 }
 0xc83   :  { %v2226_v4 = vmul.f32 0.35355338, %v2217_v59 }
 0xc84   :  { %v2229_v9 = vadd.f32 %v2227_v6, %v8058_v54 }
 0xc85   :  { %v2228_v8 = vadd.f32 %v2226_v4, %v8053_v51 }
 0xc86   :  { %v2233_v14 = vsel %vm54_vm0, %v2229_v9, -inf }
 0xc87   :  { %v2230_v11 = vsel %vm54_vm0, %v2228_v8, -inf }
 0xd04   :  { %v1855_v60 = vpop.xlane.xlu0 %1854 }
 0xd05   :  { %v1857_v7 = vsub.f32 %v1849_v53, %v1855_v60  ;;  %v1852_v5 = vpop.xlane.xlu1 %1851 }
 0xd06   :  { %v1856_v61 = vsub.f32 %v1848_v55, %v1852_v5 }
 0xd07   :  { %v1860_v62 = vmul.f32 1.442695, %v1857_v7 }
 0xd08   :  { %v1858_v63 = vmul.f32 1.442695, %v1856_v61  ;;  %v1532_v61 = vld [vmem:[#allocation2 + $0xb0] sm:$0xff] }
 0xd09   :  { %7624 = vpow2.f32 %v1860_v62 }
 0xd0a   :  { %7626 = vpow2.f32 %v1858_v63 }
 0xd13   :  { %v7625_v0 = vpop.eup %7624 }
 0xd14   :  { %v7627_v1 = vpop.eup %7626  ;;  %v1865_v2 = vsel %vm54_vm0, %v7625_v0, 0.0 }
 0xd15   :  { %1866 = vadd.xlane.f32.xlu1 %v1865_v2  ;;  %v1862_v3 = vsel %vm54_vm0, %v7627_v1, 0.0 }
 0xd16   :  { %1863 = vadd.xlane.f32.xlu0 %v1862_v3 }
 0xd26   :  { %7436 = vrot.lane.b32.xlu1 %v8028_v43, %s7797_s11 }
 0xd2c   :  { %7431 = vrot.lane.b32.xlu0 %v8022_v40, %s7797_s11 }
 0xd4a   :  { %2231 = vmax.xlane.f32.xlu1 %v2230_v11 }
 0xd4b   :  { %2234 = vmax.xlane.f32.xlu0 %v2233_v14 }
 0xda2   :  { %v1867_v15 = vpop.xlane.xlu1 %1866 }
 0xda3   :  { %v1864_v16 = vpop.xlane.xlu0 %1863 }
 0xda4   :  { %7628 = vrcp.f32 %v1864_v16 }
 0xda5   :  { %7630 = vrcp.f32 %v1867_v15 }
 0xda6   :  { %v7437_v18 = vpop.permute.xlu1 %7436 }
 0xda7   :  { %v7432_v10 = vpop.permute.xlu0 %7431  ;;  %v7439_v12 = vunpack.i.h.bf16 %v7437_v18  ;;  %v7438_v19 = vunpack.i.l.bf16 %v7437_v18 }
 0xda8   :  { %v7434_v20 = vunpack.i.h.bf16 %v7432_v10  ;;  %v7433_v35 = vunpack.i.l.bf16 %v7432_v10 }
 0xda9   :  { %v7085_v32 = vpack.c.bf16 %v7439_v12, %v7438_v19 }
 0xdaa   :  { %v7081_v21 = vpack.c.bf16 %v7434_v20, %v7433_v35 }
 0xdac   :  { %7082 = vmatprep.subr.bf16.mxu1 %v7081_v21 }
 0xdad   :  { %7084 = vmatpush3.bf16.msra.mxu1 %v7081_v21 }
 0xdae   :  { %v7629_v22 = vpop.eup %7628  ;;  %7086 = vmatprep.subr.bf16.mxu1 %v7085_v32 }
 0xdaf   :  { %v7631_v23 = vpop.eup %7630  ;;  %v1870_v24 = vmul.f32 %v7629_v22, %v7627_v1 }
 0xdb0   :  { %v1871_v25 = vmul.f32 %v7631_v23, %v7625_v0 }
 0xdb1   :  { %7088 = vmatpush3.bf16.msra.mxu1 %v7085_v32  ;;  %6638 = vmatprep.mubr.msk.f32.mxu1 %vm54_vm0, %v1870_v24 }
 0xdb2   :  { %6641 = vmatprep.subr.mxu1 %v1531_v39 }
 0xdb4   :  { %6639 = vmatmul.mubr.msk.f32.vlgmr.msra.gmra.mrb[14].mxu1 %vm54_vm0, %v1871_v25 }
 0xdb5   :  { %6642 = vmatpush3.msra.mxu1 %v1531_v39 }
 0xdb6   :  { %6646 = vmatprep.subr.mxu1 %v1530_v41 }
 0xdd7   :  { %v2232_v26 = vpop.xlane.xlu1 %2231 }
 0xdd8   :  { %v2236_v28 = vsub.f32 %v2228_v8, %v2232_v26  ;;  %v2235_v13 = vpop.xlane.xlu0 %2234  ;;  %v1533_v26 = vld [vmem:[#allocation2 + $0xb8] sm:$0xff] }
 0xdd9   :  { %v2237_v30 = vsub.f32 %v2229_v9, %v2235_v13 }
 0xdda   :  { %v2238_v31 = vmul.f32 1.442695, %v2236_v28 }
 0xddb   :  { %v2240_v33 = vmul.f32 1.442695, %v2237_v30 }
 0xddc   :  { %7632 = vpow2.f32 %v2238_v31 }
 0xddd   :  { %7634 = vpow2.f32 %v2240_v33 }
 0xde6   :  { %v7633_v34 = vpop.eup %7632 }
 0xde7   :  { %v7635_v36 = vpop.eup %7634  ;;  %v2242_v37 = vsel %vm54_vm0, %v7633_v34, 0.0 }
 0xde8   :  { %2243 = vadd.xlane.f32.xlu0 %v2242_v37  ;;  %v2245_v38 = vsel %vm54_vm0, %v7635_v36, 0.0 }
 0xde9   :  { %2246 = vadd.xlane.f32.xlu1 %v2245_v38 }
 0xdfa   :  { %7446 = vrot.lane.b32.xlu1 %v8028_v43, %s7799_s13 }
 0xdfe   :  { %7451 = vrot.lane.b32.xlu1 %v8022_v40, %s7803_s21  ;;  %7441 = vrot.lane.b32.xlu0 %v8022_v40, %s7799_s13 }
 0xe02   :  { %2428 = vrot.lane.b32.xlu1 %v8036_v47, %s7803_s21  ;;  %7456 = vrot.lane.b32.xlu0 %v8028_v43, %s7803_s21 }
 0xe06   :  { %2430 = vrot.lane.b32.xlu0 %v8038_v48, %s7803_s21 }
 0xe75   :  { %v2244_v42 = vpop.xlane.xlu0 %2243 }
 0xe76   :  { %7636 = vrcp.f32 %v2244_v42  ;;  %v2247_v49 = vpop.xlane.xlu1 %2246 }
 0xe77   :  { %7638 = vrcp.f32 %v2247_v49 }
 0xe79   :  { %v7442_v46 = vpop.permute.xlu0 %7441 }
 0xe7a   :  { %v7444_v50 = vunpack.i.h.bf16 %v7442_v46  ;;  %v7443_v52 = vunpack.i.l.bf16 %v7442_v46  ;;  %v7447_v56 = vpop.permute.xlu1 %7446 }
 0xe7b   :  { %v7449_v57 = vunpack.i.h.bf16 %v7447_v56  ;;  %v7448_v58 = vunpack.i.l.bf16 %v7447_v56 }
 0xe7c   :  { %v7101_v47 = vpack.c.bf16 %v7444_v50, %v7443_v52  ;;  %v6095_v50 = vld [vmem:[#allocation2 + $0xc0] ss:$0 sm:$0xff] }
 0xe7d   :  { %v7105_v60 = vpack.c.bf16 %v7449_v57, %v7448_v58 }
 0xe7e   :  { %v7452_v7 = vpop.permute.xlu1 %7451 }
 0xe7f   :  { %v7454_v62 = vunpack.i.h.bf16 %v7452_v7  ;;  %v7453_v63 = vunpack.i.l.bf16 %v7452_v7 }
 0xe80   :  { %v7637_v48 = vpop.eup %7636 }
 0xe81   :  { %v2250_v59 = vmul.f32 %v7637_v48, %v7633_v34  ;;  %v7639_v5 = vpop.eup %7638  ;;  %v7109_v0 = vpack.c.bf16 %v7454_v62, %v7453_v63 }
 0xe82   :  { %v2429_v8 = vpop.permute.xlu1 %2428 }
 0xe87   :  { %v6640_v53 = vpop.f32.mrb[14].mxu1 }
 0xe88   :  { %v1956_v55 = vpop.f32.mrb[15].mxu1 }
 0xe89   :  { %6643 = vmatprep.mubr.msk.f32.mxu1 %vm147_vm1, %v1956_v55 }
 0xe8a   :  { %6644 = vmatmul.mubr.msk.f32.vlgmr.msra.gmra.mrb[16].mxu1 %vm147_vm1, %v6640_v53 }
 0xe8b   :  { %6647 = vmatpush3.msra.mxu1 %v1530_v41  ;;  %6648 = vmatprep.mubr.msk.f32.mxu1 %vm147_vm1, %v8102_v45  ;;  %v2251_v45 = vmul.f32 %v7639_v5, %v7635_v36 }
 0xe8c   :  { %7102 = vmatprep.subr.bf16.mxu1 %v7101_v47 }
 0xe92   :  { %6649 = vmatmul.mubr.msk.f32.vlgmr.msra.gmra.mrb[16].mxu1 %vm147_vm1, %v8100_v44  ;;  %v7457_v44 = vpop.permute.xlu0 %7456 }
 0xe93   :  { %7104 = vmatpush3.bf16.msra.mxu1 %v7101_v47  ;;  %6670 = vmatprep.mubr.msk.f32.mxu1 %vm54_vm0, %v2250_v59  ;;  %v7459_v1 = vunpack.i.h.bf16 %v7457_v44  ;;  %v7458_v2 = vunpack.i.l.bf16 %v7457_v44  ;;  %v2778_v44 = vld [vmem:[#allocation2 + $0x100] sm:$0xff] }
 0xe94   :  { %7106 = vmatprep.subr.bf16.mxu1 %v7105_v60 }
 0xe95   :  { %v7115_v6 = vpack.c.bf16 %v7459_v1, %v7458_v2  ;;  %v2779_v2 = vld [vmem:[#allocation2 + $0x108] sm:$0xff] }
 0xe96   :  { %v2431_v9 = vpop.permute.xlu0 %2430 }
 0xe97   :  { %7108 = vmatpush3.bf16.msra.mxu1 %v7105_v60 }
 0xe98   :  { %6673 = vmatprep.subr.mxu1 %v1532_v61 }
 0xe9a   :  { %6671 = vmatmul.mubr.msk.f32.vlgmr.msra.gmra.mrb[18].mxu1 %vm54_vm0, %v2251_v45 }
 0xe9b   :  { %6674 = vmatpush3.msra.mxu1 %v1532_v61 }
 0xe9c   :  { %7111 = vmatprep.subr.msk.bf16.mxu1 %vm7892_vm2, %v7109_v0 }
 0xf6d   :  { %v6672_v3 = vpop.f32.mrb[18].mxu1 }
 0xf6e   :  { %v2336_v4 = vpop.f32.mrb[19].mxu1 }
 0xf6f   :  { %6675 = vmatprep.mubr.msk.f32.mxu1 %vm147_vm1, %v2336_v4 }
 0xf70   :  { %6676 = vmatmul.mubr.msk.f32.vlgmr.msra.gmra.mrb[16].mxu1 %vm147_vm1, %v6672_v3  ;;  %v2780_v3 = vld [vmem:[#allocation2 + $0x110] sm:$0xff] }
 0xf71   :  { %7114 = vmatpush3.bf16.xpose.msk.msra.mxu1 %vm7892_vm2, %v7109_v0  ;;  %6686 = vmatprep.mubr.msk.f32.mxu1 %vm147_vm1, %v2429_v8  ;;  %v7133_v4 = vpack.c.bf16 %v2780_v3, %v2779_v2  ;;  %v2870_v8 = vld [vmem:[#allocation2 + $0x128] sm:$0xff] }
 0xf72   :  { %7117 = vmatprep.subr.msk.bf16.mxu1 %vm7892_vm2, %v7115_v6 }
 0xf79   :  { %7120 = vmatpush3.bf16.xpose.msk.msra.mxu1 %vm7892_vm2, %v7115_v6  ;;  %v2869_v6 = vld [vmem:[#allocation2 + $0x120] sm:$0xff] }
 0xf7a   :  { %6700 = vmatprep.subr.mxu1 %v1533_v26 }
 0xf80   :  { %6687 = vmatmul.mubr.msk.f32.vlgmr.msra.gmra.mrb[20].mxu1 %vm147_vm1, %v2431_v9  ;;  %v7137_v9 = vpack.c.bf16 %v2870_v8, %v2869_v6 }
 0xf81   :  { %6701 = vmatpush3.msra.mxu1 %v1533_v26 }
0x1053   :  { %v6688_v11 = vpop.f32.mrb[20].mxu1 }
0x1054   :  { %v2528_v14 = vmul.f32 0.35355338, %v6688_v11  ;;  %v2518_v15 = vpop.f32.mrb[21].mxu1 }
0x1055   :  { %v2527_v16 = vmul.f32 0.35355338, %v2518_v15 }
0x1056   :  { %v2530_v18 = vadd.f32 %v2528_v14, %v8058_v54 }
0x1057   :  { %v2529_v10 = vadd.f32 %v2527_v16, %v8053_v51 }
0x1058   :  { %v2534_v12 = vsel %vm54_vm0, %v2530_v18, -inf }
0x1059   :  { %2535 = vmax.xlane.f32.xlu0 %v2534_v12  ;;  %v2531_v19 = vsel %vm54_vm0, %v2529_v10, -inf }
0x105a   :  { %2532 = vmax.xlane.f32.xlu1 %v2531_v19  ;;  %v6096_v19 = vld [vmem:[#allocation2 + $0xd8] ss:$0 sm:$0xff] }
0x10e6   :  { %v2536_v20 = vpop.xlane.xlu0 %2535 }
0x10e7   :  { %v2538_v35 = vsub.f32 %v2530_v18, %v2536_v20  ;;  %v2533_v21 = vpop.xlane.xlu1 %2532 }
0x10e8   :  { %v2537_v32 = vsub.f32 %v2529_v10, %v2533_v21 }
0x10e9   :  { %v2541_v22 = vmul.f32 1.442695, %v2538_v35 }
0x10ea   :  { %v2539_v23 = vmul.f32 1.442695, %v2537_v32  ;;  %v6097_v32 = vld [vmem:[#allocation2 + $0xe0] ss:$0 sm:$0xff] }
0x10eb   :  { %7640 = vpow2.f32 %v2541_v22 }
0x10ec   :  { %7642 = vpow2.f32 %v2539_v23 }
0x10f5   :  { %v7641_v24 = vpop.eup %7640 }
0x10f6   :  { %v7643_v25 = vpop.eup %7642  ;;  %v2546_v54 = vsel %vm54_vm0, %v7641_v24, 0.0 }
0x10f7   :  { %2547 = vadd.xlane.f32.xlu1 %v2546_v54  ;;  %v2543_v51 = vsel %vm54_vm0, %v7643_v25, 0.0 }
0x10f8   :  { %2544 = vadd.xlane.f32.xlu0 %v2543_v51 }
0x1108   :  { %7466 = vrot.lane.b32.xlu1 %v8028_v43, %s7801_s19 }
0x110e   :  { %7461 = vrot.lane.b32.xlu0 %v8022_v40, %s7801_s19 }
0x1184   :  { %v2548_v28 = vpop.xlane.xlu1 %2547 }
0x1185   :  { %v2545_v13 = vpop.xlane.xlu0 %2544 }
0x1186   :  { %7644 = vrcp.f32 %v2545_v13  ;;  %v2874_v13 = vld [vmem:[#allocation2 + $0x148] sm:$0xff] }
0x1187   :  { %7646 = vrcp.f32 %v2548_v28  ;;  %v2873_v28 = vld [vmem:[#allocation2 + $0x140] sm:$0xff] }
0x1188   :  { %v7467_v30 = vpop.permute.xlu1 %7466 }
0x1189   :  { %v7462_v31 = vpop.permute.xlu0 %7461  ;;  %v7469_v33 = vunpack.i.h.bf16 %v7467_v30  ;;  %v7468_v34 = vunpack.i.l.bf16 %v7467_v30  ;;  %v7145_v30 = vpack.c.bf16 %v2874_v13, %v2873_v28 }
0x118a   :  { %v7464_v36 = vunpack.i.h.bf16 %v7462_v31  ;;  %v7463_v37 = vunpack.i.l.bf16 %v7462_v31  ;;  %v2875_v31 = vld [vmem:[#allocation2 + $0x150] sm:$0xff] }
0x118b   :  { %v7125_v39 = vpack.c.bf16 %v7469_v33, %v7468_v34  ;;  %v2876_v33 = vld [vmem:[#allocation2 + $0x158] sm:$0xff] }
0x118c   :  { %v7121_v38 = vpack.c.bf16 %v7464_v36, %v7463_v37  ;;  %v7149_v34 = vpack.c.bf16 %v2876_v33, %v2875_v31  ;;  %v6098_v36 = vld [vmem:[#allocation2 + $0x118] ss:$0 sm:$0xff] }
0x118e   :  { %7122 = vmatprep.subr.bf16.mxu0 %v7121_v38 }
0x118f   :  { %7124 = vmatpush3.bf16.msra.mxu0 %v7121_v38 }
0x1190   :  { %v7645_v43 = vpop.eup %7644  ;;  %7126 = vmatprep.subr.bf16.mxu0 %v7125_v39 }
0x1191   :  { %v7647_v40 = vpop.eup %7646  ;;  %v2551_v41 = vmul.f32 %v7645_v43, %v7643_v25  ;;  %v2872_v25 = vld [vmem:[#allocation2 + $0x138] sm:$0xff] }
0x1192   :  { %v2552_v42 = vmul.f32 %v7647_v40, %v7641_v24  ;;  %v2871_v24 = vld [vmem:[#allocation2 + $0x130] sm:$0xff] }
0x1193   :  { %7128 = vmatpush3.bf16.msra.mxu0 %v7125_v39  ;;  %6697 = vmatprep.mubr.msk.f32.mxu0 %vm54_vm0, %v2551_v41  ;;  %v7141_v26 = vpack.c.bf16 %v2872_v25, %v2871_v24 }
0x1196   :  { %6698 = vmatmul.mubr.msk.f32.vlgmr.msra.gmra.mrb[20].mxu0 %vm54_vm0, %v2552_v42  ;;  %v6101_v42 = vld [vmem:[#allocation2 + $0x160] ss:$0 sm:$0xff] }
0x1269   :  { %v6699_v46 = vpop.f32.mrb[20].mxu0 }
0x126a   :  { %v2637_v49 = vpop.f32.mrb[21].mxu0 }
0x126b   :  { %6702 = vmatprep.mubr.msk.f32.mxu1 %vm147_vm1, %v2637_v49 }
0x126c   :  { %6703 = vmatmul.mubr.msk.f32.vlgmr.msra.gmra.mrb[16].mxu1 %vm147_vm1, %v6699_v46 }
0x133f   :  { %v6704_v52 = vpop.f32.mrb[16].mxu1 }
0x1340   :  { %v2734_v53 = vadd.f32 %v6704_v52, %v6095_v50  ;;  %v2718_v55 = vpop.f32.mrb[17].mxu1 }
0x1341   :  { %v2733_v47 = vadd.f32 %v6095_v50, %v2718_v55 }
0x1342   :  { %v2736_v56 = vadd.f32 %v2734_v53, %v8018_v29 }
0x1343   :  { %v2735_v48 = vadd.f32 %v2733_v47, %v8014_v27  ;;  %v2777_v27 = vld [vmem:[#allocation2 + $0xf8] sm:$0xff] }
0x1344   :  { %v2742_v57 = vsel %vm54_vm0, %v2736_v56, 0.0  ;;  %v7129_v1 = vpack.c.bf16 %v2778_v44, %v2777_v27  ;;  %v3008_v27 = vld [vmem:[#allocation2 + $0x178] sm:$0xff]  ;;  %v3009_v44 = vld [vmem:[#allocation2 + $0x180] sm:$0xff] }
0x1345   :  { %2743 = vadd.xlane.f32.xlu0 %v2742_v57  ;;  %v2739_v58 = vsel %vm54_vm0, %v2735_v48, 0.0 }
0x1346   :  { %2740 = vadd.xlane.f32.xlu1 %v2739_v58  ;;  %7130 = vmatprep.subr.bf16.mxu0 %v7129_v1 }
0x1347   :  { %7132 = vmatpush3.bf16.msra.mxu0 %v7129_v1  ;;  %v7157_v1 = vpack.c.bf16 %v3009_v44, %v3008_v27 }
0x1348   :  { %7134 = vmatprep.subr.bf16.mxu0 %v7133_v4 }
0x134b   :  { %7136 = vmatpush3.bf16.msra.mxu0 %v7133_v4 }
0x134c   :  { %7138 = vmatprep.subr.bf16.mxu0 %v7137_v9 }
0x13d2   :  { %v2744_v59 = vpop.xlane.xlu0 %2743 }
0x13d3   :  { %v2746_v60 = vmul.f32 0.03125, %v2744_v59  ;;  %v2741_v7 = vpop.xlane.xlu1 %2740 }
0x13d4   :  { %v2745_v5 = vmul.f32 0.03125, %v2741_v7 }
0x13d5   :  { %v2748_v61 = vsub.f32 %v2736_v56, %v2746_v60 }
0x13d6   :  { %v2747_v62 = vsub.f32 %v2735_v48, %v2745_v5 }
0x13d7   :  { %v2750_v63 = vmul.f32 %v2748_v61, %v2748_v61 }
0x13d8   :  { %v2749_v45 = vmul.f32 %v2747_v62, %v2747_v62 }
0x13d9   :  { %v2754_v0 = vsel %vm54_vm0, %v2750_v63, 0.0 }
0x13da   :  { %2755 = vadd.xlane.f32.xlu1 %v2754_v0  ;;  %v2751_v29 = vsel %vm54_vm0, %v2749_v45, 0.0  ;;  %v3006_v45 = vld [vmem:[#allocation2 + $0x168] sm:$0xff]  ;;  %v3007_v0 = vld [vmem:[#allocation2 + $0x170] sm:$0xff] }
0x13db   :  { %2752 = vadd.xlane.f32.xlu0 %v2751_v29  ;;  %v7153_v29 = vpack.c.bf16 %v3007_v0, %v3006_v45 }
0x13dd   :  { %7154 = vmatprep.subr.bf16.mxu1 %v7153_v29 }
0x13de   :  { %7156 = vmatpush3.bf16.msra.mxu1 %v7153_v29 }
0x13df   :  { %7158 = vmatprep.subr.bf16.mxu1 %v7157_v1 }
0x13e2   :  { %7160 = vmatpush3.bf16.msra.mxu1 %v7157_v1 }
0x1467   :  { %v2756_v11 = vpop.xlane.xlu1 %2755 }
0x1468   :  { %v2758_v14 = vmul.f32 0.03125, %v2756_v11  ;;  %v2753_v15 = vpop.xlane.xlu0 %2752 }
0x1469   :  { %v2757_v16 = vmul.f32 0.03125, %v2753_v15 }
0x146a   :  { %v2760_v18 = vadd.f32 1e-05, %v2758_v14  ;;  %v6104_v14 = vld [vmem:[#allocation2 + $0xe8] ss:$0 sm:$0xff] }
0x146b   :  { %v2759_v10 = vadd.f32 1e-05, %v2757_v16 }
0x146c   :  { %7648 = vrsqrt.f32 %v2760_v18 }
0x146d   :  { %7650 = vrsqrt.f32 %v2759_v10  ;;  %v6105_v10 = vld [vmem:[#allocation2 + $0xf0] ss:$0 sm:$0xff] }
0x1476   :  { %v7649_v12 = vpop.eup %7648 }
0x1477   :  { %v7651_v20 = vpop.eup %7650  ;;  %v2764_v35 = vmul.f32 %v7649_v12, %v2748_v61 }
0x1478   :  { %v2763_v21 = vmul.f32 %v7651_v20, %v2747_v62 }
0x1479   :  { %v2770_v22 = vmul.f32 %v6096_v19, %v2764_v35 }
0x147a   :  { %v2769_v23 = vmul.f32 %v6096_v19, %v2763_v21  ;;  %v6106_v21 = vld [vmem:[#allocation2 + $0x188] ss:$0 sm:$0xff] }
0x147b   :  { %v2776_v51 = vadd.f32 %v6097_v32, %v2770_v22 }
0x147c   :  { %v2775_v54 = vadd.f32 %v6097_v32, %v2769_v23 }
0x147e   :  { %6713 = vmatprep.mubr.msk.f32.mxu0 %vm54_vm0, %v2775_v54 }
0x147f   :  { %6714 = vmatmul.mubr.msk.f32.vlgmr.msra.gmra.mrb[22].mxu0 %vm54_vm0, %v2776_v51 }
0x1480   :  { %7140 = vmatpush3.bf16.msra.mxu0 %v7137_v9 }
0x1481   :  { %7142 = vmatprep.subr.bf16.mxu0 %v7141_v26 }
0x1484   :  { %7144 = vmatpush3.bf16.msra.mxu0 %v7141_v26 }
0x1485   :  { %7146 = vmatprep.subr.bf16.mxu0 %v7145_v30 }
0x1488   :  { %7148 = vmatpush3.bf16.msra.mxu0 %v7145_v30 }
0x1489   :  { %7150 = vmatprep.subr.bf16.mxu0 %v7149_v34 }
0x148c   :  { %7152 = vmatpush3.bf16.msra.mxu0 %v7149_v34 }
0x1552   :  { %v6715_v37 = vpop.f32.mrb[22].mxu0 }
0x1553   :  { %v2864_v38 = vadd.f32 %v6715_v37, %v6098_v36  ;;  %v2858_v39 = vpop.f32.mrb[23].mxu0 }
0x1554   :  { %v2859_v43 = vadd.f32 %v6098_v36, %v2858_v39 }
0x1555   :  { %v2868_v41 = vmax.f32 %v2864_v38, 0.0 }
0x1556   :  { %v2867_v40 = vmax.f32 %v2859_v43, 0.0 }
0x1558   :  { %6732 = vmatprep.mubr.msk.f32.mxu0 %vm2882_vm4, %v2867_v40 }
0x1559   :  { %6733 = vmatmul.mubr.msk.f32.vlgmr.msra.gmra.mrb[24].mxu0 %vm2882_vm4, %v2868_v41 }
0x162c   :  { %v6734_v46 = vpop.f32.mrb[24].mxu0 }
0x162d   :  { %v2961_v49 = vadd.f32 %v6734_v46, %v6101_v42  ;;  %v2955_v50 = vpop.f32.mrb[25].mxu0 }
0x162e   :  { %v2956_v52 = vadd.f32 %v6101_v42, %v2955_v50 }
0x162f   :  { %v2965_v53 = vadd.f32 %v2961_v49, %v2776_v51 }
0x1630   :  { %v2964_v55 = vadd.f32 %v2956_v52, %v2775_v54  ;;  %v8235_v52 = vld [vmem:[%s8515_s2 + $0x8] sm:$0xff] }
0x1631   :  { %v2971_v47 = vsel %vm54_vm0, %v2965_v53, 0.0 }
0x1632   :  { %2972 = vadd.xlane.f32.xlu1 %v2971_v47  ;;  %v2968_v56 = vsel %vm54_vm0, %v2964_v55, 0.0 }
0x1633   :  { %2969 = vadd.xlane.f32.xlu0 %v2968_v56 }
0x16bf   :  { %v2973_v48 = vpop.xlane.xlu1 %2972 }
0x16c0   :  { %v2975_v57 = vmul.f32 0.03125, %v2973_v48  ;;  %v2970_v58 = vpop.xlane.xlu0 %2969 }
0x16c1   :  { %v2974_v59 = vmul.f32 0.03125, %v2970_v58 }
0x16c2   :  { %v2977_v60 = vsub.f32 %v2965_v53, %v2975_v57 }
0x16c3   :  { %v2976_v7 = vsub.f32 %v2964_v55, %v2974_v59  ;;  %v8241_v55 = vld [vmem:[%s8515_s2] sm:$0xff] }
0x16c4   :  { %v2979_v5 = vmul.f32 %v2977_v60, %v2977_v60 }
0x16c5   :  { %v2978_v61 = vmul.f32 %v2976_v7, %v2976_v7 }
0x16c6   :  { %v2983_v62 = vsel %vm54_vm0, %v2979_v5, 0.0 }
0x16c7   :  { %2984 = vadd.xlane.f32.xlu1 %v2983_v62  ;;  %v2980_v63 = vsel %vm54_vm0, %v2978_v61, 0.0 }
0x16c8   :  { %2981 = vadd.xlane.f32.xlu0 %v2980_v63 }
0x1754   :  { %v2985_v2 = vpop.xlane.xlu1 %2984 }
0x1755   :  { %v2987_v3 = vmul.f32 0.03125, %v2985_v2  ;;  %v2982_v4 = vpop.xlane.xlu0 %2981 }
0x1756   :  { %v2986_v6 = vmul.f32 0.03125, %v2982_v4 }
0x1757   :  { %v2989_v8 = vadd.f32 1e-05, %v2987_v3 }
0x1758   :  { %v2988_v9 = vadd.f32 1e-05, %v2986_v6 }
0x1759   :  { %7652 = vrsqrt.f32 %v2989_v8 }
0x175a   :  { %7654 = vrsqrt.f32 %v2988_v9 }
0x1763   :  { %v7653_v11 = vpop.eup %7652 }
0x1764   :  { %v7655_v15 = vpop.eup %7654  ;;  %v2993_v16 = vmul.f32 %v7653_v11, %v2977_v60 }
0x1765   :  { %v2992_v18 = vmul.f32 %v7655_v15, %v2976_v7 }
0x1766   :  { %v2999_v12 = vmul.f32 %v6104_v14, %v2993_v16 }
0x1767   :  { %v2998_v19 = vmul.f32 %v6104_v14, %v2992_v18 }
0x1768   :  { %v8184_v35 = vadd.f32 %v6105_v10, %v2999_v12 }
0x1769   :  { %v8182_v20 = vadd.f32 %v6105_v10, %v2998_v19 }
0x176b   :  { %6743 = vmatprep.mubr.msk.f32.mxu1 %vm54_vm0, %v8182_v20 }
0x176c   :  { %6744 = vmatmul.mubr.msk.f32.vlgmr.msra.gmra.mrb[22].mxu1 %vm54_vm0, %v8184_v35 }
0x183f   :  { %v6745_v32 = vpop.f32.mrb[22].mxu1 }
0x1840   :  { %v8190_v22 = vadd.f32 %v6745_v32, %v6106_v21  ;;  %v3087_v23 = vpop.f32.mrb[23].mxu1 }
0x1841   :  { %v8192_v24 = vadd.f32 %v6106_v21, %v3087_v23 }
0x1843   :  { %6750 = vmatprep.mubr.msk.f32.mxu1 %vm147_vm1, %v8192_v24  ;;  %v8198_v25 = vpack.i.bf16 %v8190_v22, %v8192_v24 }
0x1845   :  { %7476 = vrot.lane.b32.xlu1 %v8198_v25, %s7797_s11  ;;  %7471 = vrot.lane.b32.xlu0 %v8198_v25, %s7796_s0 }
0x1849   :  { %3303 = vrot.lane.b32.xlu1 %v8192_v24, %s7795_s10  ;;  %3305 = vrot.lane.b32.xlu0 %v8190_v22, %s7795_s10 }
0x184d   :  { %7481 = vrot.lane.b32.xlu1 %v8198_v25, %s7799_s13  ;;  %3669 = vrot.lane.b32.xlu0 %v8192_v24, %s7798_s12 }
0x1851   :  { %3671 = vrot.lane.b32.xlu1 %v8190_v22, %s7798_s12 }
0x18b7   :  { %v7477_v54 = vpop.permute.xlu1 %7476  ;;  %v7472_v51 = vpop.permute.xlu0 %7471 }
0x18b8   :  { %v7479_v26 = vunpack.i.h.bf16 %v7477_v54  ;;  %v7478_v28 = vunpack.i.l.bf16 %v7477_v54  ;;  %v7474_v13 = vunpack.i.h.bf16 %v7472_v51  ;;  %v7473_v30 = vunpack.i.l.bf16 %v7472_v51 }
0x18ba   :  { %v7161_v31 = vpack.c.bf16 %v7474_v13, %v7473_v30  ;;  %v7171_v34 = vpack.c.bf16 %v7479_v26, %v7478_v28 }
0x18bb   :  { %v3304_v33 = vpop.permute.xlu1 %3303  ;;  %v3306_v43 = vpop.permute.xlu0 %3305 }
0x18bc   :  { %7163 = vmatprep.subr.msk.bf16.mxu1 %vm7892_vm2, %v7161_v31 }
0x18bd   :  { %7166 = vmatpush3.bf16.xpose.msk.msra.mxu1 %vm7892_vm2, %v7161_v31 }
0x18be   :  { %7173 = vmatprep.subr.msk.bf16.mxu1 %vm7892_vm2, %v7171_v34 }
0x18bf   :  { %v7482_v36 = vpop.permute.xlu1 %7481  ;;  %v3670_v40 = vpop.permute.xlu0 %3669 }
0x18c0   :  { %v7484_v37 = vunpack.i.h.bf16 %v7482_v36  ;;  %v7483_v38 = vunpack.i.l.bf16 %v7482_v36 }
0x18c2   :  { %v7181_v39 = vpack.c.bf16 %v7484_v37, %v7483_v38 }
0x18c3   :  { %v3672_v41 = vpop.permute.xlu1 %3671 }
0x18c4   :  { %6751 = vmatmul.mubr.msk.f32.vlgmr.msra.gmra.mrb[24].mxu1 %vm147_vm1, %v8190_v22 }
0x18c5   :  { %7176 = vmatpush3.bf16.xpose.msk.msra.mxu1 %vm7892_vm2, %v7171_v34  ;;  %6764 = vmatprep.mubr.msk.f32.mxu1 %vm147_vm1, %v3304_v33 }
0x18c6   :  { %7183 = vmatprep.subr.msk.bf16.mxu1 %vm7892_vm2, %v7181_v39 }
0x18cc   :  { %6765 = vmatmul.mubr.msk.f32.vlgmr.msra.gmra.mrb[26].mxu1 %vm147_vm1, %v3306_v43 }
0x18cd   :  { %7186 = vmatpush3.bf16.xpose.msk.msra.mxu1 %vm7892_vm2, %v7181_v39  ;;  %6788 = vmatprep.mubr.msk.f32.mxu1 %vm147_vm1, %v3670_v40 }
0x18d4   :  { %6789 = vmatmul.mubr.msk.f32.vlgmr.msra.gmra.mrb[28].mxu1 %vm147_vm1, %v3672_v41 }
0x1997   :  { %v6752_v42 = vpop.f32.mrb[24].mxu1 }
0x1998   :  { %v3191_v46 = vmul.f32 0.35355338, %v6752_v42  ;;  %v3181_v49 = vpop.f32.mrb[25].mxu1 }
0x1999   :  { %v3190_v50 = vmul.f32 0.35355338, %v3181_v49 }
0x199a   :  { %v3193_v53 = vadd.f32 %v8235_v52, %v3191_v46 }
0x199b   :  { %v3192_v47 = vadd.f32 %v8241_v55, %v3190_v50 }
0x199c   :  { %v3197_v56 = vsel %vm235_vm3, %v3193_v53, -inf }
0x199d   :  { %3198 = vmax.xlane.f32.xlu1 %v3197_v56  ;;  %v3194_v48 = vsel %vm235_vm3, %v3192_v47, -inf }
0x199e   :  { %3195 = vmax.xlane.f32.xlu0 %v3194_v48 }
0x199f   :  { %v6766_v57 = vpop.f32.mrb[26].mxu1 }
0x19a0   :  { %v3385_v58 = vpop.f32.mrb[27].mxu1  ;;  %v3395_v59 = vmul.f32 0.35355338, %v6766_v57 }
0x19a1   :  { %v3394_v60 = vmul.f32 0.35355338, %v3385_v58 }
0x19a2   :  { %v3397_v5 = vadd.f32 %v8235_v52, %v3395_v59 }
0x19a3   :  { %v3396_v7 = vadd.f32 %v8241_v55, %v3394_v60 }
0x19a4   :  { %v3401_v45 = vsel %vm235_vm3, %v3397_v5, -inf }
0x19a5   :  { %v3398_v61 = vsel %vm235_vm3, %v3396_v7, -inf }
0x19a6   :  { %3399 = vmax.xlane.f32.xlu0 %v3398_v61 }
0x19a7   :  { %v6790_v62 = vpop.f32.mrb[28].mxu1 }
0x19a8   :  { %v3751_v63 = vpop.f32.mrb[29].mxu1  ;;  %v3761_v32 = vmul.f32 0.35355338, %v6790_v62 }
0x19a9   :  { %v3760_v23 = vmul.f32 0.35355338, %v3751_v63 }
0x19aa   :  { %3402 = vmax.xlane.f32.xlu0 %v3401_v45  ;;  %v3763_v54 = vadd.f32 %v8235_v52, %v3761_v32 }
0x19ab   :  { %v3762_v51 = vadd.f32 %v8241_v55, %v3760_v23 }
0x19ac   :  { %v3767_v28 = vsel %vm235_vm3, %v3763_v54, -inf }
0x19ad   :  { %v3764_v26 = vsel %vm235_vm3, %v3762_v51, -inf }
0x1a2a   :  { %v3199_v0 = vpop.xlane.xlu1 %3198 }
0x1a2b   :  { %v3201_v29 = vsub.f32 %v3193_v53, %v3199_v0  ;;  %v3196_v27 = vpop.xlane.xlu0 %3195 }
0x1a2c   :  { %v3200_v44 = vsub.f32 %v3192_v47, %v3196_v27 }
0x1a2d   :  { %v3204_v1 = vmul.f32 1.442695, %v3201_v29 }
0x1a2e   :  { %v3202_v2 = vmul.f32 1.442695, %v3200_v44 }
0x1a2f   :  { %7656 = vpow2.f32 %v3204_v1  ;;  %v3097_v1 = vld [vmem:[#allocation2 + $0x198] sm:$0xff] }
0x1a30   :  { %7658 = vpow2.f32 %v3202_v2  ;;  %v3096_v2 = vld [vmem:[#allocation2 + $0x190] sm:$0xff] }
0x1a33   :  { %v3400_v3 = vpop.xlane.xlu0 %3399 }
0x1a34   :  { %v3404_v4 = vsub.f32 %v3396_v7, %v3400_v3 }
0x1a36   :  { %v3406_v6 = vmul.f32 1.442695, %v3404_v4 }
0x1a37   :  { %v3403_v8 = vpop.xlane.xlu0 %3402 }
0x1a38   :  { %7660 = vpow2.f32 %v3406_v6  ;;  %v3405_v9 = vsub.f32 %v3397_v5, %v3403_v8 }
0x1a39   :  { %v7657_v11 = vpop.eup %7656 }
0x1a3a   :  { %v7659_v14 = vpop.eup %7658  ;;  %v3408_v15 = vmul.f32 1.442695, %v3405_v9  ;;  %v3209_v16 = vsel %vm235_vm3, %v7657_v11, 0.0 }
0x1a3b   :  { %3210 = vadd.xlane.f32.xlu0 %v3209_v16  ;;  %v3206_v18 = vsel %vm235_vm3, %v7659_v14, 0.0 }
0x1a3c   :  { %7662 = vpow2.f32 %v3408_v15  ;;  %3207 = vadd.xlane.f32.xlu1 %v3206_v18 }
0x1a42   :  { %v7661_v10 = vpop.eup %7660 }
0x1a43   :  { %v3410_v12 = vsel %vm235_vm3, %v7661_v10, 0.0 }
0x1a44   :  { %3411 = vadd.xlane.f32.xlu1 %v3410_v12 }
0x1a46   :  { %v7663_v19 = vpop.eup %7662 }
0x1a47   :  { %v3413_v21 = vsel %vm235_vm3, %v7663_v19, 0.0 }
0x1a48   :  { %3414 = vadd.xlane.f32.xlu0 %v3413_v21 }
0x1a55   :  { %7486 = vrot.lane.b32.xlu1 %v8198_v25, %s7802_s20 }
0x1a59   :  { %7496 = vrot.lane.b32.xlu1 %v8198_v25, %s7801_s19 }
0x1a5d   :  { %3956 = vrot.lane.b32.xlu1 %v8192_v24, %s7803_s21 }
0x1a5e   :  { %7491 = vrot.lane.b32.xlu0 %v8198_v25, %s7800_s18 }
0x1a62   :  { %3958 = vrot.lane.b32.xlu0 %v8190_v22, %s7803_s21 }
0x1a81   :  { %3765 = vmax.xlane.f32.xlu1 %v3764_v26  ;;  %3768 = vmax.xlane.f32.xlu0 %v3767_v28 }
0x1ac8   :  { %v3211_v24 = vpop.xlane.xlu0 %3210 }
0x1ac9   :  { %v3208_v13 = vpop.xlane.xlu1 %3207 }
0x1aca   :  { %7664 = vrcp.f32 %v3208_v13 }
0x1acb   :  { %7666 = vrcp.f32 %v3211_v24 }
0x1ad1   :  { %v3412_v30 = vpop.xlane.xlu1 %3411 }
0x1ad2   :  { %7668 = vrcp.f32 %v3412_v30  ;;  %v3098_v30 = vld [vmem:[#allocation2 + $0x1a0] sm:$0xff] }
0x1ad4   :  { %v7665_v31 = vpop.eup %7664 }
0x1ad5   :  { %v7487_v22 = vpop.permute.xlu1 %7486  ;;  %v3415_v33 = vpop.xlane.xlu0 %3414  ;;  %v3214_v34 = vmul.f32 %v7665_v31, %v7659_v14 }
0x1ad6   :  { %v7489_v36 = vunpack.i.h.bf16 %v7487_v22  ;;  %v7488_v37 = vunpack.i.l.bf16 %v7487_v22  ;;  %7670 = vrcp.f32 %v3415_v33  ;;  %v7667_v39 = vpop.eup %7666 }
0x1ad7   :  { %6757 = vmatprep.mubr.msk.f32.mxu0 %vm235_vm3, %v3214_v34  ;;  %v3215_v53 = vmul.f32 %v7667_v39, %v7657_v11 }
0x1ad8   :  { %v7167_v38 = vpack.c.bf16 %v7489_v36, %v7488_v37 }
0x1ad9   :  { %v7497_v43 = vpop.permute.xlu1 %7496  ;;  %v7492_v40 = vpop.permute.xlu0 %7491 }
0x1ada   :  { %v7499_v41 = vunpack.i.h.bf16 %v7497_v43  ;;  %v7498_v42 = vunpack.i.l.bf16 %v7497_v43  ;;  %v7494_v46 = vunpack.i.h.bf16 %v7492_v40  ;;  %v7493_v49 = vunpack.i.l.bf16 %v7492_v40  ;;  %7168 = vmatprep.subr.bf16.mxu0 %v7167_v38 }
0x1adb   :  { %7170 = vmatpush3.bf16.msra.mxu0 %v7167_v38 }
0x1adc   :  { %v7669_v50 = vpop.eup %7668  ;;  %v7191_v47 = vpack.c.bf16 %v7499_v41, %v7498_v42  ;;  %v7177_v56 = vpack.c.bf16 %v7494_v46, %v7493_v49 }
0x1add   :  { %v3957_v48 = vpop.permute.xlu1 %3956  ;;  %v3418_v57 = vmul.f32 %v7669_v50, %v7661_v10  ;;  %v3959_v60 = vpop.permute.xlu0 %3958 }
0x1ade   :  { %6758 = vmatmul.mubr.msk.f32.vlgmr.msra.gmra.mrb[26].mxu0 %vm235_vm3, %v3215_v53  ;;  %7178 = vmatprep.subr.bf16.mxu0 %v7177_v56 }
0x1adf   :  { %7193 = vmatprep.subr.msk.bf16.mxu1 %vm7892_vm2, %v7191_v47  ;;  %6807 = vmatprep.mubr.msk.f32.mxu1 %vm147_vm1, %v3957_v48 }
0x1ae0   :  { %v7671_v58 = vpop.eup %7670  ;;  %7180 = vmatpush3.bf16.msra.mxu0 %v7177_v56  ;;  %6771 = vmatprep.mubr.msk.f32.mxu0 %vm235_vm3, %v3418_v57 }
0x1ae1   :  { %v3419_v59 = vmul.f32 %v7671_v58, %v7663_v19  ;;  %7196 = vmatpush3.bf16.xpose.msk.msra.mxu1 %vm7892_vm2, %v7191_v47  ;;  %6774 = vmatprep.subr.mxu0 %v3097_v1  ;;  %v3099_v47 = vld [vmem:[#allocation2 + $0x1a8] sm:$0xff] }
0x1ae3   :  { %6772 = vmatmul.mubr.msk.f32.vlgmr.msra.gmra.mrb[28].mxu0 %vm235_vm3, %v3419_v59 }
0x1ae4   :  { %6775 = vmatpush3.msra.mxu0 %v3097_v1  ;;  %v4382_v1 = vld [vmem:[#allocation2 + $0x1e8] sm:$0xff] }
0x1ae5   :  { %6779 = vmatprep.subr.mxu0 %v3096_v2 }
0x1ae8   :  { %6808 = vmatmul.mubr.msk.f32.vlgmr.msra.gmra.mrb[30].mxu1 %vm147_vm1, %v3959_v60  ;;  %v7738_v60 = vld [vmem:[%s8514_s1] sm:$0xff] }
0x1b0e   :  { %v3766_v7 = vpop.xlane.xlu1 %3765  ;;  %v3769_v5 = vpop.xlane.xlu0 %3768 }
0x1b0f   :  { %v3770_v61 = vsub.f32 %v3762_v51, %v3766_v7  ;;  %v3771_v62 = vsub.f32 %v3763_v54, %v3769_v5  ;;  %v6141_v7 = vld [vmem:[#allocation2 + $0x1b0] ss:$0 sm:$0xff] }
0x1b11   :  { %v3772_v63 = vmul.f32 1.442695, %v3770_v61  ;;  %v3774_v45 = vmul.f32 1.442695, %v3771_v62 }
0x1b13   :  { %7672 = vpow2.f32 %v3772_v63 }
0x1b14   :  { %7674 = vpow2.f32 %v3774_v45 }
0x1b1d   :  { %v7673_v0 = vpop.eup %7672 }
0x1b1e   :  { %v7675_v29 = vpop.eup %7674  ;;  %v3776_v27 = vsel %vm235_vm3, %v7673_v0, 0.0 }
0x1b1f   :  { %3777 = vadd.xlane.f32.xlu0 %v3776_v27  ;;  %v3779_v44 = vsel %vm235_vm3, %v7675_v29, 0.0 }
0x1b20   :  { %3780 = vadd.xlane.f32.xlu1 %v3779_v44  ;;  %v4381_v44 = vld [vmem:[#allocation2 + $0x1e0] sm:$0xff] }
0x1b35   :  { %7501 = vrot.lane.b32.xlu0 %v8198_v25, %s7804_s22 }
0x1bac   :  { %v3778_v3 = vpop.xlane.xlu0 %3777 }
0x1bad   :  { %v3781_v9 = vpop.xlane.xlu1 %3780  ;;  %7676 = vrcp.f32 %v3778_v3 }
0x1bae   :  { %7678 = vrcp.f32 %v3781_v9 }
0x1bb0   :  { %v7502_v6 = vpop.permute.xlu0 %7501 }
0x1bb1   :  { %v6759_v4 = vpop.f32.mrb[26].mxu0  ;;  %v7504_v11 = vunpack.i.h.bf16 %v7502_v6  ;;  %v7503_v14 = vunpack.i.l.bf16 %v7502_v6 }
0x1bb2   :  { %v3294_v8 = vpop.f32.mrb[27].mxu0 }
0x1bb3   :  { %v7187_v18 = vpack.c.bf16 %v7504_v11, %v7503_v14 }
0x1bb6   :  { %v6773_v15 = vpop.f32.mrb[28].mxu0 }
0x1bb7   :  { %v3498_v16 = vpop.f32.mrb[29].mxu0  ;;  %v7677_v32 = vpop.eup %7676 }
0x1bb8   :  { %6776 = vmatprep.mubr.msk.f32.mxu0 %vm147_vm1, %v3498_v16  ;;  %v7679_v54 = vpop.eup %7678  ;;  %v3784_v26 = vmul.f32 %v7677_v32, %v7673_v0  ;;  %v4383_v16 = vld [vmem:[#allocation2 + $0x1f0] sm:$0xff]  ;;  %v4291_v32 = vld [vmem:[#allocation2 + $0x1b8] sm:$0xff] }
0x1bb9   :  { %6777 = vmatmul.mubr.msk.f32.vlgmr.msra.gmra.mrb[30].mxu0 %vm147_vm1, %v6773_v15  ;;  %v3785_v13 = vmul.f32 %v7679_v54, %v7675_v29 }
0x1bba   :  { %6780 = vmatpush3.msra.mxu0 %v3096_v2  ;;  %6781 = vmatprep.mubr.msk.f32.mxu0 %vm147_vm1, %v3294_v8  ;;  %v7209_v2 = vpack.c.bf16 %v4382_v1, %v4381_v44  ;;  %v8355_v44 = vld [vmem:[%s8516_s3] sm:$0xff] }
0x1bbb   :  { %v6809_v10 = vpop.f32.mrb[30].mxu1  ;;  %7188 = vmatprep.subr.bf16.mxu0 %v7187_v18 }
0x1bbc   :  { %v4038_v12 = vpop.f32.mrb[31].mxu1  ;;  %v4048_v19 = vmul.f32 0.35355338, %v6809_v10 }
0x1bbd   :  { %v4047_v21 = vmul.f32 0.35355338, %v4038_v12  ;;  %v7739_v12 = vld [vmem:[%s8514_s1 + $0x8] sm:$0xff] }
0x1bbe   :  { %v4050_v28 = vadd.f32 %v8235_v52, %v4048_v19  ;;  %v7740_v19 = vld [vmem:[%s8514_s1 + $0x10] sm:$0xff] }
0x1bbf   :  { %v4049_v23 = vadd.f32 %v8241_v55, %v4047_v21  ;;  %v7741_v21 = vld [vmem:[%s8514_s1 + $0x18] sm:$0xff] }
0x1bc0   :  { %v4054_v24 = vsel %vm235_vm3, %v4050_v28, -inf }
0x1bc1   :  { %v4051_v51 = vsel %vm235_vm3, %v4049_v23, -inf  ;;  %6782 = vmatmul.mubr.msk.f32.vlgmr.msra.gmra.mrb[30].mxu0 %vm147_vm1, %v6759_v4 }
0x1bc2   :  { %4052 = vmax.xlane.f32.xlu1 %v4051_v51  ;;  %7190 = vmatpush3.bf16.msra.mxu0 %v7187_v18  ;;  %v4384_v18 = vld [vmem:[#allocation2 + $0x1f8] sm:$0xff]  ;;  %v4293_v51 = vld [vmem:[#allocation2 + $0x1c8] sm:$0xff] }
0x1bc3   :  { %6795 = vmatprep.mubr.msk.f32.mxu0 %vm235_vm3, %v3784_v26  ;;  %6798 = vmatprep.subr.mxu0 %v3098_v30  ;;  %v7213_v10 = vpack.c.bf16 %v4384_v18, %v4383_v16  ;;  %v4294_v26 = vld [vmem:[#allocation2 + $0x1d0] sm:$0xff] }
0x1bc5   :  { %6796 = vmatmul.mubr.msk.f32.vlgmr.msra.gmra.mrb[32].mxu0 %vm235_vm3, %v3785_v13 }
0x1bc6   :  { %4055 = vmax.xlane.f32.xlu1 %v4054_v24  ;;  %6799 = vmatpush3.msra.mxu0 %v3098_v30 }
0x1c4f   :  { %v4053_v55 = vpop.xlane.xlu1 %4052 }
0x1c50   :  { %v4057_v31 = vsub.f32 %v4049_v23, %v4053_v55  ;;  %v4292_v23 = vld [vmem:[#allocation2 + $0x1c0] sm:$0xff] }
0x1c51   :  { %v7201_v54 = vpack.c.bf16 %v4292_v23, %v4291_v32 }
0x1c52   :  { %v4059_v34 = vmul.f32 1.442695, %v4057_v31 }
0x1c53   :  { %v4056_v22 = vpop.xlane.xlu1 %4055  ;;  %7202 = vmatprep.subr.bf16.mxu1 %v7201_v54 }
0x1c54   :  { %v4058_v33 = vsub.f32 %v4050_v28, %v4056_v22  ;;  %7204 = vmatpush3.bf16.msra.mxu1 %v7201_v54  ;;  %v7205_v28 = vpack.c.bf16 %v4294_v26, %v4293_v51 }
0x1c56   :  { %v4061_v36 = vmul.f32 1.442695, %v4058_v33  ;;  %7206 = vmatprep.subr.bf16.mxu1 %v7205_v28 }
0x1c58   :  { %7680 = vpow2.f32 %v4061_v36  ;;  %7208 = vmatpush3.bf16.msra.mxu1 %v7205_v28 }
0x1c59   :  { %7682 = vpow2.f32 %v4059_v34  ;;  %v6142_v34 = vld [vmem:[#allocation2 + $0x230] ss:$0 sm:$0xff] }
0x1c62   :  { %v7681_v52 = vpop.eup %7680 }
0x1c63   :  { %v4066_v37 = vsel %vm235_vm3, %v7681_v52, 0.0  ;;  %v7683_v38 = vpop.eup %7682 }
0x1c64   :  { %4067 = vadd.xlane.f32.xlu1 %v4066_v37  ;;  %v4063_v39 = vsel %vm235_vm3, %v7683_v38, 0.0 }
0x1c68   :  { %4064 = vadd.xlane.f32.xlu1 %v4063_v39 }
0x1c79   :  { %7506 = vrot.lane.b32.xlu1 %v8198_v25, %s7805_s23 }
0x1c98   :  { %v6797_v43 = vpop.f32.mrb[32].mxu0 }
0x1c99   :  { %v3864_v40 = vpop.f32.mrb[33].mxu0 }
0x1c9a   :  { %6800 = vmatprep.mubr.msk.f32.mxu0 %vm147_vm1, %v3864_v40 }
0x1c9b   :  { %6801 = vmatmul.mubr.msk.f32.vlgmr.msra.gmra.mrb[30].mxu0 %vm147_vm1, %v6797_v43 }
0x1cf1   :  { %v4068_v41 = vpop.xlane.xlu1 %4067 }
0x1cf2   :  { %7684 = vrcp.f32 %v4068_v41 }
0x1cf5   :  { %v4065_v42 = vpop.xlane.xlu1 %4064 }
0x1cf6   :  { %7686 = vrcp.f32 %v4065_v42  ;;  %v6147_v42 = vld [vmem:[#allocation2 + $0x200] ss:$0 sm:$0xff] }
0x1cf9   :  { %v7507_v46 = vpop.permute.xlu1 %7506 }
0x1cfa   :  { %v7509_v49 = vunpack.i.h.bf16 %v7507_v46  ;;  %v7508_v50 = vunpack.i.l.bf16 %v7507_v46 }
0x1cfc   :  { %v7197_v53 = vpack.c.bf16 %v7509_v49, %v7508_v50  ;;  %v7685_v56 = vpop.eup %7684 }
0x1cfd   :  { %v4072_v57 = vmul.f32 %v7685_v56, %v7681_v52  ;;  %v6143_v52 = vld [vmem:[#allocation2 + $0x238] ss:$0 sm:$0xff] }
0x1cfe   :  { %7198 = vmatprep.subr.bf16.mxu0 %v7197_v53 }
0x1cff   :  { %7200 = vmatpush3.bf16.msra.mxu0 %v7197_v53 }
0x1d00   :  { %v7687_v48 = vpop.eup %7686  ;;  %6817 = vmatprep.subr.mxu0 %v3099_v47 }
0x1d01   :  { %v4071_v25 = vmul.f32 %v7687_v48, %v7683_v38 }
0x1d03   :  { %6814 = vmatprep.mubr.msk.f32.mxu0 %vm235_vm3, %v4071_v25 }
0x1d04   :  { %6815 = vmatmul.mubr.msk.f32.vlgmr.msra.gmra.mrb[34].mxu0 %vm235_vm3, %v4072_v57 }
0x1d05   :  { %6818 = vmatpush3.msra.mxu0 %v3099_v47 }
0x1d06   :  { %7210 = vmatprep.subr.bf16.mxu0 %v7209_v2 }
0x1dd7   :  { %v6816_v58 = vpop.f32.mrb[34].mxu0 }
0x1dd8   :  { %v4151_v59 = vpop.f32.mrb[35].mxu0 }
0x1dd9   :  { %6819 = vmatprep.mubr.msk.f32.mxu0 %vm147_vm1, %v4151_v59 }
0x1dda   :  { %6820 = vmatmul.mubr.msk.f32.vlgmr.msra.gmra.mrb[30].mxu0 %vm147_vm1, %v6816_v58 }
0x1ddb   :  { %6841 = vmatprep.mubr.msk.f32.mxu0 %vm54_vm0, %v7738_v60  ;;  %7212 = vmatpush3.bf16.msra.mxu0 %v7209_v2  ;;  %v8361_v2 = vld [vmem:[%s8516_s3 + $0x8] sm:$0xff]  ;;  %s7806_s3 = smov [#allocation5]  }
0x1ddc   :  { %7214 = vmatprep.subr.bf16.mxu0 %v7213_v10 }
0x1ddf   :  { %7216 = vmatpush3.bf16.msra.mxu0 %v7213_v10 }
0x1de2   :  { %6842 = vmatmul.mubr.msk.f32.vlgmr.msra.gmra.mrb[36].mxu0 %vm54_vm0, %v7739_v12 }
0x1de3   :  { %6844 = vmatprep.mubr.msk.f32.mxu0 %vm54_vm0, %v7740_v19 }
0x1de6   :  { %6845 = vmatmul.mubr.msk.f32.gmra.mrb[38].mxu0 %vm54_vm0, %v7741_v21 }
0x1ead   :  { %v6821_v5 = vpop.f32.mrb[30].mxu0 }
0x1eae   :  { %v4248_v61 = vadd.f32 %v6821_v5, %v6141_v7  ;;  %v4232_v62 = vpop.f32.mrb[31].mxu0 }
0x1eaf   :  { %v4247_v63 = vadd.f32 %v6141_v7, %v4232_v62  ;;  %v6144_v7 = vld [vmem:[#allocation2 + $0x1d8] ss:$0 sm:$0xff] }
0x1eb0   :  { %v4250_v45 = vadd.f32 %v4248_v61, %v8184_v35 }
0x1eb1   :  { %v4249_v0 = vadd.f32 %v4247_v63, %v8182_v20 }
0x1eb2   :  { %v4256_v29 = vsel %vm54_vm0, %v4250_v45, 0.0 }
0x1eb3   :  { %4257 = vadd.xlane.f32.xlu1 %v4256_v29  ;;  %v4253_v27 = vsel %vm54_vm0, %v4249_v0, 0.0 }
0x1eb4   :  { %4254 = vadd.xlane.f32.xlu0 %v4253_v27 }
0x1eb5   :  { %v6843_v46 = vpop.f32.mrb[36].mxu0 }
0x1eb6   :  { %v4462_v49 = vadd.f32 %v6843_v46, %v6147_v42  ;;  %v4456_v50 = vpop.f32.mrb[37].mxu0 }
0x1eb7   :  { %v4457_v53 = vadd.f32 %v6147_v42, %v4456_v50 }
0x1eb9   :  { %v7217_v47 = vpack.c.bf16 %v4462_v49, %v4457_v53  ;;  %v6846_v56 = vpop.f32.mrb[38].mxu0  ;;  %v8332_v57 = vpack.i.bf16 %v4462_v49, %v4457_v53 }
0x1eba   :  { %v4472_v48 = vadd.f32 %v6846_v56, %v6147_v42  ;;  %v4466_v25 = vpop.f32.mrb[39].mxu0 }
0x1ebb   :  { %7219 = vmatprep.subr.msk.bf16.mxu1 %vm7892_vm2, %v7217_v47  ;;  %v4467_v58 = vadd.f32 %v6147_v42, %v4466_v25 }
0x1ebd   :  { %v7223_v59 = vpack.c.bf16 %v4472_v48, %v4467_v58  ;;  %v8340_v60 = vpack.i.bf16 %v4472_v48, %v4467_v58 }
0x1f40   :  { %v4258_v3 = vpop.xlane.xlu1 %4257 }
0x1f41   :  { %v4260_v4 = vmul.f32 0.03125, %v4258_v3  ;;  %v4255_v6 = vpop.xlane.xlu0 %4254 }
0x1f42   :  { %v4259_v8 = vmul.f32 0.03125, %v4255_v6 }
0x1f43   :  { %v4262_v9 = vsub.f32 %v4250_v45, %v4260_v4 }
0x1f44   :  { %v4261_v11 = vsub.f32 %v4249_v0, %v4259_v8 }
0x1f45   :  { %v4264_v14 = vmul.f32 %v4262_v9, %v4262_v9 }
0x1f46   :  { %v4263_v35 = vmul.f32 %v4261_v11, %v4261_v11 }
0x1f47   :  { %v4268_v15 = vsel %vm54_vm0, %v4264_v14, 0.0 }
0x1f48   :  { %v4265_v20 = vsel %vm54_vm0, %v4263_v35, 0.0 }
0x1f49   :  { %4266 = vadd.xlane.f32.xlu0 %v4265_v20 }
0x1f4d   :  { %4269 = vadd.xlane.f32.xlu0 %v4268_v15 }
0x1fd6   :  { %v4267_v13 = vpop.xlane.xlu0 %4266 }
0x1fd7   :  { %v4271_v24 = vmul.f32 0.03125, %v4267_v13 }
0x1fd9   :  { %v4273_v30 = vadd.f32 1e-05, %v4271_v24 }
0x1fda   :  { %v4270_v55 = vpop.xlane.xlu0 %4269 }
0x1fdb   :  { %7688 = vrsqrt.f32 %v4273_v30  ;;  %v4272_v31 = vmul.f32 0.03125, %v4270_v55 }
0x1fdd   :  { %v4274_v22 = vadd.f32 1e-05, %v4272_v31 }
0x1fdf   :  { %7690 = vrsqrt.f32 %v4274_v22 }
0x1fe5   :  { %v7689_v33 = vpop.eup %7688 }
0x1fe6   :  { %v4277_v36 = vmul.f32 %v7689_v33, %v4261_v11 }
0x1fe8   :  { %v4283_v37 = vmul.f32 %v6142_v34, %v4277_v36 }
0x1fe9   :  { %v7691_v38 = vpop.eup %7690 }
0x1fea   :  { %v4278_v39 = vmul.f32 %v7691_v38, %v4262_v9  ;;  %v8324_v43 = vadd.f32 %v6143_v52, %v4283_v37 }
0x1fec   :  { %v4284_v40 = vmul.f32 %v6142_v34, %v4278_v39  ;;  %6830 = vmatprep.mubr.msk.f32.mxu1 %vm54_vm0, %v8324_v43 }
0x1fee   :  { %v8328_v41 = vadd.f32 %v6143_v52, %v4284_v40 }
0x1ff0   :  { %6831 = vmatmul.mubr.msk.f32.vlgmr.msra.gmra.mrb[32].mxu1 %vm54_vm0, %v8328_v41 }
0x1ff1   :  { %7222 = vmatpush3.bf16.xpose.msk.msra.mxu1 %vm7892_vm2, %v7217_v47 }
0x1ff2   :  { %7225 = vmatprep.subr.msk.bf16.mxu1 %vm7892_vm2, %v7223_v59 }
0x1ff9   :  { %7228 = vmatpush3.bf16.xpose.msk.msra.mxu1 %vm7892_vm2, %v7223_v59 }
0x20c3   :  { %v6832_v5 = vpop.f32.mrb[32].mxu1 }
0x20c4   :  { %v4372_v61 = vpop.f32.mrb[33].mxu1  ;;  %v8346_v63 = vadd.f32 %v6832_v5, %v6144_v7 }
0x20c5   :  { %v8344_v62 = vadd.f32 %v6144_v7, %v4372_v61 }
0x20c7   :  { %6855 = vmatprep.mubr.msk.f32.mxu1 %vm147_vm1, %v8344_v62 }
0x20c8   :  { %6856 = vmatmul.mubr.msk.f32.vlgmr.msra.gmra.mrb[34].mxu1 %vm147_vm1, %v8346_v63 }
0x219b   :  { %v6857_v45 = vpop.f32.mrb[34].mxu1 }
0x219c   :  { %v4564_v0 = vpop.f32.mrb[35].mxu1  ;;  %v4574_v29 = vmul.f32 0.35355338, %v6857_v45 }
0x219d   :  { %v4573_v27 = vmul.f32 0.35355338, %v4564_v0 }
0x219e   :  { %v4576_v3 = vadd.f32 %v8361_v2, %v4574_v29 }
0x219f   :  { %v4575_v1 = vadd.f32 %v8355_v44, %v4573_v27 }
0x21a0   :  { %v4580_v6 = vsel %vm54_vm0, %v4576_v3, -inf }
0x21a1   :  { %v4577_v4 = vsel %vm54_vm0, %v4575_v1, -inf }
0x21a2   :  { %4578 = vmax.xlane.f32.xlu0 %v4577_v4 }
0x21a6   :  { %4581 = vmax.xlane.f32.xlu0 %v4580_v6 }
0x222f   :  { %v4579_v8 = vpop.xlane.xlu0 %4578 }
0x2230   :  { %v4583_v9 = vsub.f32 %v4575_v1, %v4579_v8 }
0x2232   :  { %v4585_v11 = vmul.f32 1.442695, %v4583_v9 }
0x2233   :  { %v4582_v35 = vpop.xlane.xlu0 %4581 }
0x2234   :  { %7692 = vpow2.f32 %v4585_v11  ;;  %v4584_v20 = vsub.f32 %v4576_v3, %v4582_v35 }
0x2236   :  { %v4587_v14 = vmul.f32 1.442695, %v4584_v20 }
0x2238   :  { %7694 = vpow2.f32 %v4587_v14 }
0x223e   :  { %v7693_v15 = vpop.eup %7692 }
0x223f   :  { %v4589_v16 = vsel %vm54_vm0, %v7693_v15, 0.0 }
0x2240   :  { %4590 = vadd.xlane.f32.xlu0 %v4589_v16 }
0x2242   :  { %v7695_v18 = vpop.eup %7694 }
0x2243   :  { %v4592_v10 = vsel %vm54_vm0, %v7695_v18, 0.0 }
0x2244   :  { %4593 = vadd.xlane.f32.xlu1 %v4592_v10 }
0x2255   :  { %7516 = vrot.lane.b32.xlu1 %v8340_v60, %s7796_s0 }
0x2256   :  { %7511 = vrot.lane.b32.xlu0 %v8332_v57, %s7796_s0 }
0x2259   :  { %7521 = vrot.lane.b32.xlu1 %v8332_v57, %s7795_s10 }
0x225a   :  { %7526 = vrot.lane.b32.xlu0 %v8340_v60, %s7795_s10 }
0x225d   :  { %4692 = vrot.lane.b32.xlu1 %v8344_v62, %s7795_s10 }
0x225e   :  { %4694 = vrot.lane.b32.xlu0 %v8346_v63, %s7795_s10  ;;  %s5997_s10 = sshll.u32 %s7806_s3, 4  ;;  %s5998_s10 = int_to_ptr.vmem [resolvable:$true] %s5997_s10 }
0x225f   :  { %s7766_s0 = scalar_lea.vmem %s5998_s10, 256  ;;  %p7771_p9 = scmp.lt.s32.totalorder %s5998_s10, %s5998_s10 }
0x2260   :  { %p7767_p8 = scmp.ne.s32.totalorder %s5998_s10, %s7766_s0  ;;  %p7772_p10 = scmp.lt.s32.totalorder %s7766_s0, %s7766_s0 }
0x2261   :  { %7531 = vrot.lane.b32.xlu1 %v8332_v57, %s7798_s12 }
0x2262   :  { %7536 = vrot.lane.b32.xlu0 %v8340_v60, %s7798_s12  ;;  %p7773_p11 = por %p7772_p10, %p7771_p9 }
0x2264   :  { %p7774_p12 = pnand %p7773_p11, %p7767_p8 }
0x2265   :  { %5072 = vrot.lane.b32.xlu1 %v8344_v62, %s7798_s12 }
0x2266   :  { %5074 = vrot.lane.b32.xlu0 %v8346_v63, %s7798_s12 }
0x22cd   :  { %v4591_v12 = vpop.xlane.xlu0 %4590 }
0x22ce   :  { %7696 = vrcp.f32 %v4591_v12 }
0x22d1   :  { %v4594_v19 = vpop.xlane.xlu1 %4593  ;;  %v7512_v21 = vpop.permute.xlu0 %7511 }
0x22d2   :  { %7698 = vrcp.f32 %v4594_v19  ;;  %v7514_v32 = vunpack.i.h.bf16 %v7512_v21  ;;  %v7513_v23 = vunpack.i.l.bf16 %v7512_v21 }
0x22d4   :  { %v7229_v54 = vpack.c.bf16 %v7514_v32, %v7513_v23 }
0x22d5   :  { %v7517_v51 = vpop.permute.xlu1 %7516  ;;  %v7527_v34 = vpop.permute.xlu0 %7526 }
0x22d6   :  { %v7519_v26 = vunpack.i.h.bf16 %v7517_v51  ;;  %v7518_v28 = vunpack.i.l.bf16 %v7517_v51  ;;  %7230 = vmatprep.subr.bf16.mxu0 %v7229_v54  ;;  %v7529_v38 = vunpack.i.h.bf16 %v7527_v34  ;;  %v7528_v39 = vunpack.i.l.bf16 %v7527_v34 }
0x22d7   :  { %7232 = vmatpush3.bf16.msra.mxu0 %v7229_v54 }
0x22d8   :  { %v7697_v13 = vpop.eup %7696  ;;  %v7233_v24 = vpack.c.bf16 %v7519_v26, %v7518_v28  ;;  %v7243_v40 = vpack.c.bf16 %v7529_v38, %v7528_v39 }
0x22d9   :  { %v7522_v30 = vpop.permute.xlu1 %7521  ;;  %v4597_v55 = vmul.f32 %v7697_v13, %v7693_v15  ;;  %v4695_v46 = vpop.permute.xlu0 %4694 }
0x22da   :  { %v7524_v31 = vunpack.i.h.bf16 %v7522_v30  ;;  %v7523_v22 = vunpack.i.l.bf16 %v7522_v30  ;;  %7234 = vmatprep.subr.bf16.mxu0 %v7233_v24 }
0x22db   :  { %7236 = vmatpush3.bf16.msra.mxu0 %v7233_v24  ;;  %6866 = vmatprep.mubr.msk.f32.mxu0 %vm54_vm0, %v4597_v55 }
0x22dc   :  { %v7699_v33 = vpop.eup %7698  ;;  %v7237_v36 = vpack.c.bf16 %v7524_v31, %v7523_v22 }
0x22dd   :  { %v4598_v52 = vmul.f32 %v7699_v33, %v7695_v18  ;;  %v4693_v37 = vpop.permute.xlu1 %4692  ;;  %v7537_v47 = vpop.permute.xlu0 %7536 }
0x22de   :  { %7239 = vmatprep.subr.msk.bf16.mxu0 %vm7892_vm2, %v7237_v36  ;;  %v7539_v56 = vunpack.i.h.bf16 %v7537_v47  ;;  %v7538_v48 = vunpack.i.l.bf16 %v7537_v47 }
0x22df   :  { %6867 = vmatmul.mubr.msk.f32.vlgmr.msra.gmra.mrb[40].mxu0 %vm54_vm0, %v4598_v52 }
0x22e0   :  { %6877 = vmatprep.mubr.msk.f32.mxu0 %vm147_vm1, %v4693_v37  ;;  %v7263_v25 = vpack.c.bf16 %v7539_v56, %v7538_v48 }
0x22e1   :  { %v7532_v42 = vpop.permute.xlu1 %7531  ;;  %v5075_v59 = vpop.permute.xlu0 %5074 }
0x22e2   :  { %v7534_v49 = vunpack.i.h.bf16 %v7532_v42  ;;  %v7533_v50 = vunpack.i.l.bf16 %v7532_v42 }
0x22e4   :  { %7242 = vmatpush3.bf16.xpose.msk.msra.mxu0 %vm7892_vm2, %v7237_v36  ;;  %v7257_v53 = vpack.c.bf16 %v7534_v49, %v7533_v50 }
0x22e5   :  { %7245 = vmatprep.subr.msk.bf16.mxu0 %vm7892_vm2, %v7243_v40  ;;  %v5073_v58 = vpop.permute.xlu1 %5072 }
0x22ec   :  { %7248 = vmatpush3.bf16.xpose.msk.msra.mxu0 %vm7892_vm2, %v7243_v40 }
0x22ed   :  { %7259 = vmatprep.subr.msk.bf16.mxu0 %vm7892_vm2, %v7257_v53 }
0x22f3   :  { %6878 = vmatmul.mubr.msk.f32.vlgmr.msra.gmra.mrb[42].mxu0 %vm147_vm1, %v4695_v46 }
0x22f4   :  { %7262 = vmatpush3.bf16.xpose.msk.msra.mxu0 %vm7892_vm2, %v7257_v53  ;;  %6909 = vmatprep.mubr.msk.f32.mxu0 %vm147_vm1, %v5073_v58  ;;  %v4475_v58 = vld [vmem:[#allocation2 + $0x208] sm:$0xff] }
0x22f5   :  { %7265 = vmatprep.subr.msk.bf16.mxu0 %vm7892_vm2, %v7263_v25 }
0x22fc   :  { %7268 = vmatpush3.bf16.xpose.msk.msra.mxu0 %vm7892_vm2, %v7263_v25  ;;  %v4476_v25 = vld [vmem:[#allocation2 + $0x210] sm:$0xff] }
0x2303   :  { %6910 = vmatmul.mubr.msk.f32.vlgmr.msra.gmra.mrb[44].mxu0 %vm147_vm1, %v5075_v59 }
0x23b2   :  { %v8410_v7 = vpop.f32.mrb[40].mxu0 }
0x23b3   :  { %v8412_v5 = vpop.f32.mrb[41].mxu0 }
0x23c6   :  { %v6879_v61 = vpop.f32.mrb[42].mxu0 }
0x23c7   :  { %v4792_v45 = vmul.f32 0.35355338, %v6879_v61  ;;  %v4782_v0 = vpop.f32.mrb[43].mxu0 }
0x23c8   :  { %v4791_v29 = vmul.f32 0.35355338, %v4782_v0 }
0x23c9   :  { %v4794_v27 = vadd.f32 %v8361_v2, %v4792_v45 }
0x23ca   :  { %v4793_v1 = vadd.f32 %v8355_v44, %v4791_v29 }
0x23cb   :  { %v4798_v3 = vsel %vm54_vm0, %v4794_v27, -inf }
0x23cc   :  { %4799 = vmax.xlane.f32.xlu0 %v4798_v3  ;;  %v4795_v4 = vsel %vm54_vm0, %v4793_v1, -inf }
0x23cd   :  { %4796 = vmax.xlane.f32.xlu1 %v4795_v4 }
0x23d6   :  { %v6911_v6 = vpop.f32.mrb[44].mxu0 }
0x23d7   :  { %v5162_v8 = vpop.f32.mrb[45].mxu0  ;;  %v5172_v21 = vmul.f32 0.35355338, %v6911_v6 }
0x23d8   :  { %v5171_v19 = vmul.f32 0.35355338, %v5162_v8 }
0x23d9   :  { %v5174_v23 = vadd.f32 %v8361_v2, %v5172_v21 }
0x23da   :  { %v5173_v32 = vadd.f32 %v8355_v44, %v5171_v19 }
0x23db   :  { %v5178_v51 = vsel %vm54_vm0, %v5174_v23, -inf }
0x23dc   :  { %v5175_v54 = vsel %vm54_vm0, %v5173_v32, -inf }
0x2459   :  { %v4800_v9 = vpop.xlane.xlu0 %4799 }
0x245a   :  { %v4802_v11 = vsub.f32 %v4794_v27, %v4800_v9  ;;  %v4797_v35 = vpop.xlane.xlu1 %4796 }
0x245b   :  { %v4801_v20 = vsub.f32 %v4793_v1, %v4797_v35 }
0x245c   :  { %v4805_v14 = vmul.f32 1.442695, %v4802_v11 }
0x245d   :  { %v4803_v15 = vmul.f32 1.442695, %v4801_v20  ;;  %v4477_v20 = vld [vmem:[#allocation2 + $0x218] sm:$0xff] }
0x245e   :  { %7700 = vpow2.f32 %v4805_v14 }
0x245f   :  { %7702 = vpow2.f32 %v4803_v15 }
0x2468   :  { %v7701_v16 = vpop.eup %7700 }
0x2469   :  { %v7703_v18 = vpop.eup %7702  ;;  %v4810_v10 = vsel %vm54_vm0, %v7701_v16, 0.0 }
0x246a   :  { %4811 = vadd.xlane.f32.xlu1 %v4810_v10  ;;  %v4807_v12 = vsel %vm54_vm0, %v7703_v18, 0.0 }
0x246b   :  { %4808 = vadd.xlane.f32.xlu0 %v4807_v12 }
0x247b   :  { %7546 = vrot.lane.b32.xlu1 %v8340_v60, %s7797_s11 }
0x2481   :  { %7541 = vrot.lane.b32.xlu0 %v8332_v57, %s7797_s11 }
0x249f   :  { %5176 = vmax.xlane.f32.xlu1 %v5175_v54 }
0x24a0   :  { %5179 = vmax.xlane.f32.xlu0 %v5178_v51 }
0x24f7   :  { %v4812_v26 = vpop.xlane.xlu1 %4811 }
0x24f8   :  { %v4809_v28 = vpop.xlane.xlu0 %4808 }
0x24f9   :  { %7704 = vrcp.f32 %v4809_v28 }
0x24fa   :  { %7706 = vrcp.f32 %v4812_v26 }
0x24fb   :  { %v7547_v13 = vpop.permute.xlu1 %7546 }
0x24fc   :  { %v7542_v24 = vpop.permute.xlu0 %7541  ;;  %v7549_v30 = vunpack.i.h.bf16 %v7547_v13  ;;  %v7548_v55 = vunpack.i.l.bf16 %v7547_v13 }
0x24fd   :  { %v7544_v31 = vunpack.i.h.bf16 %v7542_v24  ;;  %v7543_v22 = vunpack.i.l.bf16 %v7542_v24 }
0x24fe   :  { %v7253_v34 = vpack.c.bf16 %v7549_v30, %v7548_v55 }
0x24ff   :  { %v7249_v33 = vpack.c.bf16 %v7544_v31, %v7543_v22 }
0x2501   :  { %7250 = vmatprep.subr.bf16.mxu1 %v7249_v33 }
0x2502   :  { %7252 = vmatpush3.bf16.msra.mxu1 %v7249_v33 }
0x2503   :  { %v7705_v36 = vpop.eup %7704  ;;  %7254 = vmatprep.subr.bf16.mxu1 %v7253_v34 }
0x2504   :  { %v7707_v52 = vpop.eup %7706  ;;  %v4815_v37 = vmul.f32 %v7705_v36, %v7703_v18 }
0x2505   :  { %v4816_v38 = vmul.f32 %v7707_v52, %v7701_v16 }
0x2506   :  { %7256 = vmatpush3.bf16.msra.mxu1 %v7253_v34  ;;  %6888 = vmatprep.mubr.msk.f32.mxu1 %vm54_vm0, %v4815_v37 }
0x2507   :  { %6891 = vmatprep.subr.mxu1 %v4476_v25 }
0x2509   :  { %6889 = vmatmul.mubr.msk.f32.vlgmr.msra.gmra.mrb[36].mxu1 %vm54_vm0, %v4816_v38  ;;  %v4478_v38 = vld [vmem:[#allocation2 + $0x220] sm:$0xff] }
0x250a   :  { %6892 = vmatpush3.msra.mxu1 %v4476_v25 }
0x250b   :  { %6896 = vmatprep.subr.mxu1 %v4475_v58 }
0x252c   :  { %v5177_v39 = vpop.xlane.xlu1 %5176 }
0x252d   :  { %v5181_v40 = vsub.f32 %v5173_v32, %v5177_v39  ;;  %v5180_v42 = vpop.xlane.xlu0 %5179 }
0x252e   :  { %v5182_v46 = vsub.f32 %v5174_v23, %v5180_v42 }
0x252f   :  { %v5183_v49 = vmul.f32 1.442695, %v5181_v40 }
0x2530   :  { %v5185_v50 = vmul.f32 1.442695, %v5182_v46 }
0x2531   :  { %7708 = vpow2.f32 %v5183_v49 }
0x2532   :  { %7710 = vpow2.f32 %v5185_v50 }
0x253b   :  { %v7709_v53 = vpop.eup %7708 }
0x253c   :  { %v7711_v47 = vpop.eup %7710  ;;  %v5187_v56 = vsel %vm54_vm0, %v7709_v53, 0.0 }
0x253d   :  { %5188 = vadd.xlane.f32.xlu0 %v5187_v56  ;;  %v5190_v48 = vsel %vm54_vm0, %v7711_v47, 0.0 }
0x253e   :  { %5191 = vadd.xlane.f32.xlu1 %v5190_v48 }
0x254f   :  { %7556 = vrot.lane.b32.xlu1 %v8340_v60, %s7799_s13 }
0x2553   :  { %7561 = vrot.lane.b32.xlu1 %v8332_v57, %s7803_s21  ;;  %7551 = vrot.lane.b32.xlu0 %v8332_v57, %s7799_s13 }
0x2557   :  { %5373 = vrot.lane.b32.xlu1 %v8344_v62, %s7803_s21  ;;  %7566 = vrot.lane.b32.xlu0 %v8340_v60, %s7803_s21 }
0x255b   :  { %5375 = vrot.lane.b32.xlu0 %v8346_v63, %s7803_s21 }
0x25ca   :  { %v5189_v59 = vpop.xlane.xlu0 %5188 }
0x25cb   :  { %7712 = vrcp.f32 %v5189_v59  ;;  %v5192_v45 = vpop.xlane.xlu1 %5191 }
0x25cc   :  { %7714 = vrcp.f32 %v5192_v45  ;;  %v6192_v45 = vld [vmem:[#allocation2 + $0x228] ss:$0 sm:$0xff] }
0x25ce   :  { %v7552_v61 = vpop.permute.xlu0 %7551 }
0x25cf   :  { %v7554_v0 = vunpack.i.h.bf16 %v7552_v61  ;;  %v7553_v29 = vunpack.i.l.bf16 %v7552_v61  ;;  %v7557_v3 = vpop.permute.xlu1 %7556 }
0x25d0   :  { %v7559_v4 = vunpack.i.h.bf16 %v7557_v3  ;;  %v7558_v6 = vunpack.i.l.bf16 %v7557_v3 }
0x25d1   :  { %v7269_v62 = vpack.c.bf16 %v7554_v0, %v7553_v29 }
0x25d2   :  { %v7273_v9 = vpack.c.bf16 %v7559_v4, %v7558_v6 }
0x25d3   :  { %v7562_v11 = vpop.permute.xlu1 %7561 }
0x25d4   :  { %v7564_v14 = vunpack.i.h.bf16 %v7562_v11  ;;  %v7563_v15 = vunpack.i.l.bf16 %v7562_v11 }
0x25d5   :  { %v7713_v63 = vpop.eup %7712 }
0x25d6   :  { %v5195_v8 = vmul.f32 %v7713_v63, %v7709_v53  ;;  %v7715_v35 = vpop.eup %7714  ;;  %v7277_v16 = vpack.c.bf16 %v7564_v14, %v7563_v15 }
0x25d7   :  { %v5374_v32 = vpop.permute.xlu1 %5373 }
0x25dc   :  { %v6890_v27 = vpop.f32.mrb[36].mxu1 }
0x25dd   :  { %v4901_v1 = vpop.f32.mrb[37].mxu1 }
0x25de   :  { %6893 = vmatprep.mubr.msk.f32.mxu1 %vm147_vm1, %v4901_v1 }
0x25df   :  { %6894 = vmatmul.mubr.msk.f32.vlgmr.msra.gmra.mrb[38].mxu1 %vm147_vm1, %v6890_v27 }
0x25e0   :  { %6897 = vmatpush3.msra.mxu1 %v4475_v58  ;;  %6898 = vmatprep.mubr.msk.f32.mxu1 %vm147_vm1, %v8412_v5  ;;  %v5196_v5 = vmul.f32 %v7715_v35, %v7711_v47 }
0x25e1   :  { %7270 = vmatprep.subr.bf16.mxu1 %v7269_v62 }
0x25e7   :  { %6899 = vmatmul.mubr.msk.f32.vlgmr.msra.gmra.mrb[38].mxu1 %vm147_vm1, %v8410_v7  ;;  %v7567_v7 = vpop.permute.xlu0 %7566 }
0x25e8   :  { %7272 = vmatpush3.bf16.msra.mxu1 %v7269_v62  ;;  %6920 = vmatprep.mubr.msk.f32.mxu1 %vm54_vm0, %v5195_v8  ;;  %v7569_v18 = vunpack.i.h.bf16 %v7567_v7  ;;  %v7568_v10 = vunpack.i.l.bf16 %v7567_v7 }
0x25e9   :  { %7274 = vmatprep.subr.bf16.mxu1 %v7273_v9 }
0x25ea   :  { %v7283_v21 = vpack.c.bf16 %v7569_v18, %v7568_v10  ;;  %v5724_v18 = vld [vmem:[#allocation2 + $0x270] sm:$0xff]  ;;  %v5725_v10 = vld [vmem:[#allocation2 + $0x278] sm:$0xff] }
0x25eb   :  { %v5376_v23 = vpop.permute.xlu0 %5375 }
0x25ec   :  { %7276 = vmatpush3.bf16.msra.mxu1 %v7273_v9 }
0x25ed   :  { %6923 = vmatprep.subr.mxu1 %v4477_v20 }
0x25ef   :  { %6921 = vmatmul.mubr.msk.f32.vlgmr.msra.gmra.mrb[40].mxu1 %vm54_vm0, %v5196_v5 }
0x25f0   :  { %6924 = vmatpush3.msra.mxu1 %v4477_v20 }
0x25f1   :  { %7279 = vmatprep.subr.msk.bf16.mxu1 %vm7892_vm2, %v7277_v16 }
0x26c2   :  { %v6922_v12 = vpop.f32.mrb[40].mxu1 }
0x26c3   :  { %v5281_v19 = vpop.f32.mrb[41].mxu1 }
0x26c4   :  { %6925 = vmatprep.mubr.msk.f32.mxu1 %vm147_vm1, %v5281_v19  ;;  %v5814_v19 = vld [vmem:[#allocation2 + $0x288] sm:$0xff] }
0x26c5   :  { %6926 = vmatmul.mubr.msk.f32.vlgmr.msra.gmra.mrb[38].mxu1 %vm147_vm1, %v6922_v12  ;;  %v7301_v12 = vpack.c.bf16 %v5725_v10, %v5724_v18  ;;  %v6201_v18 = vld [vmem:[#allocation2 + $0x250] ss:$0 sm:$0xff] }
0x26c6   :  { %7282 = vmatpush3.bf16.xpose.msk.msra.mxu1 %vm7892_vm2, %v7277_v16  ;;  %6936 = vmatprep.mubr.msk.f32.mxu1 %vm147_vm1, %v5374_v32  ;;  %v5723_v16 = vld [vmem:[#allocation2 + $0x268] sm:$0xff] }
0x26c7   :  { %7285 = vmatprep.subr.msk.bf16.mxu1 %vm7892_vm2, %v7283_v21 }
0x26ce   :  { %7288 = vmatpush3.bf16.xpose.msk.msra.mxu1 %vm7892_vm2, %v7283_v21  ;;  %v5815_v21 = vld [vmem:[#allocation2 + $0x290] sm:$0xff] }
0x26cf   :  { %6950 = vmatprep.subr.mxu1 %v4478_v38  ;;  %v7305_v32 = vpack.c.bf16 %v5815_v21, %v5814_v19  ;;  %v6202_v19 = vld [vmem:[#allocation2 + $0x258] ss:$0 sm:$0xff] }
0x26d5   :  { %6937 = vmatmul.mubr.msk.f32.vlgmr.msra.gmra.mrb[42].mxu1 %vm147_vm1, %v5376_v23 }
0x26d6   :  { %6951 = vmatpush3.msra.mxu1 %v4478_v38  ;;  %v5818_v38 = vld [vmem:[#allocation2 + $0x2a8] sm:$0xff] }
0x27a8   :  { %v6938_v54 = vpop.f32.mrb[42].mxu1 }
0x27a9   :  { %v5473_v51 = vmul.f32 0.35355338, %v6938_v54  ;;  %v5463_v26 = vpop.f32.mrb[43].mxu1 }
0x27aa   :  { %v5472_v28 = vmul.f32 0.35355338, %v5463_v26 }
0x27ab   :  { %v5475_v13 = vadd.f32 %v8361_v2, %v5473_v51 }
0x27ac   :  { %v5474_v24 = vadd.f32 %v8355_v44, %v5472_v28 }
0x27ad   :  { %v5479_v30 = vsel %vm54_vm0, %v5475_v13, -inf }
0x27ae   :  { %5480 = vmax.xlane.f32.xlu0 %v5479_v30  ;;  %v5476_v55 = vsel %vm54_vm0, %v5474_v24, -inf  ;;  %v6193_v30 = vld [vmem:[#allocation2 + $0x240] ss:$0 sm:$0xff] }
0x27af   :  { %5477 = vmax.xlane.f32.xlu1 %v5476_v55 }
0x283b   :  { %v5481_v31 = vpop.xlane.xlu0 %5480 }
0x283c   :  { %v5483_v17 = vsub.f32 %v5475_v13, %v5481_v31  ;;  %v5478_v22 = vpop.xlane.xlu1 %5477 }
0x283d   :  { %v5482_v33 = vsub.f32 %v5474_v24, %v5478_v22  ;;  %v6194_v22 = vld [vmem:[#allocation2 + $0x248] ss:$0 sm:$0xff] }
0x283e   :  { %v5486_v34 = vmul.f32 1.442695, %v5483_v17 }
0x283f   :  { %v5484_v36 = vmul.f32 1.442695, %v5482_v33 }
0x2840   :  { %7716 = vpow2.f32 %v5486_v34 }
0x2841   :  { %7718 = vpow2.f32 %v5484_v36  ;;  %v5816_v36 = vld [vmem:[#allocation2 + $0x298] sm:$0xff] }
0x284a   :  { %v7717_v52 = vpop.eup %7716 }
0x284b   :  { %v7719_v37 = vpop.eup %7718  ;;  %v5491_v2 = vsel %vm54_vm0, %v7717_v52, 0.0 }
0x284c   :  { %5492 = vadd.xlane.f32.xlu1 %v5491_v2  ;;  %v5488_v44 = vsel %vm54_vm0, %v7719_v37, 0.0 }
0x284d   :  { %5489 = vadd.xlane.f32.xlu0 %v5488_v44 }
0x285d   :  { %7576 = vrot.lane.b32.xlu1 %v8340_v60, %s7801_s19 }
0x2863   :  { %7571 = vrot.lane.b32.xlu0 %v8332_v57, %s7801_s19 }
0x28d9   :  { %v5493_v39 = vpop.xlane.xlu1 %5492 }
0x28da   :  { %v5490_v40 = vpop.xlane.xlu0 %5489 }
0x28db   :  { %7720 = vrcp.f32 %v5490_v40 }
0x28dc   :  { %7722 = vrcp.f32 %v5493_v39  ;;  %v5819_v39 = vld [vmem:[#allocation2 + $0x2b0] sm:$0xff] }
0x28dd   :  { %v7577_v42 = vpop.permute.xlu1 %7576  ;;  %v7313_v40 = vpack.c.bf16 %v5819_v39, %v5818_v38 }
0x28de   :  { %v7572_v46 = vpop.permute.xlu0 %7571  ;;  %v7579_v49 = vunpack.i.h.bf16 %v7577_v42  ;;  %v7578_v50 = vunpack.i.l.bf16 %v7577_v42  ;;  %v5820_v42 = vld [vmem:[#allocation2 + $0x2b8] sm:$0xff] }
0x28df   :  { %v7574_v53 = vunpack.i.h.bf16 %v7572_v46  ;;  %v7573_v47 = vunpack.i.l.bf16 %v7572_v46  ;;  %v5821_v46 = vld [vmem:[#allocation2 + $0x2c0] sm:$0xff] }
0x28e0   :  { %v7293_v48 = vpack.c.bf16 %v7579_v49, %v7578_v50  ;;  %v7317_v49 = vpack.c.bf16 %v5821_v46, %v5820_v42  ;;  %v6195_v50 = vld [vmem:[#allocation2 + $0x280] ss:$0 sm:$0xff]  ;;  %v6203_v42 = vld [vmem:[#allocation2 + $0x2d0] ss:$0 sm:$0xff] }
0x28e1   :  { %v7289_v56 = vpack.c.bf16 %v7574_v53, %v7573_v47 }
0x28e3   :  { %7290 = vmatprep.subr.bf16.mxu0 %v7289_v56 }
0x28e4   :  { %7292 = vmatpush3.bf16.msra.mxu0 %v7289_v56 }
0x28e5   :  { %v7721_v60 = vpop.eup %7720  ;;  %7294 = vmatprep.subr.bf16.mxu0 %v7293_v48 }
0x28e6   :  { %v7723_v57 = vpop.eup %7722  ;;  %v5496_v25 = vmul.f32 %v7721_v60, %v7719_v37 }
0x28e7   :  { %v5497_v58 = vmul.f32 %v7723_v57, %v7717_v52  ;;  %v5817_v52 = vld [vmem:[#allocation2 + $0x2a0] sm:$0xff] }
0x28e8   :  { %7296 = vmatpush3.bf16.msra.mxu0 %v7293_v48  ;;  %6947 = vmatprep.mubr.msk.f32.mxu0 %vm54_vm0, %v5496_v25  ;;  %v7309_v44 = vpack.c.bf16 %v5817_v52, %v5816_v36  ;;  %v6198_v25 = vld [vmem:[#allocation2 + $0x2c8] ss:$0 sm:$0xff] }
0x28eb   :  { %6948 = vmatmul.mubr.msk.f32.vlgmr.msra.gmra.mrb[46].mxu0 %vm54_vm0, %v5497_v58 }
0x29be   :  { %v6949_v59 = vpop.f32.mrb[46].mxu0 }
0x29bf   :  { %v5582_v61 = vpop.f32.mrb[47].mxu0 }
0x29c0   :  { %6952 = vmatprep.mubr.msk.f32.mxu1 %vm147_vm1, %v5582_v61 }
0x29c1   :  { %6953 = vmatmul.mubr.msk.f32.vlgmr.msra.gmra.mrb[38].mxu1 %vm147_vm1, %v6949_v59 }
0x2a94   :  { %v6954_v0 = vpop.f32.mrb[38].mxu1 }
0x2a95   :  { %v5679_v29 = vadd.f32 %v6954_v0, %v6192_v45  ;;  %v5663_v27 = vpop.f32.mrb[39].mxu1 }
0x2a96   :  { %v5678_v1 = vadd.f32 %v6192_v45, %v5663_v27 }
0x2a97   :  { %v5681_v62 = vadd.f32 %v5679_v29, %v8328_v41 }
0x2a98   :  { %v5680_v3 = vadd.f32 %v5678_v1, %v8324_v43  ;;  %v5722_v43 = vld [vmem:[#allocation2 + $0x260] sm:$0xff] }
0x2a99   :  { %v5687_v63 = vsel %vm54_vm0, %v5681_v62, 0.0  ;;  %v7297_v7 = vpack.c.bf16 %v5723_v16, %v5722_v43 }
0x2a9a   :  { %5688 = vadd.xlane.f32.xlu0 %v5687_v63  ;;  %v5684_v4 = vsel %vm54_vm0, %v5680_v3, 0.0 }
0x2a9b   :  { %5685 = vadd.xlane.f32.xlu1 %v5684_v4  ;;  %7298 = vmatprep.subr.bf16.mxu0 %v7297_v7 }
0x2a9c   :  { %7300 = vmatpush3.bf16.msra.mxu0 %v7297_v7 }
0x2a9d   :  { %7302 = vmatprep.subr.bf16.mxu0 %v7301_v12 }
0x2aa0   :  { %7304 = vmatpush3.bf16.msra.mxu0 %v7301_v12 }
0x2aa1   :  { %7306 = vmatprep.subr.bf16.mxu0 %v7305_v32 }
0x2b27   :  { %v5689_v6 = vpop.xlane.xlu0 %5688 }
0x2b28   :  { %v5691_v8 = vmul.f32 0.03125, %v5689_v6  ;;  %v5686_v9 = vpop.xlane.xlu1 %5685 }
0x2b29   :  { %v5690_v11 = vmul.f32 0.03125, %v5686_v9 }
0x2b2a   :  { %v5693_v35 = vsub.f32 %v5681_v62, %v5691_v8 }
0x2b2b   :  { %v5692_v20 = vsub.f32 %v5680_v3, %v5690_v11 }
0x2b2c   :  { %v5695_v14 = vmul.f32 %v5693_v35, %v5693_v35 }
0x2b2d   :  { %v5694_v15 = vmul.f32 %v5692_v20, %v5692_v20 }
0x2b2e   :  { %v5699_v5 = vsel %vm54_vm0, %v5695_v14, 0.0 }
0x2b2f   :  { %5700 = vadd.xlane.f32.xlu1 %v5699_v5  ;;  %v5696_v41 = vsel %vm54_vm0, %v5694_v15, 0.0 }
0x2b30   :  { %5697 = vadd.xlane.f32.xlu0 %v5696_v41 }
0x2bbc   :  { %v5701_v23 = vpop.xlane.xlu1 %5700 }
0x2bbd   :  { %v5703_v54 = vmul.f32 0.03125, %v5701_v23  ;;  %v5698_v51 = vpop.xlane.xlu0 %5697 }
0x2bbe   :  { %v5702_v26 = vmul.f32 0.03125, %v5698_v51 }
0x2bbf   :  { %v5705_v28 = vadd.f32 1e-05, %v5703_v54 }
0x2bc0   :  { %v5704_v13 = vadd.f32 1e-05, %v5702_v26 }
0x2bc1   :  { %7724 = vrsqrt.f32 %v5705_v28 }
0x2bc2   :  { %7726 = vrsqrt.f32 %v5704_v13 }
0x2bcb   :  { %v7725_v24 = vpop.eup %7724 }
0x2bcc   :  { %v7727_v55 = vpop.eup %7726  ;;  %v5709_v31 = vmul.f32 %v7725_v24, %v5693_v35 }
0x2bcd   :  { %v5708_v17 = vmul.f32 %v7727_v55, %v5692_v20 }
0x2bce   :  { %v5715_v33 = vmul.f32 %v6193_v30, %v5709_v31 }
0x2bcf   :  { %v5714_v34 = vmul.f32 %v6193_v30, %v5708_v17 }
0x2bd0   :  { %v5721_v2 = vadd.f32 %v6194_v22, %v5715_v33 }
0x2bd1   :  { %v5720_v37 = vadd.f32 %v6194_v22, %v5714_v34 }
0x2bd3   :  { %6963 = vmatprep.mubr.msk.f32.mxu0 %vm54_vm0, %v5720_v37 }
0x2bd4   :  { %6964 = vmatmul.mubr.msk.f32.vlgmr.msra.gmra.mrb[48].mxu0 %vm54_vm0, %v5721_v2 }
0x2bd5   :  { %7308 = vmatpush3.bf16.msra.mxu0 %v7305_v32 }
0x2bd6   :  { %7310 = vmatprep.subr.bf16.mxu0 %v7309_v44 }
0x2bd9   :  { %7312 = vmatpush3.bf16.msra.mxu0 %v7309_v44 }
0x2bda   :  { %7314 = vmatprep.subr.bf16.mxu0 %v7313_v40 }
0x2bdd   :  { %7316 = vmatpush3.bf16.msra.mxu0 %v7313_v40 }
0x2bde   :  { %7318 = vmatprep.subr.bf16.mxu0 %v7317_v49 }
0x2be1   :  { %7320 = vmatpush3.bf16.msra.mxu0 %v7317_v49 }
0x2ca7   :  { %v6965_v53 = vpop.f32.mrb[48].mxu0 }
0x2ca8   :  { %v5809_v47 = vadd.f32 %v6965_v53, %v6195_v50  ;;  %v5803_v56 = vpop.f32.mrb[49].mxu0  ;;  %v6204_v53 = vld [vmem:[#allocation2 + $0x2d8] ss:$0 sm:$0xff] }
0x2ca9   :  { %v5804_v48 = vadd.f32 %v6195_v50, %v5803_v56 }
0x2caa   :  { %v5813_v57 = vmax.f32 %v5809_v47, 0.0 }
0x2cab   :  { %v5812_v60 = vmax.f32 %v5804_v48, 0.0 }
0x2cad   :  { %6982 = vmatprep.mubr.msk.f32.mxu0 %vm2882_vm4, %v5812_v60 }
0x2cae   :  { %6983 = vmatmul.mubr.msk.f32.vlgmr.msra.gmra.mrb[50].mxu0 %vm2882_vm4, %v5813_v57 }
0x2d81   :  { %v6984_v58 = vpop.f32.mrb[50].mxu0 }
0x2d82   :  { %v5905_v59 = vadd.f32 %v6984_v58, %v6198_v25  ;;  %v5899_v61 = vpop.f32.mrb[51].mxu0 }
0x2d83   :  { %v5900_v45 = vadd.f32 %v6198_v25, %v5899_v61 }
0x2d84   :  { %v5909_v0 = vadd.f32 %v5905_v59, %v5721_v2 }
0x2d85   :  { %v5908_v29 = vadd.f32 %v5900_v45, %v5720_v37 }
0x2d86   :  { %v5915_v27 = vsel %vm54_vm0, %v5909_v0, 0.0 }
0x2d87   :  { %5916 = vadd.xlane.f32.xlu1 %v5915_v27  ;;  %v5912_v1 = vsel %vm54_vm0, %v5908_v29, 0.0 }
0x2d88   :  { %5913 = vadd.xlane.f32.xlu0 %v5912_v1 }
0x2e14   :  { %v5917_v62 = vpop.xlane.xlu1 %5916 }
0x2e15   :  { %v5919_v3 = vmul.f32 0.03125, %v5917_v62  ;;  %v5914_v63 = vpop.xlane.xlu0 %5913 }
0x2e16   :  { %v5918_v4 = vmul.f32 0.03125, %v5914_v63 }
0x2e17   :  { %v5921_v6 = vsub.f32 %v5909_v0, %v5919_v3 }
0x2e18   :  { %v5920_v8 = vsub.f32 %v5908_v29, %v5918_v4 }
0x2e19   :  { %v5923_v9 = vmul.f32 %v5921_v6, %v5921_v6 }
0x2e1a   :  { %v5922_v11 = vmul.f32 %v5920_v8, %v5920_v8 }
0x2e1b   :  { %v5927_v35 = vsel %vm54_vm0, %v5923_v9, 0.0 }
0x2e1c   :  { %5928 = vadd.xlane.f32.xlu1 %v5927_v35  ;;  %v5924_v20 = vsel %vm54_vm0, %v5922_v11, 0.0 }
0x2e1d   :  { %5925 = vadd.xlane.f32.xlu0 %v5924_v20 }
0x2ea9   :  { %v5929_v14 = vpop.xlane.xlu1 %5928 }
0x2eaa   :  { %v5931_v15 = vmul.f32 0.03125, %v5929_v14  ;;  %v5926_v5 = vpop.xlane.xlu0 %5925 }
0x2eab   :  { %v5930_v41 = vmul.f32 0.03125, %v5926_v5 }
0x2eac   :  { %v5933_v43 = vadd.f32 1e-05, %v5931_v15 }
0x2ead   :  { %v5932_v16 = vadd.f32 1e-05, %v5930_v41 }
0x2eae   :  { %7728 = vrsqrt.f32 %v5933_v43 }
0x2eaf   :  { %7730 = vrsqrt.f32 %v5932_v16 }
0x2eb8   :  { %v7729_v7 = vpop.eup %7728 }
0x2eb9   :  { %v7731_v10 = vpop.eup %7730  ;;  %v5937_v12 = vmul.f32 %v7729_v7, %v5921_v6 }
0x2eba   :  { %v5936_v21 = vmul.f32 %v7731_v10, %v5920_v8 }
0x2ebb   :  { %v5943_v32 = vmul.f32 %v6201_v18, %v5937_v12 }
0x2ebc   :  { %v5942_v23 = vmul.f32 %v6201_v18, %v5936_v21 }
0x2ebd   :  { %v5949_v54 = vadd.f32 %v6202_v19, %v5943_v32 }
0x2ebe   :  { %v5948_v51 = vadd.f32 %v6202_v19, %v5942_v23 }
0x2ebf   :  { %v5955_v26 = vsel %vm54_vm0, %v5949_v54, 0.0 }
0x2ec0   :  { %5956 = vadd.xlane.f32.xlu1 %v5955_v26  ;;  %v5952_v28 = vsel %vm54_vm0, %v5948_v51, 0.0 }
0x2ec1   :  { %5953 = vadd.xlane.f32.xlu0 %v5952_v28 }
0x2f4d   :  { %v5957_v13 = vpop.xlane.xlu1 %5956 }
0x2f4e   :  { %v5959_v24 = vmul.f32 0.03125, %v5957_v13  ;;  %v5954_v30 = vpop.xlane.xlu0 %5953 }
0x2f4f   :  { %v5958_v55 = vmul.f32 0.03125, %v5954_v30 }
0x2f50   :  { %v5961_v31 = vsub.f32 %v5949_v54, %v5959_v24 }
0x2f51   :  { %v5960_v17 = vsub.f32 %v5948_v51, %v5958_v55 }
0x2f52   :  { %v5963_v22 = vmul.f32 %v5961_v31, %v5961_v31 }
0x2f53   :  { %v5962_v33 = vmul.f32 %v5960_v17, %v5960_v17 }
0x2f54   :  { %v5967_v34 = vsel %vm54_vm0, %v5963_v22, 0.0 }
0x2f55   :  { %5968 = vadd.xlane.f32.xlu1 %v5967_v34  ;;  %v5964_v36 = vsel %vm54_vm0, %v5962_v33, 0.0 }
0x2f56   :  { %5965 = vadd.xlane.f32.xlu0 %v5964_v36 }
0x2fe2   :  { %v5969_v52 = vpop.xlane.xlu1 %5968 }
0x2fe3   :  { %v5971_v37 = vmul.f32 0.03125, %v5969_v52  ;;  %v5966_v2 = vpop.xlane.xlu0 %5965 }
0x2fe4   :  { %v5970_v44 = vmul.f32 0.03125, %v5966_v2 }
0x2fe5   :  { %v5973_v38 = vadd.f32 1e-05, %v5971_v37 }
0x2fe6   :  { %v5972_v39 = vadd.f32 1e-05, %v5970_v44 }
0x2fe7   :  { %7732 = vrsqrt.f32 %v5973_v38 }
0x2fe8   :  { %7734 = vrsqrt.f32 %v5972_v39 }
0x2ff1   :  { %v7733_v40 = vpop.eup %7732 }
0x2ff2   :  { %v7735_v46 = vpop.eup %7734  ;;  %v5977_v49 = vmul.f32 %v7733_v40, %v5961_v31 }
0x2ff3   :  { %v5976_v50 = vmul.f32 %v7735_v46, %v5960_v17 }
0x2ff4   :  { %v5983_v47 = vmul.f32 %v6203_v42, %v5977_v49 }
0x2ff5   :  { %v5982_v56 = vmul.f32 %v6203_v42, %v5976_v50 }
0x2ff6   :  { %v5989_v48 = vadd.f32 %v6204_v53, %v5983_v47 }
0x2ff7   :  { %v5988_v60 = vadd.f32 %v6204_v53, %v5982_v56 }
0x2ff8   :  { %5991 = vst.msk [vmem:[#allocation5 + $0x8] sm:$0xff] %vm54_vm0, %v5989_v48 }
0x2ff9   :  { %5990 = vst.msk [vmem:[#allocation5] sm:$0xff] %vm54_vm0, %v5988_v60 }
0x2ffa   :  { %7777 = shalt.err (!%p7774_p12)
}
0x2ffb   :  { %s7778_s13 = scalar_lea.hbm %s8518_s5, 256 }
0x2ffc   :  { %p7779_p13 = scmp.ne.s32.totalorder %s8518_s5, %s7778_s13  ;;  %p7782_p0 = scmp.lt.u32.totalorder %s7778_s13, %s8518_s5 }
0x2ffe   :  { %p7784_p1 = pnand %p7782_p0, %p7779_p13 }
0x3000   :  { %7787 = shalt.err (!%p7784_p1)
}
0x3001   :  { %6003 = dma.vmem_to_hbm [thread:$0]  %s5998_s10, 256, %s8518_s5, [#allocation4], %s7793_s28, %s7793_s28, %s7794_s29  }
0x3002   :  { %7790 = dma.done.wait [#allocation4], 256  }
0x3003   :  { %7791 = vsyncadd [#allocation4], 4294967040 }
0x3004   :  { %6007 = vsyncpa [#allocation3], 1 }
0x3005   :  { %6008 = vsyncpa [#allocation4], 1 }

</bundles_post_ra>
